<compile_context>
chip_gen: v7x
topology: tpu7x:2x2x1
jax: 0.10.0
libtpu: 0.0.40
codegen_flags: <defaults>
</compile_context>

<pallas_src>
import jax
import jax.numpy as jnp
import numpy as np
from jax.experimental import pallas as pl
from jax.experimental.pallas import tpu as pltpu

EPS = 1e-5  # nn.BatchNorm2d default eps
LANE = 128


def _round_up(x, m):
    return ((x + m - 1) // m) * m


def _make_kernel(W, band, halo8, cmid_p, n_total):
    taps = [(dy, dx) for dy in (-1, 0, 1) for dx in (-1, 0, 1)]

    def kernel(x_ref, wd_ref, w1_ref, w2_ref, w3_ref, wfc1_ref, wfc2_ref,
               bm_ref, bo_ref, o_ref,
               h1_ref, h2_ref, slab_ref, pool_ref, gate_ref):
        phase = pl.program_id(1)
        t = pl.program_id(2)
        n_tiles = pl.num_programs(2)

        # ----------------- phase 0: conv1 (1x1, BN scale pre-folded) --------
        @pl.when(phase == 0)
        def _phase_conv1():
            b1 = bm_ref[0:1, :]
            h1 = jnp.dot(x_ref[0], w1_ref[...],
                         preferred_element_type=jnp.float32)
            h1 = jnp.maximum(h1 + b1, 0.0).astype(jnp.bfloat16)
            h1_ref[t, halo8:halo8 + band, :] = h1

            # Replicate the shared rows into the neighbours' halo regions so
            # phase 1 only ever slices statically inside its own band entry.
            @pl.when(t > 0)
            def _():
                h1_ref[t - 1, halo8 + band:halo8 + band + halo8, :] = \
                    h1[:halo8, :]

            @pl.when(t < n_tiles - 1)
            def _():
                h1_ref[t + 1, 0:halo8, :] = h1[band - halo8:, :]

            # Image-edge halos read as zeros (vertically out-of-image taps).
            # Re-zeroed per image: with the batch axis "parallel" each
            # TensorCore owns its own scratch and may never see b == 0.
            @pl.when(t == 0)
            def _():
                h1_ref[0, 0:halo8, :] = jnp.zeros((halo8, cmid_p),
                                                  jnp.bfloat16)
                pool_ref[...] = jnp.zeros_like(pool_ref)

            @pl.when(t == n_tiles - 1)
            def _():
                h1_ref[n_tiles - 1, halo8 + band:halo8 + band + halo8, :] = \
                    jnp.zeros((halo8, cmid_p), jnp.bfloat16)

        # -------- phase 1: conv2 (3x3, im2col) + SE pool accumulation -------
        @pl.when(phase == 1)
        def _phase_conv2():
            b2 = bm_ref[1:2, :]
            # Horizontal edge masks (a band is a whole number of image rows,
            # so the in-band column index equals the image column index).
            col = jax.lax.broadcasted_iota(jnp.int32, (band, 1), 0) % W
            not_left = col != 0
            not_right = col != (W - 1)
            for i, (dy, dx) in enumerate(taps):
                s = dy * W + dx
                tap = h1_ref[t, halo8 + s:halo8 + s + band, :]
                if dx == -1:
                    tap = jnp.where(not_left, tap, 0.0)
                elif dx == 1:
                    tap = jnp.where(not_right, tap, 0.0)
                slab_ref[:, i * cmid_p:(i + 1) * cmid_p] = tap
            h2 = jnp.dot(slab_ref[...], w2_ref[...],
                         preferred_element_type=jnp.float32)
            h2 = jnp.maximum(h2 + b2, 0.0)
            h2_ref[t] = h2.astype(jnp.bfloat16)
            # SE pool on h2 (exact: conv3+BN is affine in h2, so
            # mean(h3) == mean(h2) @ w3_folded + b3).  Cheaper reduction and
            # the gate is available before any h3 is materialised.
            pool_ref[...] += jnp.sum(h2, axis=0, keepdims=True)

        # ------ phase 2: SE gate, conv3 (1x1), identity, residual, ReLU -----
        @pl.when(phase == 2)
        def _phase_out():
            bd = bo_ref[0:1, :]
            b3 = bo_ref[1:2, :]

            @pl.when(t == 0)
            def _():
                mean_h2 = pool_ref[...] * (1.0 / n_total)
                m3 = jnp.dot(mean_h2.astype(jnp.bfloat16), w3_ref[...],
                             preferred_element_type=jnp.float32) + b3
                y = jnp.maximum(
                    jnp.dot(m3.astype(jnp.bfloat16), wfc1_ref[...],
                            preferred_element_type=jnp.float32), 0.0)
                y = jnp.dot(y.astype(jnp.bfloat16), wfc2_ref[...],
                            preferred_element_type=jnp.float32)
                gate_ref[...] = jax.nn.sigmoid(y)

            h3 = jnp.dot(h2_ref[t], w3_ref[...],
                         preferred_element_type=jnp.float32) + b3
            identity = jnp.dot(x_ref[0], wd_ref[...],
                               preferred_element_type=jnp.float32) + bd
            o_ref[0] = jnp.maximum(h3 * gate_ref[...] + identity,
                                   0.0).astype(o_ref.dtype)

    return kernel


def residual_block_with_se(x_nchw, kp, *, tile_h=None):
    """x_nchw: (B, Cin, H, W) float32. Returns (B, Cout, H, W)."""
    B, Cin, H, W = x_nchw.shape
    cmid_p, cout_p, cout = kp["cmid_p"], kp["cout_p"], kp["cout"]

    halo8 = _round_up(W + 1, 16)          # bf16 sublane-pack aligned halo
    if tile_h is None:
        tile_h = H
        for d in range(H, 0, -1):         # largest divisor with band <= ~2048 rows
            if H % d == 0 and d * W <= 2048 and (d == H or d * W >= halo8):
                tile_h = d
                break
    assert H % tile_h == 0, "tile_h must divide H"
    n_tiles = H // tile_h
    band = tile_h * W
    n_total = H * W
    assert n_tiles == 1 or (band % 8 == 0 and band >= halo8), \
        "row band too small / unaligned for the 3x3 halo"

    # NCHW -> channels-last rows; cast to bf16 once (the MXU consumes bf16
    # anyway, and it halves x's HBM read traffic).  In a channels-last network
    # these transposes disappear entirely.
    # TODO(synk): keep channels-last end-to-end / bf16 output if the consumer
    # accepts it -- kept NCHW f32 here to honor the PyTorch interface.
    x_rows = jnp.transpose(x_nchw, (0, 2, 3, 1)).reshape(B, n_total, Cin)
    x_rows = x_rows.astype(jnp.bfloat16)

    operands = (x_rows, kp["wd"], kp["w1"], kp["w2"], kp["w3"],
                kp["wfc1"], kp["wfc2"], kp["b_mid"], kp["b_out"])

    def rep_spec(a):  # grid-invariant (small, padded) array, fetched once
        return pl.BlockSpec(a.shape, lambda b, p, t, _nd=a.ndim: (0,) * _nd)

    # x is needed in phases 0 and 2; park it on tile 0 during phase 1.
    in_specs = [pl.BlockSpec(
        (1, band, Cin), lambda b, p, t: (b, jnp.where(p == 1, 0, t), 0))]
    in_specs += [rep_spec(a) for a in operands[1:]]
    # Output blocks are written only in phase 2; parking the index on tile 0
    # during phases 0/1 means no stale buffer is ever flushed to HBM.
    out_spec = pl.BlockSpec(
        (1, band, cout_p), lambda b, p, t: (b, jnp.where(p == 2, t, 0), 0))

    scratch_shapes = [
        pltpu.VMEM((n_tiles, band + 2 * halo8, cmid_p), jnp.bfloat16),  # h1(+halo)
        pltpu.VMEM((n_tiles, band, cmid_p), jnp.bfloat16),              # h2
        pltpu.VMEM((band, 9 * cmid_p), jnp.bfloat16),                   # im2col slab
        pltpu.VMEM((1, cmid_p), jnp.float32),                           # SE pooled sum
        pltpu.VMEM((1, cout_p), jnp.float32),                           # SE gate
    ]

    # Resident-VMEM estimate -> per-generation scoped limit (v7x: 64 MiB
    # physical per core vs 128 MiB on v5e/v6e).
    est = 0
    for a in operands[1:]:
        est += 2 * int(np.prod(a.shape)) * a.dtype.itemsize   # double-buffered
    est += 2 * band * Cin * 2              # x block (bf16, double-buffered)
    est += 2 * band * cout_p * 4           # out block (f32, double-buffered)
    est += (n_tiles * (band + 2 * halo8) * cmid_p * 2
            + n_tiles * band * cmid_p * 2
            + band * 9 * cmid_p * 2
            + (cmid_p + cout_p) * 4)
    try:
        vmem_cap = pltpu.get_tpu_info().vmem_capacity_bytes
    except Exception:
        vmem_cap = 64 * 1024 * 1024        # conservative (v7x per-core VMEM)
    vmem_limit = int(min(max(2 * est, 32 * 1024 * 1024), vmem_cap * 3 // 4))

    out_rows = pl.pallas_call(
        _make_kernel(W, band, halo8, cmid_p, n_total),
        out_shape=jax.ShapeDtypeStruct((B, n_total, cout_p), jnp.float32),
        grid_spec=pltpu.PrefetchScalarGridSpec(
            num_scalar_prefetch=0,
            grid=(B, 3, n_tiles),
            in_specs=in_specs,
            out_specs=out_spec,
            scratch_shapes=scratch_shapes),
        compiler_params=pltpu.CompilerParams(
            dimension_semantics=("parallel", "arbitrary", "arbitrary"),
            vmem_limit_bytes=vmem_limit),
    )(*operands)

    out = out_rows[:, :, :cout].reshape(B, H, W, cout)
    return jnp.transpose(out, (0, 3, 1, 2))


# ------------------------- parameters (deterministic) -------------------------

def init_torch_params(key, in_channels, out_channels, reduction=16):
    cmid = out_channels // 4
    cred = out_channels // reduction
    ks = list(jax.random.split(key, 10))

    def w(k, shape, std=0.15):
        return (std * jax.random.normal(k, shape)).astype(jnp.float32)

    def bn(k, c):
        k1, k2, k3, k4 = jax.random.split(k, 4)
        gamma = (1.0 + 0.1 * jax.random.normal(k1, (c,))).astype(jnp.float32)
        beta = (0.1 * jax.random.normal(k2, (c,))).astype(jnp.float32)
        mean = (0.1 * jax.random.normal(k3, (c,))).astype(jnp.float32)
        var = jnp.abs(1.0 + 0.1 * jax.random.normal(k4, (c,))).astype(jnp.float32)
        return (gamma, beta, mean, var)

    return dict(
        conv1_w=w(ks[0], (cmid, in_channels, 1, 1)),   # OIHW
        conv2_w=w(ks[1], (cmid, cmid, 3, 3)),
        conv3_w=w(ks[2], (out_channels, cmid, 1, 1)),
        down_w=w(ks[3], (out_channels, in_channels, 1, 1)),
        fc1_w=w(ks[4], (cred, out_channels)),          # Linear (out, in)
        fc2_w=w(ks[5], (out_channels, cred)),
        bn1=bn(ks[6], cmid), bn2=bn(ks[7], cmid),
        bn3=bn(ks[8], out_channels), bnd=bn(ks[9], out_channels),
    )


def _bn_scale_bias(bn):
    gamma, beta, mean, var = bn
    scale = gamma / jnp.sqrt(var + EPS)
    bias = beta - mean * scale
    return scale, bias


def _pad_axis(a, axis, target):
    pad = target - a.shape[axis]
    if pad == 0:
        return a
    widths = [(0, 0)] * a.ndim
    widths[axis] = (0, pad)
    return jnp.pad(a, widths)


def to_kernel_params(p):
    cmid = p["conv1_w"].shape[0]
    cout = p["conv3_w"].shape[0]
    cred = p["fc1_w"].shape[0]
    cmid_p = _round_up(cmid, LANE)
    cout_p = _round_up(cout, LANE)
    cred_p = _round_up(cred, LANE)

    s1, b1 = _bn_scale_bias(p["bn1"])
    s2, b2 = _bn_scale_bias(p["bn2"])
    s3, b3 = _bn_scale_bias(p["bn3"])
    sd, bd = _bn_scale_bias(p["bnd"])

    # BN scales folded into the bf16 weight columns; only bias epilogues remain
    # inside the kernel.
    w1 = _pad_axis(p["conv1_w"][:, :, 0, 0].T * s1[None, :], 1,
                   cmid_p).astype(jnp.bfloat16)
    wd = _pad_axis(p["down_w"][:, :, 0, 0].T * sd[None, :], 1,
                   cout_p).astype(jnp.bfloat16)
    w3 = _pad_axis(_pad_axis(p["conv3_w"][:, :, 0, 0].T * s3[None, :], 0,
                             cmid_p), 1, cout_p).astype(jnp.bfloat16)
    # conv2 weight: OIHW -> (ky, kx, Cin, Cout) * s2, pad channels, flatten to
    # the im2col layout (tap-major rows) matching the kernel's slab columns.
    w2t = jnp.transpose(p["conv2_w"], (2, 3, 1, 0)) * s2[None, None, None, :]
    w2t = _pad_axis(_pad_axis(w2t, 2, cmid_p), 3, cmid_p)
    w2 = w2t.reshape(9 * cmid_p, cmid_p).astype(jnp.bfloat16)
    wfc1 = _pad_axis(_pad_axis(p["fc1_w"].T, 0, cout_p), 1,
                     cred_p).astype(jnp.bfloat16)
    wfc2 = _pad_axis(_pad_axis(p["fc2_w"].T, 0, cred_p), 1,
                     cout_p).astype(jnp.bfloat16)

    b_mid = jnp.stack([_pad_axis(b1, 0, cmid_p),
                       _pad_axis(b2, 0, cmid_p)]).astype(jnp.float32)
    b_out = jnp.stack([_pad_axis(bd, 0, cout_p),
                       _pad_axis(b3, 0, cout_p)]).astype(jnp.float32)

    return dict(wd=wd, w1=w1, w2=w2, w3=w3, wfc1=wfc1, wfc2=wfc2,
                b_mid=b_mid, b_out=b_out,
                cmid_p=cmid_p, cout_p=cout_p, cout=cout)


# ------------------------------ pure-JAX reference -----------------------------

def reference_forward(x, p):
    def conv(inp, w, padding):
        return jax.lax.conv_general_dilated(
            inp, w, window_strides=(1, 1), padding=padding,
            dimension_numbers=("NCHW", "OIHW", "NCHW"))

    def bn(inp, params):
        gamma, beta, mean, var = (a.reshape(1, -1, 1, 1) for a in params)
        return gamma * (inp - mean) / jnp.sqrt(var + EPS) + beta

    identity = bn(conv(x, p["down_w"], "VALID"), p["bnd"])
    out = jax.nn.relu(bn(conv(x, p["conv1_w"], "VALID"), p["bn1"]))
    out = jax.nn.relu(bn(conv(out, p["conv2_w"], [(1, 1), (1, 1)]), p["bn2"]))
    out = bn(conv(out, p["conv3_w"], "VALID"), p["bn3"])
    b_, c_, _, _ = out.shape
    y = jnp.mean(out, axis=(2, 3))                 # (B, C) global avg pool
    y = jax.nn.relu(y @ p["fc1_w"].T)
    y = jax.nn.sigmoid(y @ p["fc2_w"].T)
    out = out * y.reshape(b_, c_, 1, 1)
    out = out + identity
    return jax.nn.relu(out)


if __name__ == "__main__":
    key = jax.random.PRNGKey(0)
    kx, kp = jax.random.split(key)
    B, Cin, H, W = 2, 8, 16, 16
    Cout = 32                                     # must be >= 16 (SE reduction)
    x = jax.random.normal(kx, (B, Cin, H, W), dtype=jnp.float32)

    torch_params = init_torch_params(kp, Cin, Cout)
    kernel_params = to_kernel_params(torch_params)

    # tile_h=8 -> 2 row-bands per image: exercises the banded path (halo
    # replication + cross-band SE accumulation) at a small problem size.
    out = residual_block_with_se(x, kernel_params, tile_h=8)
    out = jax.block_until_ready(out)

    ref = jax.block_until_ready(reference_forward(x, torch_params))
    assert out.shape == ref.shape == (B, Cout, H, W)
    np.testing.assert_allclose(np.asarray(out), np.asarray(ref),
                               atol=5e-2, rtol=5e-2)
    print("KERNEL_OK")
</pallas_src>

<mosaic_0001>
module attributes {stable_mosaic.version = 11 : i64} {
  func.func @kernel(%arg0: i32, %arg1: i32, %arg2: i32, %arg3: memref<1x128x8xbf16, #tpu.memory_space<vmem>>, %arg4: memref<8x128xbf16, #tpu.memory_space<vmem>>, %arg5: memref<8x128xbf16, #tpu.memory_space<vmem>>, %arg6: memref<1152x128xbf16, #tpu.memory_space<vmem>>, %arg7: memref<128x128xbf16, #tpu.memory_space<vmem>>, %arg8: memref<128x128xbf16, #tpu.memory_space<vmem>>, %arg9: memref<128x128xbf16, #tpu.memory_space<vmem>>, %arg10: memref<2x128xf32, #tpu.memory_space<vmem>>, %arg11: memref<2x128xf32, #tpu.memory_space<vmem>>, %arg12: memref<1x128x128xf32, #tpu.memory_space<vmem>>, %arg13: memref<2x192x128xbf16, #tpu.memory_space<vmem>>, %arg14: memref<2x128x128xbf16, #tpu.memory_space<vmem>>, %arg15: memref<128x1152xbf16, #tpu.memory_space<vmem>>, %arg16: memref<1x128xf32, #tpu.memory_space<vmem>>, %arg17: memref<1x128xf32, #tpu.memory_space<vmem>>) attributes {dimension_semantics = [#tpu.dimension_semantics<parallel>, #tpu.dimension_semantics<arbitrary>, #tpu.dimension_semantics<arbitrary>], iteration_bounds = array<i64: 2, 3, 2>, scalar_prefetch = 0 : i64, scratch_operands = 5 : i64, tpu.core_type = #tpu.core_type<tc>, window_params = [{transform_indices = @transform_0, window_bounds = array<i64: 1, 128, 8>}, {pipeline_mode = #tpu.pipeline_mode<synchronous>, transform_indices = @transform_1, window_bounds = array<i64: 8, 128>}, {pipeline_mode = #tpu.pipeline_mode<synchronous>, transform_indices = @transform_2, window_bounds = array<i64: 8, 128>}, {pipeline_mode = #tpu.pipeline_mode<synchronous>, transform_indices = @transform_3, window_bounds = array<i64: 1152, 128>}, {pipeline_mode = #tpu.pipeline_mode<synchronous>, transform_indices = @transform_4, window_bounds = array<i64: 128, 128>}, {pipeline_mode = #tpu.pipeline_mode<synchronous>, transform_indices = @transform_5, window_bounds = array<i64: 128, 128>}, {pipeline_mode = #tpu.pipeline_mode<synchronous>, transform_indices = @transform_6, window_bounds = array<i64: 128, 128>}, {pipeline_mode = #tpu.pipeline_mode<synchronous>, transform_indices = @transform_7, window_bounds = array<i64: 2, 128>}, {pipeline_mode = #tpu.pipeline_mode<synchronous>, transform_indices = @transform_8, window_bounds = array<i64: 2, 128>}, {transform_indices = @transform_9, window_bounds = array<i64: 1, 128, 128>}]} {
    %c0_i32 = arith.constant 0 : i32
    %0 = arith.cmpi eq, %arg1, %c0_i32 : i32
    %1 = arith.extui %0 : i1 to i32
    %c0_i32_0 = arith.constant 0 : i32
    %2 = arith.cmpi ne, %1, %c0_i32_0 : i32
    scf.if %2 {
      %c0 = arith.constant 0 : index
      %c0_3 = arith.constant 0 : index
      %9 = vector.load %arg10[%c0, %c0_3] : memref<2x128xf32, #tpu.memory_space<vmem>>, vector<1x128xf32>
      %c0_4 = arith.constant 0 : index
      %c0_5 = arith.constant 0 : index
      %c0_6 = arith.constant 0 : index
      %10 = vector.load %arg3[%c0_4, %c0_5, %c0_6] : memref<1x128x8xbf16, #tpu.memory_space<vmem>>, vector<1x128x8xbf16>
      %11 = vector.shape_cast %10 : vector<1x128x8xbf16> to vector<128x8xbf16>
      %c0_7 = arith.constant 0 : index
      %c0_8 = arith.constant 0 : index
      %12 = vector.load %arg5[%c0_7, %c0_8] : memref<8x128xbf16, #tpu.memory_space<vmem>>, vector<8x128xbf16>
      %cst = arith.constant dense<0.000000e+00> : vector<128x128xf32>
      %13 = tpu.matmul %11, %12, %cst {dimension_numbers = #tpu.dot_dimension_numbers<[1], [0], [0], [1], [0, 0, 1, 1], [], []>} : vector<128x8xbf16>, vector<8x128xbf16>, vector<128x128xf32> -> vector<128x128xf32>
      %14 = vector.broadcast %9 : vector<1x128xf32> to vector<128x128xf32>
      %15 = arith.addf %13, %14 : vector<128x128xf32>
      %cst_9 = arith.constant 0.000000e+00 : f32
      %16 = vector.broadcast %cst_9 : f32 to vector<128x128xf32>
      %17 = arith.maximumf %15, %16 : vector<128x128xf32>
      %18 = arith.truncf %17 : vector<128x128xf32> to vector<128x128xbf16>
      %19 = arith.index_cast %arg2 : i32 to index
      %c32 = arith.constant 32 : index
      %c0_10 = arith.constant 0 : index
      %20 = vector.load %arg13[%19, %c32, %c0_10] : memref<2x192x128xbf16, #tpu.memory_space<vmem>>, vector<1x128x128xbf16>
      %21 = vector.shape_cast %20 : vector<1x128x128xbf16> to vector<128x128xbf16>
      %22 = vector.shape_cast %18 : vector<128x128xbf16> to vector<1x128x128xbf16>
      tpu.vector_store %arg13[%19, %c32, %c0_10], %22 {strides = array<i32>} : memref<2x192x128xbf16, #tpu.memory_space<vmem>>, vector<1x128x128xbf16>,
      %c0_i32_11 = arith.constant 0 : i32
      %23 = arith.cmpi sgt, %arg2, %c0_i32_11 : i32
      %24 = arith.extui %23 : i1 to i32
      %c0_i32_12 = arith.constant 0 : i32
      %25 = arith.cmpi ne, %24, %c0_i32_12 : i32
      scf.if %25 {
        %35 = vector.extract_strided_slice %18 {offsets = [0, 0], sizes = [32, 128], strides = [1, 1]} : vector<128x128xbf16> to vector<32x128xbf16>
        %c1_i32_19 = arith.constant 1 : i32
        %36 = arith.subi %arg2, %c1_i32_19 : i32
        %37 = arith.index_cast %36 : i32 to index
        %c160 = arith.constant 160 : index
        %c0_20 = arith.constant 0 : index
        %38 = vector.load %arg13[%37, %c160, %c0_20] : memref<2x192x128xbf16, #tpu.memory_space<vmem>>, vector<1x32x128xbf16>
        %39 = vector.shape_cast %38 : vector<1x32x128xbf16> to vector<32x128xbf16>
        %40 = vector.shape_cast %35 : vector<32x128xbf16> to vector<1x32x128xbf16>
        tpu.vector_store %arg13[%37, %c160, %c0_20], %40 {strides = array<i32>} : memref<2x192x128xbf16, #tpu.memory_space<vmem>>, vector<1x32x128xbf16>,
      } else {
      }
      %c1_i32_13 = arith.constant 1 : i32
      %26 = arith.cmpi slt, %arg2, %c1_i32_13 : i32
      %27 = arith.extui %26 : i1 to i32
      %c0_i32_14 = arith.constant 0 : i32
      %28 = arith.cmpi ne, %27, %c0_i32_14 : i32
      scf.if %28 {
        %35 = vector.extract_strided_slice %18 {offsets = [96, 0], sizes = [32, 128], strides = [1, 1]} : vector<128x128xbf16> to vector<32x128xbf16>
        %c1_i32_19 = arith.constant 1 : i32
        %36 = arith.addi %arg2, %c1_i32_19 : i32
        %37 = arith.index_cast %36 : i32 to index
        %c0_20 = arith.constant 0 : index
        %c0_21 = arith.constant 0 : index
        %38 = vector.load %arg13[%37, %c0_20, %c0_21] : memref<2x192x128xbf16, #tpu.memory_space<vmem>>, vector<1x32x128xbf16>
        %39 = vector.shape_cast %38 : vector<1x32x128xbf16> to vector<32x128xbf16>
        %40 = vector.shape_cast %35 : vector<32x128xbf16> to vector<1x32x128xbf16>
        tpu.vector_store %arg13[%37, %c0_20, %c0_21], %40 {strides = array<i32>} : memref<2x192x128xbf16, #tpu.memory_space<vmem>>, vector<1x32x128xbf16>,
      } else {
      }
      %c0_i32_15 = arith.constant 0 : i32
      %29 = arith.cmpi eq, %arg2, %c0_i32_15 : i32
      %30 = arith.extui %29 : i1 to i32
      %c0_i32_16 = arith.constant 0 : i32
      %31 = arith.cmpi ne, %30, %c0_i32_16 : i32
      scf.if %31 {
        %cst_19 = arith.constant 0.000000e+00 : bf16
        %35 = vector.broadcast %cst_19 : bf16 to vector<32x128xbf16>
        %c0_20 = arith.constant 0 : index
        %c0_21 = arith.constant 0 : index
        %c0_22 = arith.constant 0 : index
        %36 = vector.load %arg13[%c0_20, %c0_21, %c0_22] : memref<2x192x128xbf16, #tpu.memory_space<vmem>>, vector<1x32x128xbf16>
        %37 = vector.shape_cast %36 : vector<1x32x128xbf16> to vector<32x128xbf16>
        %38 = vector.shape_cast %35 : vector<32x128xbf16> to vector<1x32x128xbf16>
        tpu.vector_store %arg13[%c0_20, %c0_21, %c0_22], %38 {strides = array<i32>} : memref<2x192x128xbf16, #tpu.memory_space<vmem>>, vector<1x32x128xbf16>,
        %cst_23 = arith.constant 0.000000e+00 : f32
        %39 = vector.broadcast %cst_23 : f32 to vector<1x128xf32>
        %c0_24 = arith.constant 0 : index
        %c0_25 = arith.constant 0 : index
        %40 = vector.load %arg16[%c0_24, %c0_25] : memref<1x128xf32, #tpu.memory_space<vmem>>, vector<1x128xf32>
        tpu.vector_store %arg16[%c0_24, %c0_25], %39 {strides = array<i32>} : memref<1x128xf32, #tpu.memory_space<vmem>>, vector<1x128xf32>,
      } else {
      }
      %c1_i32_17 = arith.constant 1 : i32
      %32 = arith.cmpi eq, %arg2, %c1_i32_17 : i32
      %33 = arith.extui %32 : i1 to i32
      %c0_i32_18 = arith.constant 0 : i32
      %34 = arith.cmpi ne, %33, %c0_i32_18 : i32
      scf.if %34 {
        %cst_19 = arith.constant 0.000000e+00 : bf16
        %35 = vector.broadcast %cst_19 : bf16 to vector<32x128xbf16>
        %c1 = arith.constant 1 : index
        %c160 = arith.constant 160 : index
        %c0_20 = arith.constant 0 : index
        %36 = vector.load %arg13[%c1, %c160, %c0_20] : memref<2x192x128xbf16, #tpu.memory_space<vmem>>, vector<1x32x128xbf16>
        %37 = vector.shape_cast %36 : vector<1x32x128xbf16> to vector<32x128xbf16>
        %38 = vector.shape_cast %35 : vector<32x128xbf16> to vector<1x32x128xbf16>
        tpu.vector_store %arg13[%c1, %c160, %c0_20], %38 {strides = array<i32>} : memref<2x192x128xbf16, #tpu.memory_space<vmem>>, vector<1x32x128xbf16>,
      } else {
      }
    } else {
    }
    %c1_i32 = arith.constant 1 : i32
    %3 = arith.cmpi eq, %arg1, %c1_i32 : i32
    %4 = arith.extui %3 : i1 to i32
    %c0_i32_1 = arith.constant 0 : i32
    %5 = arith.cmpi ne, %4, %c0_i32_1 : i32
    scf.if %5 {
      %c1 = arith.constant 1 : index
      %c0 = arith.constant 0 : index
      %9 = vector.load %arg10[%c1, %c0] : memref<2x128xf32, #tpu.memory_space<vmem>>, vector<1x128xf32>
      %10 = tpu.iota {dimensions = array<i32: 0>} : vector<128x1xi32>
      %c16_i32 = arith.constant 16 : i32
      %c0_i32_3 = arith.constant 0 : i32
      %11 = arith.cmpi eq, %c16_i32, %c0_i32_3 : i32
      %c1_i32_4 = arith.constant 1 : i32
      %12 = arith.select %11, %c1_i32_4, %c16_i32 : i32
      %13 = vector.broadcast %12 : i32 to vector<128x1xi32>
      %14 = arith.remsi %10, %13 : vector<128x1xi32>
      %c0_i32_5 = arith.constant 0 : i32
      %15 = vector.broadcast %c0_i32_5 : i32 to vector<128x1xi32>
      %16 = arith.cmpi ne, %14, %15 : vector<128x1xi32>
      %c0_i32_6 = arith.constant 0 : i32
      %17 = vector.broadcast %c0_i32_6 : i32 to vector<128x1xi32>
      %18 = arith.cmpi slt, %14, %17 : vector<128x1xi32>
      %c0_i32_7 = arith.constant 0 : i32
      %19 = arith.cmpi slt, %12, %c0_i32_7 : i32
      %20 = vector.broadcast %19 : i1 to vector<128x1xi1>
      %21 = vector.broadcast %20 : vector<128x1xi1> to vector<128x1xi1>
      %22 = arith.xori %18, %21 : vector<128x1xi1>
      %23 = arith.andi %22, %16 : vector<128x1xi1>
      %24 = vector.broadcast %12 : i32 to vector<128x1xi32>
      %25 = arith.addi %14, %24 : vector<128x1xi32>
      %26 = arith.select %23, %25, %14 : vector<128x1xi1>, vector<128x1xi32>
      %c0_i32_8 = arith.constant 0 : i32
      %27 = vector.broadcast %c0_i32_8 : i32 to vector<128x1xi32>
      %28 = arith.cmpi ne, %26, %27 : vector<128x1xi32>
      %c15_i32 = arith.constant 15 : i32
      %29 = vector.broadcast %c15_i32 : i32 to vector<128x1xi32>
      %30 = arith.cmpi ne, %26, %29 : vector<128x1xi32>
      %31 = arith.index_cast %arg2 : i32 to index
      %c15 = arith.constant 15 : index
      %c0_9 = arith.constant 0 : index
      %32 = vector.load %arg13[%31, %c15, %c0_9] : memref<2x192x128xbf16, #tpu.memory_space<vmem>>, vector<1x128x128xbf16>
      %33 = vector.shape_cast %32 : vector<1x128x128xbf16> to vector<128x128xbf16>
      %cst = arith.constant 0.000000e+00 : f32
      %34 = arith.truncf %cst : f32 to bf16
      %35 = vector.shape_cast %28 : vector<128x1xi1> to vector<128x1xi1>
      %36 = vector.broadcast %35 : vector<128x1xi1> to vector<128x128xi1>
      %37 = vector.broadcast %34 : bf16 to vector<128x128xbf16>
      %38 = arith.select %36, %33, %37 : vector<128x128xi1>, vector<128x128xbf16>
      %c0_10 = arith.constant 0 : index
      %c0_11 = arith.constant 0 : index
      %39 = vector.load %arg15[%c0_10, %c0_11] : memref<128x1152xbf16, #tpu.memory_space<vmem>>, vector<128x128xbf16>
      tpu.vector_store %arg15[%c0_10, %c0_11], %38 {strides = array<i32>} : memref<128x1152xbf16, #tpu.memory_space<vmem>>, vector<128x128xbf16>,
      %40 = arith.index_cast %arg2 : i32 to index
      %c16 = arith.constant 16 : index
      %c0_12 = arith.constant 0 : index
      %41 = vector.load %arg13[%40, %c16, %c0_12] : memref<2x192x128xbf16, #tpu.memory_space<vmem>>, vector<1x128x128xbf16>
      %42 = vector.shape_cast %41 : vector<1x128x128xbf16> to vector<128x128xbf16>
      %c0_13 = arith.constant 0 : index
      %c128 = arith.constant 128 : index
      %43 = vector.load %arg15[%c0_13, %c128] : memref<128x1152xbf16, #tpu.memory_space<vmem>>, vector<128x128xbf16>
      tpu.vector_store %arg15[%c0_13, %c128], %42 {strides = array<i32>} : memref<128x1152xbf16, #tpu.memory_space<vmem>>, vector<128x128xbf16>,
      %44 = arith.index_cast %arg2 : i32 to index
      %c17 = arith.constant 17 : index
      %c0_14 = arith.constant 0 : index
      %45 = vector.load %arg13[%44, %c17, %c0_14] : memref<2x192x128xbf16, #tpu.memory_space<vmem>>, vector<1x128x128xbf16>
      %46 = vector.shape_cast %45 : vector<1x128x128xbf16> to vector<128x128xbf16>
      %cst_15 = arith.constant 0.000000e+00 : f32
      %47 = arith.truncf %cst_15 : f32 to bf16
      %48 = vector.shape_cast %30 : vector<128x1xi1> to vector<128x1xi1>
      %49 = vector.broadcast %48 : vector<128x1xi1> to vector<128x128xi1>
      %50 = vector.broadcast %47 : bf16 to vector<128x128xbf16>
      %51 = arith.select %49, %46, %50 : vector<128x128xi1>, vector<128x128xbf16>
      %c0_16 = arith.constant 0 : index
      %c256 = arith.constant 256 : index
      %52 = vector.load %arg15[%c0_16, %c256] : memref<128x1152xbf16, #tpu.memory_space<vmem>>, vector<128x128xbf16>
      tpu.vector_store %arg15[%c0_16, %c256], %51 {strides = array<i32>} : memref<128x1152xbf16, #tpu.memory_space<vmem>>, vector<128x128xbf16>,
      %53 = arith.index_cast %arg2 : i32 to index
      %c31 = arith.constant 31 : index
      %c0_17 = arith.constant 0 : index
      %54 = vector.load %arg13[%53, %c31, %c0_17] : memref<2x192x128xbf16, #tpu.memory_space<vmem>>, vector<1x128x128xbf16>
      %55 = vector.shape_cast %54 : vector<1x128x128xbf16> to vector<128x128xbf16>
      %cst_18 = arith.constant 0.000000e+00 : f32
      %56 = arith.truncf %cst_18 : f32 to bf16
      %57 = vector.shape_cast %28 : vector<128x1xi1> to vector<128x1xi1>
      %58 = vector.broadcast %57 : vector<128x1xi1> to vector<128x128xi1>
      %59 = vector.broadcast %56 : bf16 to vector<128x128xbf16>
      %60 = arith.select %58, %55, %59 : vector<128x128xi1>, vector<128x128xbf16>
      %c0_19 = arith.constant 0 : index
      %c384 = arith.constant 384 : index
      %61 = vector.load %arg15[%c0_19, %c384] : memref<128x1152xbf16, #tpu.memory_space<vmem>>, vector<128x128xbf16>
      tpu.vector_store %arg15[%c0_19, %c384], %60 {strides = array<i32>} : memref<128x1152xbf16, #tpu.memory_space<vmem>>, vector<128x128xbf16>,
      %62 = arith.index_cast %arg2 : i32 to index
      %c32 = arith.constant 32 : index
      %c0_20 = arith.constant 0 : index
      %63 = vector.load %arg13[%62, %c32, %c0_20] : memref<2x192x128xbf16, #tpu.memory_space<vmem>>, vector<1x128x128xbf16>
      %64 = vector.shape_cast %63 : vector<1x128x128xbf16> to vector<128x128xbf16>
      %c0_21 = arith.constant 0 : index
      %c512 = arith.constant 512 : index
      %65 = vector.load %arg15[%c0_21, %c512] : memref<128x1152xbf16, #tpu.memory_space<vmem>>, vector<128x128xbf16>
      tpu.vector_store %arg15[%c0_21, %c512], %64 {strides = array<i32>} : memref<128x1152xbf16, #tpu.memory_space<vmem>>, vector<128x128xbf16>,
      %66 = arith.index_cast %arg2 : i32 to index
      %c33 = arith.constant 33 : index
      %c0_22 = arith.constant 0 : index
      %67 = vector.load %arg13[%66, %c33, %c0_22] : memref<2x192x128xbf16, #tpu.memory_space<vmem>>, vector<1x128x128xbf16>
      %68 = vector.shape_cast %67 : vector<1x128x128xbf16> to vector<128x128xbf16>
      %cst_23 = arith.constant 0.000000e+00 : f32
      %69 = arith.truncf %cst_23 : f32 to bf16
      %70 = vector.shape_cast %30 : vector<128x1xi1> to vector<128x1xi1>
      %71 = vector.broadcast %70 : vector<128x1xi1> to vector<128x128xi1>
      %72 = vector.broadcast %69 : bf16 to vector<128x128xbf16>
      %73 = arith.select %71, %68, %72 : vector<128x128xi1>, vector<128x128xbf16>
      %c0_24 = arith.constant 0 : index
      %c640 = arith.constant 640 : index
      %74 = vector.load %arg15[%c0_24, %c640] : memref<128x1152xbf16, #tpu.memory_space<vmem>>, vector<128x128xbf16>
      tpu.vector_store %arg15[%c0_24, %c640], %73 {strides = array<i32>} : memref<128x1152xbf16, #tpu.memory_space<vmem>>, vector<128x128xbf16>,
      %75 = arith.index_cast %arg2 : i32 to index
      %c47 = arith.constant 47 : index
      %c0_25 = arith.constant 0 : index
      %76 = vector.load %arg13[%75, %c47, %c0_25] : memref<2x192x128xbf16, #tpu.memory_space<vmem>>, vector<1x128x128xbf16>
      %77 = vector.shape_cast %76 : vector<1x128x128xbf16> to vector<128x128xbf16>
      %cst_26 = arith.constant 0.000000e+00 : f32
      %78 = arith.truncf %cst_26 : f32 to bf16
      %79 = vector.shape_cast %28 : vector<128x1xi1> to vector<128x1xi1>
      %80 = vector.broadcast %79 : vector<128x1xi1> to vector<128x128xi1>
      %81 = vector.broadcast %78 : bf16 to vector<128x128xbf16>
      %82 = arith.select %80, %77, %81 : vector<128x128xi1>, vector<128x128xbf16>
      %c0_27 = arith.constant 0 : index
      %c768 = arith.constant 768 : index
      %83 = vector.load %arg15[%c0_27, %c768] : memref<128x1152xbf16, #tpu.memory_space<vmem>>, vector<128x128xbf16>
      tpu.vector_store %arg15[%c0_27, %c768], %82 {strides = array<i32>} : memref<128x1152xbf16, #tpu.memory_space<vmem>>, vector<128x128xbf16>,
      %84 = arith.index_cast %arg2 : i32 to index
      %c48 = arith.constant 48 : index
      %c0_28 = arith.constant 0 : index
      %85 = vector.load %arg13[%84, %c48, %c0_28] : memref<2x192x128xbf16, #tpu.memory_space<vmem>>, vector<1x128x128xbf16>
      %86 = vector.shape_cast %85 : vector<1x128x128xbf16> to vector<128x128xbf16>
      %c0_29 = arith.constant 0 : index
      %c896 = arith.constant 896 : index
      %87 = vector.load %arg15[%c0_29, %c896] : memref<128x1152xbf16, #tpu.memory_space<vmem>>, vector<128x128xbf16>
      tpu.vector_store %arg15[%c0_29, %c896], %86 {strides = array<i32>} : memref<128x1152xbf16, #tpu.memory_space<vmem>>, vector<128x128xbf16>,
      %88 = arith.index_cast %arg2 : i32 to index
      %c49 = arith.constant 49 : index
      %c0_30 = arith.constant 0 : index
      %89 = vector.load %arg13[%88, %c49, %c0_30] : memref<2x192x128xbf16, #tpu.memory_space<vmem>>, vector<1x128x128xbf16>
      %90 = vector.shape_cast %89 : vector<1x128x128xbf16> to vector<128x128xbf16>
      %cst_31 = arith.constant 0.000000e+00 : f32
      %91 = arith.truncf %cst_31 : f32 to bf16
      %92 = vector.shape_cast %30 : vector<128x1xi1> to vector<128x1xi1>
      %93 = vector.broadcast %92 : vector<128x1xi1> to vector<128x128xi1>
      %94 = vector.broadcast %91 : bf16 to vector<128x128xbf16>
      %95 = arith.select %93, %90, %94 : vector<128x128xi1>, vector<128x128xbf16>
      %c0_32 = arith.constant 0 : index
      %c1024 = arith.constant 1024 : index
      %96 = vector.load %arg15[%c0_32, %c1024] : memref<128x1152xbf16, #tpu.memory_space<vmem>>, vector<128x128xbf16>
      tpu.vector_store %arg15[%c0_32, %c1024], %95 {strides = array<i32>} : memref<128x1152xbf16, #tpu.memory_space<vmem>>, vector<128x128xbf16>,
      %c0_33 = arith.constant 0 : index
      %c0_34 = arith.constant 0 : index
      %97 = vector.load %arg15[%c0_33, %c0_34] : memref<128x1152xbf16, #tpu.memory_space<vmem>>, vector<128x1152xbf16>
      %c0_35 = arith.constant 0 : index
      %c0_36 = arith.constant 0 : index
      %98 = vector.load %arg6[%c0_35, %c0_36] : memref<1152x128xbf16, #tpu.memory_space<vmem>>, vector<1152x128xbf16>
      %cst_37 = arith.constant dense<0.000000e+00> : vector<128x128xf32>
      %99 = tpu.matmul %97, %98, %cst_37 {dimension_numbers = #tpu.dot_dimension_numbers<[1], [0], [0], [1], [0, 0, 1, 1], [], []>} : vector<128x1152xbf16>, vector<1152x128xbf16>, vector<128x128xf32> -> vector<128x128xf32>
      %100 = vector.broadcast %9 : vector<1x128xf32> to vector<128x128xf32>
      %101 = arith.addf %99, %100 : vector<128x128xf32>
      %cst_38 = arith.constant 0.000000e+00 : f32
      %102 = vector.broadcast %cst_38 : f32 to vector<128x128xf32>
      %103 = arith.maximumf %101, %102 : vector<128x128xf32>
      %104 = arith.truncf %103 : vector<128x128xf32> to vector<128x128xbf16>
      %105 = arith.index_cast %arg2 : i32 to index
      %c0_39 = arith.constant 0 : index
      %c0_40 = arith.constant 0 : index
      %106 = vector.load %arg14[%105, %c0_39, %c0_40] : memref<2x128x128xbf16, #tpu.memory_space<vmem>>, vector<1x128x128xbf16>
      %107 = vector.shape_cast %106 : vector<1x128x128xbf16> to vector<128x128xbf16>
      %108 = vector.shape_cast %104 : vector<128x128xbf16> to vector<1x128x128xbf16>
      tpu.vector_store %arg14[%105, %c0_39, %c0_40], %108 {strides = array<i32>} : memref<2x128x128xbf16, #tpu.memory_space<vmem>>, vector<1x128x128xbf16>,
      %c0_41 = arith.constant 0 : index
      %c0_42 = arith.constant 0 : index
      %109 = vector.load %arg16[%c0_41, %c0_42] : memref<1x128xf32, #tpu.memory_space<vmem>>, vector<1x128xf32>
      %cst_43 = arith.constant dense<0.000000e+00> : vector<128xf32>
      %110 = vector.multi_reduction <add>, %103, %cst_43 [0] : vector<128x128xf32> to vector<128xf32>
      %111 = vector.shape_cast %110 : vector<128xf32> to vector<1x128xf32>
      %112 = arith.addf %109, %111 : vector<1x128xf32>
      %c0_44 = arith.constant 0 : index
      %c0_45 = arith.constant 0 : index
      %113 = vector.load %arg16[%c0_44, %c0_45] : memref<1x128xf32, #tpu.memory_space<vmem>>, vector<1x128xf32>
      tpu.vector_store %arg16[%c0_44, %c0_45], %112 {strides = array<i32>} : memref<1x128xf32, #tpu.memory_space<vmem>>, vector<1x128xf32>,
    } else {
    }
    %c2_i32 = arith.constant 2 : i32
    %6 = arith.cmpi eq, %arg1, %c2_i32 : i32
    %7 = arith.extui %6 : i1 to i32
    %c0_i32_2 = arith.constant 0 : i32
    %8 = arith.cmpi ne, %7, %c0_i32_2 : i32
    scf.if %8 {
      %c0 = arith.constant 0 : index
      %c0_3 = arith.constant 0 : index
      %9 = vector.load %arg11[%c0, %c0_3] : memref<2x128xf32, #tpu.memory_space<vmem>>, vector<1x128xf32>
      %c1 = arith.constant 1 : index
      %c0_4 = arith.constant 0 : index
      %10 = vector.load %arg11[%c1, %c0_4] : memref<2x128xf32, #tpu.memory_space<vmem>>, vector<1x128xf32>
      %c0_i32_5 = arith.constant 0 : i32
      %11 = arith.cmpi eq, %arg2, %c0_i32_5 : i32
      %12 = arith.extui %11 : i1 to i32
      %c0_i32_6 = arith.constant 0 : i32
      %13 = arith.cmpi ne, %12, %c0_i32_6 : i32
      scf.if %13 {
        %c0_23 = arith.constant 0 : index
        %c0_24 = arith.constant 0 : index
        %36 = vector.load %arg16[%c0_23, %c0_24] : memref<1x128xf32, #tpu.memory_space<vmem>>, vector<1x128xf32>
        %cst_25 = arith.constant 3.906250e-03 : f32
        %37 = vector.broadcast %cst_25 : f32 to vector<1x128xf32>
        %38 = arith.mulf %36, %37 : vector<1x128xf32>
        %39 = arith.truncf %38 : vector<1x128xf32> to vector<1x128xbf16>
        %c0_26 = arith.constant 0 : index
        %c0_27 = arith.constant 0 : index
        %40 = vector.load %arg7[%c0_26, %c0_27] : memref<128x128xbf16, #tpu.memory_space<vmem>>, vector<128x128xbf16>
        %cst_28 = arith.constant dense<0.000000e+00> : vector<1x128xf32>
        %41 = tpu.matmul %39, %40, %cst_28 {dimension_numbers = #tpu.dot_dimension_numbers<[1], [0], [0], [1], [0, 0, 1, 1], [], []>} : vector<1x128xbf16>, vector<128x128xbf16>, vector<1x128xf32> -> vector<1x128xf32>
        %42 = arith.addf %41, %10 : vector<1x128xf32>
        %43 = arith.truncf %42 : vector<1x128xf32> to vector<1x128xbf16>
        %c0_29 = arith.constant 0 : index
        %c0_30 = arith.constant 0 : index
        %44 = vector.load %arg8[%c0_29, %c0_30] : memref<128x128xbf16, #tpu.memory_space<vmem>>, vector<128x128xbf16>
        %cst_31 = arith.constant dense<0.000000e+00> : vector<1x128xf32>
        %45 = tpu.matmul %43, %44, %cst_31 {dimension_numbers = #tpu.dot_dimension_numbers<[1], [0], [0], [1], [0, 0, 1, 1], [], []>} : vector<1x128xbf16>, vector<128x128xbf16>, vector<1x128xf32> -> vector<1x128xf32>
        %cst_32 = arith.constant 0.000000e+00 : f32
        %46 = vector.broadcast %cst_32 : f32 to vector<1x128xf32>
        %47 = arith.maximumf %45, %46 : vector<1x128xf32>
        %48 = arith.truncf %47 : vector<1x128xf32> to vector<1x128xbf16>
        %c0_33 = arith.constant 0 : index
        %c0_34 = arith.constant 0 : index
        %49 = vector.load %arg9[%c0_33, %c0_34] : memref<128x128xbf16, #tpu.memory_space<vmem>>, vector<128x128xbf16>
        %cst_35 = arith.constant dense<0.000000e+00> : vector<1x128xf32>
        %50 = tpu.matmul %48, %49, %cst_35 {dimension_numbers = #tpu.dot_dimension_numbers<[1], [0], [0], [1], [0, 0, 1, 1], [], []>} : vector<1x128xbf16>, vector<128x128xbf16>, vector<1x128xf32> -> vector<1x128xf32>
        %51 = arith.negf %50 : vector<1x128xf32>
        %52 = math.exp %51 : vector<1x128xf32>
        %cst_36 = arith.constant 1.000000e+00 : f32
        %53 = vector.broadcast %cst_36 : f32 to vector<1x128xf32>
        %54 = arith.addf %53, %52 : vector<1x128xf32>
        %55 = arith.divf %53, %54 : vector<1x128xf32>
        %c0_37 = arith.constant 0 : index
        %c0_38 = arith.constant 0 : index
        %56 = vector.load %arg17[%c0_37, %c0_38] : memref<1x128xf32, #tpu.memory_space<vmem>>, vector<1x128xf32>
        tpu.vector_store %arg17[%c0_37, %c0_38], %55 {strides = array<i32>} : memref<1x128xf32, #tpu.memory_space<vmem>>, vector<1x128xf32>,
      } else {
      }
      %14 = arith.index_cast %arg2 : i32 to index
      %c0_7 = arith.constant 0 : index
      %c0_8 = arith.constant 0 : index
      %15 = vector.load %arg14[%14, %c0_7, %c0_8] : memref<2x128x128xbf16, #tpu.memory_space<vmem>>, vector<1x128x128xbf16>
      %16 = vector.shape_cast %15 : vector<1x128x128xbf16> to vector<128x128xbf16>
      %c0_9 = arith.constant 0 : index
      %c0_10 = arith.constant 0 : index
      %17 = vector.load %arg7[%c0_9, %c0_10] : memref<128x128xbf16, #tpu.memory_space<vmem>>, vector<128x128xbf16>
      %cst = arith.constant dense<0.000000e+00> : vector<128x128xf32>
      %18 = tpu.matmul %16, %17, %cst {dimension_numbers = #tpu.dot_dimension_numbers<[1], [0], [0], [1], [0, 0, 1, 1], [], []>} : vector<128x128xbf16>, vector<128x128xbf16>, vector<128x128xf32> -> vector<128x128xf32>
      %19 = vector.broadcast %10 : vector<1x128xf32> to vector<128x128xf32>
      %20 = arith.addf %18, %19 : vector<128x128xf32>
      %c0_11 = arith.constant 0 : index
      %c0_12 = arith.constant 0 : index
      %c0_13 = arith.constant 0 : index
      %21 = vector.load %arg3[%c0_11, %c0_12, %c0_13] : memref<1x128x8xbf16, #tpu.memory_space<vmem>>, vector<1x128x8xbf16>
      %22 = vector.shape_cast %21 : vector<1x128x8xbf16> to vector<128x8xbf16>
      %c0_14 = arith.constant 0 : index
      %c0_15 = arith.constant 0 : index
      %23 = vector.load %arg4[%c0_14, %c0_15] : memref<8x128xbf16, #tpu.memory_space<vmem>>, vector<8x128xbf16>
      %cst_16 = arith.constant dense<0.000000e+00> : vector<128x128xf32>
      %24 = tpu.matmul %22, %23, %cst_16 {dimension_numbers = #tpu.dot_dimension_numbers<[1], [0], [0], [1], [0, 0, 1, 1], [], []>} : vector<128x8xbf16>, vector<8x128xbf16>, vector<128x128xf32> -> vector<128x128xf32>
      %25 = vector.broadcast %9 : vector<1x128xf32> to vector<128x128xf32>
      %26 = arith.addf %24, %25 : vector<128x128xf32>
      %c0_17 = arith.constant 0 : index
      %c0_18 = arith.constant 0 : index
      %27 = vector.load %arg17[%c0_17, %c0_18] : memref<1x128xf32, #tpu.memory_space<vmem>>, vector<1x128xf32>
      %28 = vector.broadcast %27 : vector<1x128xf32> to vector<128x128xf32>
      %29 = arith.mulf %20, %28 : vector<128x128xf32>
      %30 = arith.addf %29, %26 : vector<128x128xf32>
      %cst_19 = arith.constant 0.000000e+00 : f32
      %31 = vector.broadcast %cst_19 : f32 to vector<128x128xf32>
      %32 = arith.maximumf %30, %31 : vector<128x128xf32>
      %c0_20 = arith.constant 0 : index
      %c0_21 = arith.constant 0 : index
      %c0_22 = arith.constant 0 : index
      %33 = vector.load %arg12[%c0_20, %c0_21, %c0_22] : memref<1x128x128xf32, #tpu.memory_space<vmem>>, vector<1x128x128xf32>
      %34 = vector.shape_cast %33 : vector<1x128x128xf32> to vector<128x128xf32>
      %35 = vector.shape_cast %32 : vector<128x128xf32> to vector<1x128x128xf32>
      tpu.vector_store %arg12[%c0_20, %c0_21, %c0_22], %35 {strides = array<i32>} : memref<1x128x128xf32, #tpu.memory_space<vmem>>, vector<1x128x128xf32>,
    } else {
    }
    return
  }
  func.func @transform_0(%arg0: i32, %arg1: i32, %arg2: i32) -> (i32, i32, i32) {
    %c1_i32 = arith.constant 1 : i32
    %0 = arith.cmpi eq, %arg1, %c1_i32 : i32
    %c0_i32 = arith.constant 0 : i32
    %1 = arith.select %0, %c0_i32, %arg2 : i32
    %c0_i32_0 = arith.constant 0 : i32
    %c0_i32_1 = arith.constant 0 : i32
    return %arg0, %1, %c0_i32_0 : i32, i32, i32
  }
  func.func @transform_1(%arg0: i32, %arg1: i32, %arg2: i32) -> (i32, i32) {
    %c0_i32 = arith.constant 0 : i32
    %c0_i32_0 = arith.constant 0 : i32
    %c0_i32_1 = arith.constant 0 : i32
    return %c0_i32, %c0_i32_0 : i32, i32
  }
  func.func @transform_2(%arg0: i32, %arg1: i32, %arg2: i32) -> (i32, i32) {
    %c0_i32 = arith.constant 0 : i32
    %c0_i32_0 = arith.constant 0 : i32
    %c0_i32_1 = arith.constant 0 : i32
    return %c0_i32, %c0_i32_0 : i32, i32
  }
  func.func @transform_3(%arg0: i32, %arg1: i32, %arg2: i32) -> (i32, i32) {
    %c0_i32 = arith.constant 0 : i32
    %c0_i32_0 = arith.constant 0 : i32
    %c0_i32_1 = arith.constant 0 : i32
    return %c0_i32, %c0_i32_0 : i32, i32
  }
  func.func @transform_4(%arg0: i32, %arg1: i32, %arg2: i32) -> (i32, i32) {
    %c0_i32 = arith.constant 0 : i32
    %c0_i32_0 = arith.constant 0 : i32
    %c0_i32_1 = arith.constant 0 : i32
    return %c0_i32, %c0_i32_0 : i32, i32
  }
  func.func @transform_5(%arg0: i32, %arg1: i32, %arg2: i32) -> (i32, i32) {
    %c0_i32 = arith.constant 0 : i32
    %c0_i32_0 = arith.constant 0 : i32
    %c0_i32_1 = arith.constant 0 : i32
    return %c0_i32, %c0_i32_0 : i32, i32
  }
  func.func @transform_6(%arg0: i32, %arg1: i32, %arg2: i32) -> (i32, i32) {
    %c0_i32 = arith.constant 0 : i32
    %c0_i32_0 = arith.constant 0 : i32
    %c0_i32_1 = arith.constant 0 : i32
    return %c0_i32, %c0_i32_0 : i32, i32
  }
  func.func @transform_7(%arg0: i32, %arg1: i32, %arg2: i32) -> (i32, i32) {
    %c0_i32 = arith.constant 0 : i32
    %c0_i32_0 = arith.constant 0 : i32
    %c0_i32_1 = arith.constant 0 : i32
    return %c0_i32, %c0_i32_0 : i32, i32
  }
  func.func @transform_8(%arg0: i32, %arg1: i32, %arg2: i32) -> (i32, i32) {
    %c0_i32 = arith.constant 0 : i32
    %c0_i32_0 = arith.constant 0 : i32
    %c0_i32_1 = arith.constant 0 : i32
    return %c0_i32, %c0_i32_0 : i32, i32
  }
  func.func @transform_9(%arg0: i32, %arg1: i32, %arg2: i32) -> (i32, i32, i32) {
    %c2_i32 = arith.constant 2 : i32
    %0 = arith.cmpi eq, %arg1, %c2_i32 : i32
    %c0_i32 = arith.constant 0 : i32
    %1 = arith.select %0, %arg2, %c0_i32 : i32
    %c0_i32_0 = arith.constant 0 : i32
    %c0_i32_1 = arith.constant 0 : i32
    return %arg0, %1, %c0_i32_0 : i32, i32, i32
  }
}

</mosaic_0001>

<bundles_post_ra>
// kernel: tpu_custom_call.1
= control target key start
LH: loop header
LB: loop body
LE: loop exit
PB: predicated region body
PF: predicated region fallthrough
CT: control target
= control target key end

     0   :  { %s6476_s0 = inlined_call_operand.vmem [shape: bf16[2,256,8], index: 0, kind: input, shape index: {}]   ;;  %s6477_s1 = inlined_call_operand.vmem [shape: bf16[8,128], index: 1, kind: input, shape index: {}]   ;;  %s6478_s2 = inlined_call_operand.vmem [shape: bf16[8,128], index: 2, kind: input, shape index: {}]   ;;  %s6479_s3 = inlined_call_operand.hbm [shape: bf16[1152,128], index: 3, kind: input, shape index: {}]   ;;  %s6480_s4 = inlined_call_operand.vmem [shape: bf16[128,128], index: 4, kind: input, shape index: {}]   ;;  %s6481_s5 = inlined_call_operand.vmem [shape: bf16[128,128], index: 5, kind: input, shape index: {}]   ;;  %s6482_s6 = inlined_call_operand.vmem [shape: bf16[128,128], index: 6, kind: input, shape index: {}]   ;;  %s6483_s7 = inlined_call_operand.vmem [shape: f32[2,128], index: 7, kind: input, shape index: {}]   ;;  %s6484_s8 = inlined_call_operand.vmem [shape: f32[2,128], index: 8, kind: input, shape index: {}]   ;;  %s6485_s9 = inlined_call_operand.hbm [shape: f32[2,256,128], index: 9, kind: output, shape index: {}]  }
   0x1   :  { %6500 = sst [smem:[#allocation20_spill]] %s6479_s3 }
   0x2   :  { %14 = vsyncpa [#allocation8], 0 }
   0x3   :  { %15 = vsyncpa [#allocation9], 0 }
   0x4   :  { %17 = vsyncpa [#allocation9 + $0x1], 0  ;;  %s5146_s30 = smov 0   ;;  %s5148_s10 = smov 0  }
   0x5   :  { %s5150_s11 = smov 0   ;;  %s5152_s12 = smov 0  }
   0x6   :  { %s5154_s13 = smov 0   ;;  %s5156_s14 = smov 0  }
   0x7   :  { %s5158_s15 = smov 0   ;;  %s5160_s16 = smov 0  }
   0x8   :  { %s5162_s17 = smov 0   ;;  %s5164_s18 = smov 0  }
   0x9 LB: > { %6501 = sst [smem:[#allocation13_spill]] %s5069_s15  ;;  %s6486_s19 = sadd.s32 4294967295, %s5081_s18   ;;  %s5081_s18 = sphi %s5164_s18, %s23_s18   ;;  %s5077_s17 = sphi %s5162_s17, %s6552_s17   ;;  %s5073_s16 = sphi %s5160_s16, %s6551_s16   ;;  %s5069_s15 = sphi %s5158_s15, %s6550_s15   ;;  %s5065_s14 = sphi %s5156_s14, %s6556_s14   ;;  %s5061_s13 = sphi %s5154_s13, %s6548_s13   ;;  %s5057_s12 = sphi %s5152_s12, %s6547_s12   ;;  %s5053_s11 = sphi %s5150_s11, %s6555_s11   ;;  %s5049_s10 = sphi %s5148_s10, %s6554_s10   ;;  %s5045_s30 = sphi %s5146_s30, %s6553_s30  }
   0xa   : > { %6502 = sst [smem:[#allocation14_spill]] %s5073_s16  ;;  %s3996_s20 = sadd.s32 4294967294, %s5081_s18  }
   0xb   : > { %6503 = sst [smem:[#allocation15_spill]] %s5077_s17  ;;  %s35_s21 = sadd.s32 1, %s5069_s15 }
   0xc   : > { %s38_s22 = sadd.s32 1, %s5073_s16  ;;  %p36_p0 = scmp.ge.s32.totalorder %s35_s21, 2 }
   0xd   : > { %s42_s23 = sadd.s32 1, %s5077_s17  ;;  %p246_p1 = scmp.eq.s32.totalorder %s5073_s16, 2 }
   0xe   : > { %s255_s24 = sadd.s32 1, %s5053_s11  ;;  %s6558_s21 = smov (%p36_p0, %s35_s21), 0 }
   0xf   : > { %6504 = sst [smem:[#allocation16_spill]] %s6558_s21  ;;  %s6560_s22 = smov (!%p36_p0, %s38_s22), %s5073_s16 }
  0x10   : > { %s247_s25 = scalar_select %p246_p1, %s5069_s15, 0 }
  0x11   : > { %p40_p2 = scmp.ge.s32.totalorder %s6560_s22, 3  ;;  %p265_p3 = scmp.ne.s32.totalorder %s5053_s11, %s5049_s10 }
  0x12   : > { %p266_p4 = scmp.eq.s32.totalorder %s6486_s19, 11  ;;  %p271_p5 = scmp.ne.s32.totalorder %s5049_s10, %s5045_s30 }
  0x13   : > { %s6562_s22 = smov (%p40_p2, %s6560_s22), 0  ;;  %s6564_s23 = smov (!%p40_p2, %s42_s23), %s5077_s17 }
  0x14   : > { %6505 = sst [smem:[#allocation17_spill]] %s6562_s22  ;;  %p248_p6 = scmp.eq.s32.totalorder %s6562_s22, 2 }
  0x15   : > { %p5217_p7 = por %p266_p4, %p265_p3  ;;  %p44_p8 = scmp.ge.s32.totalorder %s6564_s23, 2 }
  0x16   : > { %p272_p9 = scmp.eq.s32.totalorder %s3996_s20, 11  ;;  %p3997_p11 = scmp.ge.s32.totalorder %s5081_s18, 1 }
  0x17   : > { %s6506_s26 = scalar_select %p5217_p7, 1, 0 }
  0x18   : > { %s249_s27 = scalar_select %p248_p6, %s6558_s21, 0 }
  0x19   : > { %s6566_s23 = smov (%p44_p8, %s6564_s23), 0  ;;  %p5224_p10 = por %p272_p9, %p271_p5 }
  0x1a   : > { %6507 = sst [smem:[#allocation18_spill]] %s6566_s23  ;;  %s251_s28 = ssub.s32 %s247_s25, %s249_s27 }
  0x1b   : > { %s6508_s29 = scalar_select %p5224_p10, 1, 0 }
  0x1c   : > { %s250_s19 = ssub.s32 %s5077_s17, %s6566_s23  ;;  %p279_p12 = scmp.lt.s32.totalorder %s5081_s18, 13 }
  0x1d   : > { %s252_s16 = sor.u32 %s251_s28, %s250_s19  ;;  %s6510_s15 = sadd.s32 4294967295, %s5081_s18  }
  0x1e   : > { %p253_p13 = scmp.eq.s32.totalorder %s252_s16, 0  ;;  %p5232_p0 = pnand %p3997_p11, %p279_p12 }
  0x1f   : > { %p5238_p1 = scmp.eq.s32.totalorder %s6510_s15, 0  ;;  %s5083_s27 = smov [#allocation7]  }
  0x20   : > { %s6509_s22 = scalar_select %p5232_p0, 1, 0 }
  0x21   : > { %s6511_s20 = scalar_select %p5238_p1, 1, 0 }
  0x22   : > { %s5243_s25 = scalar_select %p253_p13, %s5053_s11, %s255_s24  }
  0x23   : > { %p4712_p2 = pneg %p5232_p0  ;;  %s297_s23 = sshll.u32 %s5083_s27, 4  ;;  %s298_s23 = int_to_ptr.vmem [resolvable:$true] %s297_s23 }
  0x24   : > { %6512 = sst [smem:[#allocation19_spill]] %s5243_s25  ;;  %s6514_s3 = sld [smem:[#allocation20_spill]] }
  0x25   : > { %p5249_p3 = pnand %p5238_p1, %p4712_p2 }
  0x27   : > { %p4941_p5 = pneg %p5249_p3 }
  0x2a   : > { %s4939_s15 = scalar_lea.hbm %s6514_s3, 9216 }
  0x2b   : > { %p4940_p4 = scmp.ne.s32.totalorder %s6514_s3, %s4939_s15  ;;  %p4946_p9 = scmp.lt.u32.totalorder %s4939_s15, %s6514_s3 }
  0x2d   : > { %p4942_p6 = pnand %p4941_p5, %p4940_p4 }
  0x2f   : > { %p4943_p8 = pneg %p4942_p6 }
  0x31   : > { %p4948_p11 = pnand %p4946_p9, %p4943_p8 }
  0x33   : > { %4951 = shalt.err (!%p4948_p11)
}
  0x34   : > { %s4952_s25 = scalar_lea.vmem %s298_s23, 9216  ;;  %p4960_p10 = scmp.lt.s32.totalorder %s298_s23, %s298_s23 }
  0x35   : > { %p4953_p12 = scmp.ne.s32.totalorder %s298_s23, %s4952_s25  ;;  %p4961_p7 = scmp.lt.s32.totalorder %s4952_s25, %s4952_s25 }
  0x37   : > { %p4955_p13 = pnand %p4953_p12, %p4941_p5  ;;  %p4962_p1 = por %p4961_p7, %p4960_p10 }
  0x39   : > { %p4956_p2 = pneg %p4955_p13 }
  0x3b   : > { %p4963_p0 = pnand %p4962_p1, %p4956_p2 }
  0x3d   : > { %4966 = shalt.err (!%p4963_p0)
}
  0x3e   : > { %s5084_s17 = smov 64   ;;  %s5085_s21 = smov 4  }
  0x3f   : > { %4715 = dma.hbm_to_vmem [thread:$0]  (!%p5249_p3), %s6514_s3, 9216, %s298_s23, [#allocation8], %s5084_s17, %s5084_s17, %s5085_s21  }
  0x40   : > { %p6515_p4 = scmp.ne.s32.totalorder %s6509_s22, 0 }
  0x41   : > { %p6516_p6 = scmp.ne.s32.totalorder (!%p6515_p4), %s6511_s20, 0 }
  0x42   : > { %345 = sbr.rel (%p6515_p4) target bundleno = 1801 (0x709), region = 56 }
  0x49   : > { %5036 = dma.done.wait (%p6516_p6), [#allocation8], 9216  }
  0x4a   : > { %5038 = vsyncadd (%p6516_p6), [#allocation8], 4294958080  ;;  %s6497_s25 = sand.u32 1, %s5049_s10   ;;  %p387_p7 = scmp.eq.s32.totalorder %s5061_s13, 1 }
  0x4b   : > { %s4002_s16 = sshll.u32 %s6497_s25, 7  ;;  %p390_p10 = scmp.lt.s32.totalorder %s5065_s14, 1 }
  0x4c   : > { %s388_s23 = scalar_select %p387_p7, 0, %s5057_s12 }
  0x4d   : > { %s391_s22 = scalar_select %p390_p10, %s5065_s14, 1 }
  0x4e   : > { %s4003_s15 = sshll.u32 %s388_s23, 4  ;;  %s5287_s28 = scalar_lea.vmem [#allocation10], %s4002_s16 }
  0x4f   : > { %p392_p0 = scmp.lt.s32.totalorder %s4003_s15, 31  ;;  %s4004_s24 = sshll.u32 %s391_s22, 5 }
  0x50   : > { %p4006_p1 = scmp.ne.s32.totalorder %s5061_s13, 0 }
  0x51   : > { %s6568_s15 = smov (!%p392_p0, %s4003_s15), 31  ;;  %v428_v0 = vld [vmem:[%s6478_s2] sm:$0xf] (!%p4006_p1)  ;;  %vm498_vm0 = vcmask (!%p4006_p1), 1043456   ;;  %vm473_vm1 = vcmask (!%p4006_p1), 64512   ;;  %s4187_s16 = smul.u32 (!%p4006_p1), 96, %s5057_s12 }
  0x52   : > { %s395_s27 = sadd.s32 %s4004_s24, %s6568_s15  ;;  %410 = sbr.rel (%p4006_p1) target bundleno = 346 (0x15a), region = 64  ;;  %4703 = vmatprep.subr.msk.bf16.mxu0 (!%p4006_p1), %vm498_vm0, %v428_v0  ;;  %4704 = vmatprep.subr.msk.bf16.mxu1 (!%p4006_p1), %vm498_vm0, %v428_v0  ;;  %v500_v2 = vsel (!%p4006_p1), %vm498_vm0, %v428_v0, 0  ;;  %v4007_v10 = vld [vmem:[%s6483_s7] ss:$0 sm:$0xff] (!%p4006_p1) }
  0x53   : > { %s4005_s20 = sshll.u32 %s395_s27, 2  ;;  %4526 = vmatpush3.bf16.msra.mxu0 (!%p4006_p1), %v500_v2  ;;  %4686 = vmatpush3.bf16.msra.mxu1 (!%p4006_p1), %v500_v2  ;;  %s5313_s23 = scalar_lea.vmem (!%p4006_p1), [#allocation2], %s4187_s16 }
  0x54   : > { %s5285_s19 = scalar_lea.vmem %s6476_s0, %s4005_s20  ;;  %p4025_p3 = scmp.le.s32.totalorder (!%p4006_p1), %s5057_s12, 0 }
  0x55   : > { %v4815_v1 = vld [vmem:[%s5285_s19] sm:$0xff] (!%p4006_p1)   ;;  %v4817_v4 = vld [vmem:[%s5285_s19 + $0x8] sm:$0xff] (!%p4006_p1)   ;;  %v4819_v6 = vld [vmem:[%s5285_s19 + $0x10] sm:$0xff] (!%p4006_p1)  }
  0x56   : > { %v4816_v3 = vld [vmem:[%s5285_s19 + $0x20] sm:$0xff] (!%p4006_p1)   ;;  %4527 = vmatprep.mubr.msk.bf16.mxu0 (!%p4006_p1), %vm473_vm1, %v4815_v1  ;;  %v4818_v5 = vld [vmem:[%s5285_s19 + $0x28] sm:$0xff] (!%p4006_p1)   ;;  %v4820_v7 = vld [vmem:[%s5285_s19 + $0x30] sm:$0xff] (!%p4006_p1)  }
  0x57   : > { %4535 = vmatprep.mubr.msk.bf16.mxu1 (!%p4006_p1), %vm473_vm1, %v4816_v3  ;;  %4528 = vmatmul.mubr.msk.bf16.vlgmr.msra.gmra.mrb[0].mxu0 (!%p4006_p1), %vm473_vm1, %v4817_v4  ;;  %v4821_v8 = vld [vmem:[%s5285_s19 + $0x18] sm:$0xff] (!%p4006_p1)  }
  0x58   : > { %4536 = vmatmul.mubr.msk.bf16.vlgmr.msra.gmra.mrb[0].mxu1 (!%p4006_p1), %vm473_vm1, %v4818_v5  ;;  %4531 = vmatprep.mubr.msk.bf16.mxu0 (!%p4006_p1), %vm473_vm1, %v4819_v6  ;;  %v4822_v9 = vld [vmem:[%s5285_s19 + $0x38] sm:$0xff] (!%p4006_p1)  }
  0x59   : > { %4539 = vmatprep.mubr.msk.bf16.mxu1 %vm473_vm1, %v4820_v7  ;;  %s4026_s22 = sadd.s32 (!%p4025_p3), 4294967295, %s5057_s12 }
  0x5a   : > { %s4188_s15 = smul.u32 (!%p4025_p3), 96, %s4026_s22 }
  0x5c   : > { %s641_s24 = scalar_lea.vmem (!%p4025_p3), [#allocation2], %s4188_s15 }
  0x5f   : > { %4532 = vmatmul.mubr.msk.bf16.gmra.mrb[4].mxu0 %vm473_vm1, %v4821_v8 }
  0x60   : > { %4540 = vmatmul.mubr.msk.bf16.gmra.mrb[4].mxu1 %vm473_vm1, %v4822_v9 }
 0x12a   : > { %v4529_v11 = vpop.f32.mrb[0].mxu0 }
 0x12b   : > { %v545_v12 = vadd.f32 %v4529_v11, %v4007_v10  ;;  %v4537_v13 = vpop.f32.mrb[0].mxu1  ;;  %v536_v14 = vpop.f32.mrb[1].mxu0 }
 0x12c   : > { %v577_v15 = vadd.f32 %v4537_v13, %v4007_v10  ;;  %v537_v16 = vadd.f32 %v4007_v10, %v536_v14  ;;  %v568_v17 = vpop.f32.mrb[1].mxu1  ;;  %v4530_v18 = vpop.f32.mrb[2].mxu0 }
 0x12d   : > { %v569_v19 = vadd.f32 %v4007_v10, %v568_v17  ;;  %v548_v20 = vadd.f32 %v4530_v18, %v4007_v10  ;;  %v4538_v21 = vpop.f32.mrb[2].mxu1  ;;  %v539_v22 = vpop.f32.mrb[3].mxu0  ;;  %v601_v26 = vmax.f32 %v545_v12, 0.0 }
 0x12e   : > { %v580_v23 = vadd.f32 %v4538_v21, %v4007_v10  ;;  %v540_v24 = vadd.f32 %v4007_v10, %v539_v22  ;;  %v571_v25 = vpop.f32.mrb[3].mxu1  ;;  %v609_v29 = vmax.f32 %v577_v15, 0.0  ;;  %v599_v30 = vmax.f32 %v537_v16, 0.0 }
 0x12f   : > { %v602_v27 = vmax.f32 %v548_v20, 0.0  ;;  %v572_v28 = vadd.f32 %v4007_v10, %v571_v25  ;;  %v607_v33 = vmax.f32 %v569_v19, 0.0 }
 0x130   : > { %v610_v31 = vmax.f32 %v580_v23, 0.0  ;;  %v600_v32 = vmax.f32 %v540_v24, 0.0 }
 0x131   : > { %v616_v34 = vpack.c.bf16 %v602_v27, %v601_v26  ;;  %v608_v35 = vmax.f32 %v572_v28, 0.0 }
 0x132   : > { %v620_v36 = vpack.c.bf16 %v610_v31, %v609_v29  ;;  %v615_v37 = vpack.c.bf16 %v600_v32, %v599_v30  ;;  %v4533_v38 = vpop.f32.mrb[4].mxu0 }
 0x133   : > { %627 = vst [vmem:[%s5313_s23 + $0x18] sm:$0xff] %v616_v34  ;;  %v619_v39 = vpack.c.bf16 %v608_v35, %v607_v33  ;;  %v561_v40 = vadd.f32 %v4533_v38, %v4007_v10  ;;  %v4541_v41 = vpop.f32.mrb[4].mxu1  ;;  %v552_v42 = vpop.f32.mrb[5].mxu0 }
 0x134   : > { %631 = vst [vmem:[%s5313_s23 + $0x38] sm:$0xff] %v620_v36  ;;  %626 = vst [vmem:[%s5313_s23 + $0x10] sm:$0xff] %v615_v37  ;;  %v593_v43 = vadd.f32 %v4541_v41, %v4007_v10  ;;  %v553_v44 = vadd.f32 %v4007_v10, %v552_v42  ;;  %v584_v45 = vpop.f32.mrb[5].mxu1  ;;  %v4534_v46 = vpop.f32.mrb[6].mxu0 }
 0x135   : > { %630 = vst [vmem:[%s5313_s23 + $0x30] sm:$0xff] %v619_v39  ;;  %v585_v47 = vadd.f32 %v4007_v10, %v584_v45  ;;  %v564_v48 = vadd.f32 %v4534_v46, %v4007_v10  ;;  %v4542_v49 = vpop.f32.mrb[6].mxu1  ;;  %v555_v50 = vpop.f32.mrb[7].mxu0  ;;  %v605_v54 = vmax.f32 %v561_v40, 0.0 }
 0x136   : > { %v596_v51 = vadd.f32 %v4542_v49, %v4007_v10  ;;  %v556_v52 = vadd.f32 %v4007_v10, %v555_v50  ;;  %v587_v53 = vpop.f32.mrb[7].mxu1  ;;  %v613_v57 = vmax.f32 %v593_v43, 0.0  ;;  %v603_v58 = vmax.f32 %v553_v44, 0.0 }
 0x137   : > { %v606_v55 = vmax.f32 %v564_v48, 0.0  ;;  %v588_v56 = vadd.f32 %v4007_v10, %v587_v53  ;;  %v611_v61 = vmax.f32 %v585_v47, 0.0  ;;  %637 = sbr.rel (%p4025_p3) target bundleno = 319 (0x13f), region = 68 }
 0x138   : > { %v614_v59 = vmax.f32 %v596_v51, 0.0  ;;  %v604_v60 = vmax.f32 %v556_v52, 0.0 }
 0x139   : > { %v618_v62 = vpack.c.bf16 %v606_v55, %v605_v54  ;;  %v612_v63 = vmax.f32 %v588_v56, 0.0 }
 0x13a   : > { %v622_v0 = vpack.c.bf16 %v614_v59, %v613_v57  ;;  %v617_v1 = vpack.c.bf16 %v604_v60, %v603_v58 }
 0x13b   : > { %629 = vst [vmem:[%s5313_s23 + $0x28] sm:$0xff] %v618_v62  ;;  %v621_v2 = vpack.c.bf16 %v612_v63, %v611_v61 }
 0x13c   : > { %633 = vst [vmem:[%s5313_s23 + $0x48] sm:$0xff] %v622_v0  ;;  %628 = vst [vmem:[%s5313_s23 + $0x20] sm:$0xff] %v617_v1 }
 0x13d   : > { %632 = vst [vmem:[%s5313_s23 + $0x40] sm:$0xff] %v621_v2 }
 0x13e   : > { %642 = vst [vmem:[%s641_s24 + $0x50] sm:$0xff] %v615_v37  ;;  %643 = vst [vmem:[%s641_s24 + $0x58] sm:$0xff] %v616_v34 }
 0x13f PF: > { %p4028_p5 = scmp.ge.s32.totalorder %s5057_s12, 1 }
 0x140   : > { %4029 = vst [vmem:[%s5313_s23 + $0x60] sm:$0xff] (!%p4028_p5), %v621_v2  ;;  %4030 = vst [vmem:[%s5313_s23 + $0x68] sm:$0xff] (!%p4028_p5), %v622_v0 }
 0x141   : > { %647 = sbr.rel (%p4028_p5) target bundleno = 328 (0x148), region = 72 }
 0x148 PF: > { %p4031_p8 = scmp.ne.s32.totalorder %s5057_s12, 0 }
 0x149   : > { %v5086_v3 = vmov (!%p4031_p8), 0   ;;  %v5087_v4 = vmov (!%p4031_p8), 0.0  }
 0x14a   : > { %657 = sbr.rel (%p4031_p8) target bundleno = 337 (0x151), region = 76  ;;  %658 = vst [vmem:[#allocation2] sm:$0xff] (!%p4031_p8), %v5086_v3  ;;  %659 = vst [vmem:[#allocation2 + $0x8] sm:$0xff] (!%p4031_p8), %v5086_v3 }
 0x14b   : > { %660 = vst [vmem:[#allocation5] sm:$0x1] (!%p4031_p8), %v5087_v4 }
 0x151 PF: > { %p4032_p9 = scmp.ne.s32.totalorder %s5057_s12, 1 }
 0x152   : > { %v5088_v5 = vmov (!%p4032_p9), 0  }
 0x153   : > { %664 = sbr.rel (%p4032_p9) target bundleno = 346 (0x15a), region = 80  ;;  %666 = vst [vmem:[#allocation2 + $0xb0] sm:$0xff] (!%p4032_p9), %v5088_v5  ;;  %667 = vst [vmem:[#allocation2 + $0xb8] sm:$0xff] (!%p4032_p9), %v5088_v5 }
 0x15a PF: > { %p4033_p11 = scmp.ne.s32.totalorder %s5061_s13, 1 }
 0x15b   : > { %v4823_v6 = vld [vmem:[#allocation7 + $0x40] sm:$0xff] (!%p4033_p11)   ;;  %v4827_v10 = vld [vmem:[#allocation7 + $0x48] sm:$0xff] (!%p4033_p11)   ;;  %v673_v14 = vlaneseq (!%p4033_p11)  ;;  %v4831_v15 = vld [vmem:[#allocation7 + $0x50] sm:$0xff] (!%p4033_p11)   ;;  %s4189_s27 = smul.u32 (!%p4033_p11), 96, %s5057_s12  ;;  %vm5089_vm7 = vmmov (!%p4033_p11), 1   ;;  %v5090_v60 = vmov (!%p4033_p11), 0  }
 0x15c   : > { %671 = sbr.rel (%p4033_p11) target bundleno = 778 (0x30a), region = 84  ;;  %v4824_v7 = vld [vmem:[#allocation7 + $0xc0] sm:$0xff] (!%p4033_p11)   ;;  %4201 = vmatprep.subr.bf16.mxu0 (!%p4033_p11), %v4823_v6  ;;  %v4828_v11 = vld [vmem:[#allocation7 + $0xc8] sm:$0xff] (!%p4033_p11)   ;;  %v4832_v16 = vld [vmem:[#allocation7 + $0xd0] sm:$0xff] (!%p4033_p11)   ;;  %vm1014_vm12 = vsmask.f32 (!%p4033_p11), 7424 }
 0x15d   : > { %v4825_v8 = vld [vmem:[#allocation7] sm:$0xff] (!%p4033_p11)   ;;  %4265 = vmatprep.subr.bf16.mxu1 (!%p4033_p11), %v4824_v7  ;;  %v4829_v12 = vld [vmem:[#allocation7 + $0x8] sm:$0xff] (!%p4033_p11)   ;;  %v4833_v17 = vld [vmem:[#allocation7 + $0x10] sm:$0xff] (!%p4033_p11)   ;;  %v5331_v19 = vshrl.u32 (!%p4033_p11), %v673_v14, 7  ;;  %s5359_s20 = scalar_lea.vmem (!%p4033_p11), [#allocation2], %s4189_s27  ;;  %s4190_s3 = sshll.u32 (!%p4033_p11), %s5057_s12, 6 }
 0x15e   : > { %v4826_v9 = vld [vmem:[#allocation7 + $0x80] sm:$0xff] (!%p4033_p11)   ;;  %4202 = vmatpush3.bf16.msra.mxu0 (!%p4033_p11), %v4825_v8  ;;  %v4830_v13 = vld [vmem:[#allocation7 + $0x88] sm:$0xff] (!%p4033_p11)   ;;  %v4834_v18 = vld [vmem:[#allocation7 + $0x90] sm:$0xff] (!%p4033_p11)   ;;  %vm1096_vm14 = vsmask.f32 (!%p4033_p11), 256  ;;  %s6125_s25 = scalar_lea.vmem (!%p4033_p11), [#allocation3], %s4190_s3 }
 0x15f   : > { %4266 = vmatpush3.bf16.msra.mxu1 (!%p4033_p11), %v4826_v9  ;;  %4203 = vmatprep.subr.bf16.mxu0 (!%p4033_p11), %v4827_v10  ;;  %v4835_v20 = vld [vmem:[#allocation7 + $0x58] sm:$0xff] (!%p4033_p11)   ;;  %v676_v24 = vadd.s32 (!%p4033_p11), 16, %v5331_v19  ;;  %v4839_v25 = vld [vmem:[#allocation7 + $0x60] sm:$0xff] (!%p4033_p11)   ;;  %v694_v27 = vand.u32 (!%p4033_p11), 15, %v5331_v19  ;;  %v4843_v31 = vld [vmem:[#allocation7 + $0x68] sm:$0xff] (!%p4033_p11)   ;;  %v675_v34 = vadd.s32 (!%p4033_p11), 8, %v5331_v19 }
 0x160   : > { %4267 = vmatprep.subr.bf16.mxu1 (!%p4033_p11), %v4828_v11  ;;  %v4836_v21 = vld [vmem:[#allocation7 + $0xd8] sm:$0xff] (!%p4033_p11)   ;;  %v4840_v26 = vld [vmem:[#allocation7 + $0xe0] sm:$0xff] (!%p4033_p11)   ;;  %v4844_v32 = vld [vmem:[#allocation7 + $0xe8] sm:$0xff] (!%p4033_p11)   ;;  %v677_v36 = vadd.s32 (!%p4033_p11), 24, %v5331_v19  ;;  %v678_v39 = vadd.s32 (!%p4033_p11), 32, %v5331_v19  ;;  %v679_v41 = vadd.s32 (!%p4033_p11), 40, %v5331_v19 }
 0x161   : > { %v4837_v22 = vld [vmem:[#allocation7 + $0x18] sm:$0xff] (!%p4033_p11)   ;;  %v4841_v28 = vld [vmem:[#allocation7 + $0x20] sm:$0xff] (!%p4033_p11)   ;;  %v708_v30 = vand.u32 (!%p4033_p11), 15, %v676_v24  ;;  %vm5336_vm2 = vcmp.ne.s32.totalorder (!%p4033_p11), %v694_v27, 0  ;;  %v4845_v35 = vld [vmem:[#allocation7 + $0x28] sm:$0xff] (!%p4033_p11)   ;;  %v701_v43 = vand.u32 (!%p4033_p11), 15, %v675_v34 }
 0x162   : > { %4204 = vmatpush3.bf16.msra.mxu0 (!%p4033_p11), %v4829_v12  ;;  %v4838_v23 = vld [vmem:[#allocation7 + $0x98] sm:$0xff] (!%p4033_p11)   ;;  %v4842_v29 = vld [vmem:[#allocation7 + $0xa0] sm:$0xff] (!%p4033_p11)   ;;  %v4846_v37 = vld [vmem:[#allocation7 + $0xa8] sm:$0xff] (!%p4033_p11)   ;;  %v715_v45 = vand.u32 (!%p4033_p11), 15, %v677_v36  ;;  %v722_v47 = vand.u32 (!%p4033_p11), 15, %v678_v39  ;;  %v729_v49 = vand.u32 (!%p4033_p11), 15, %v679_v41 }
 0x163   : > { %4268 = vmatpush3.bf16.msra.mxu1 %v4830_v13  ;;  %4205 = vmatprep.subr.bf16.mxu0 %v4831_v15  ;;  %vm5342_vm3 = vcmp.ne.s32.totalorder %v708_v30, 0  ;;  %v4847_v40 = vld [vmem:[#allocation7 + $0x70] sm:$0xff]   ;;  %v4851_v48 = vld [vmem:[#allocation7 + $0x78] sm:$0xff]   ;;  %v5349_v51 = vadd.s32 48, %v5331_v19  ;;  %v5352_v53 = vadd.s32 56, %v5331_v19  ;;  %v5355_v55 = vadd.s32 64, %v5331_v19  ;;  %vm958_vm4 = vmpackc.low %vm5336_vm2, %vm5336_vm2 }
 0x164   : > { %4269 = vmatprep.subr.bf16.mxu1 %v4832_v16  ;;  %v4848_v42 = vld [vmem:[#allocation7 + $0xf0] sm:$0xff]   ;;  %v4852_v50 = vld [vmem:[#allocation7 + $0xf8] sm:$0xff]   ;;  %v5362_v56 = vld [vmem:[%s5359_s20 + $0x8] sm:$0xff]  ;;  %vm5367_vm5 = vcmp.ne.s32.totalorder %v701_v43, 15  ;;  %vm5371_vm6 = vcmp.ne.s32.totalorder %v715_v45, 15  ;;  %v5376_v59 = vadd.s32 72, %v5331_v19 }
 0x165   : > { %v4849_v44 = vld [vmem:[#allocation7 + $0x30] sm:$0xff]   ;;  %v4853_v52 = vld [vmem:[#allocation7 + $0x38] sm:$0xff]   ;;  %2583 = vmatprep.mubr.bf16.mxu0 %v5362_v56  ;;  %vm959_vm8 = vmpackc.low %vm5089_vm7, %vm5089_vm7  ;;  %v974_v61 = vsel %vm958_vm4, 65537, %v5090_v60  ;;  %vm5380_vm9 = vcmp.ne.s32.totalorder %v722_v47, 0  ;;  %vm5384_vm10 = vcmp.ne.s32.totalorder %v729_v49, 15  ;;  %v736_v0 = vand.u32 15, %v5349_v51 }
 0x166   : > { %4206 = vmatpush3.bf16.msra.mxu0 %v4833_v17  ;;  %v4850_v46 = vld [vmem:[#allocation7 + $0xb0] sm:$0xff]   ;;  %v4854_v54 = vld [vmem:[#allocation7 + $0xb8] sm:$0xff]   ;;  %vm960_vm11 = vmpackc.low %vm5342_vm3, %vm5342_vm3  ;;  %v5393_v1 = vsel %vm959_vm8, 65537, %v5090_v60  ;;  %v743_v2 = vand.u32 15, %v5352_v53  ;;  %v5397_v3 = vadd.s32 80, %v5331_v19  ;;  %v750_v6 = vand.u32 15, %v5355_v55 }
 0x167   : > { %4270 = vmatpush3.bf16.msra.mxu1 %v4834_v18  ;;  %4207 = vmatprep.subr.bf16.mxu0 %v4835_v20  ;;  %v976_v4 = vsel %vm960_vm11, 65537, %v5090_v60  ;;  %v4035_v5 = vcombine.low %v974_v61, %v5393_v1  ;;  %vm1239_vm13 = vmpackc.low %vm5367_vm5, %vm5367_vm5  ;;  %v4855_v9 = vld [vmem:[#allocation7 + $0x140] sm:$0xff]   ;;  %v757_v10 = vand.u32 15, %v5376_v59  ;;  %v5412_v11 = vadd.s32 88, %v5331_v19  ;;  %v1459_v14 = vld [vmem:[%s5359_s20 + $0x8] sm:$0x80] }
 0x168   : > { %4271 = vmatprep.subr.bf16.mxu1 %v4836_v21  ;;  %v4036_v7 = vcombine.low %v976_v4, %v5393_v1  ;;  %vm1241_vm15 = vmpackc.low %vm5371_vm6, %vm5371_vm6  ;;  %v1255_v8 = vsel %vm1239_vm13, 65537, %v5090_v60  ;;  %v917_v15 = vld [vmem:[%s5359_s20] sm:$0x80]  ;;  %vm5437_vm3 = vcmp.ne.s32.totalorder %v736_v0, 0  ;;  %vm5451_vm4 = vcmp.ne.s32.totalorder %v743_v2, 15  ;;  %v5457_v43 = vld [vmem:[%s5359_s20 + $0x18] sm:$0xff] }
 0x169   : > { %v1016_v12 = vshll.u32 %v4035_v5, 16  ;;  %v1019_v13 = vshrl.u32 %v4035_v5, 16  ;;  %v1257_v16 = vsel %vm1241_vm15, 65537, %v5090_v60  ;;  %v4043_v17 = vcombine.low %v5393_v1, %v1255_v8  ;;  %vm962_vm0 = vmpackc.low %vm5380_vm9, %vm5380_vm9 }
 0x16a   : > { %4208 = vmatpush3.bf16.msra.mxu0 %v4837_v22  ;;  %v1023_v18 = vshll.u32 %v4036_v7, 16  ;;  %v4044_v20 = vcombine.low %v5393_v1, %v1257_v16  ;;  %v978_v21 = vsel %vm962_vm0, 65537, %v5090_v60  ;;  %v764_v22 = vand.u32 15, %v5397_v3  ;;  %vm1243_vm1 = vmpackc.low %vm5384_vm10, %vm5384_vm10  ;;  %v4865_v3 = vld [vmem:[#allocation7 + $0x118] sm:$0xff]  }
 0x16b   : > { %4272 = vmatpush3.bf16.msra.mxu1 %v4838_v23  ;;  %4209 = vmatprep.subr.bf16.mxu0 %v4839_v25  ;;  %v5424_v23 = vrot.slane %v1016_v12, 1  ;;  %v1295_v24 = vshrl.u32 %v4043_v17, 16  ;;  %v5427_v25 = vcombine.low %v978_v21, %v5393_v1  ;;  %v1259_v39 = vsel %vm1243_vm1, 65537, %v5090_v60  ;;  %v4857_v12 = vld [vmem:[#allocation7 + $0x148] sm:$0xff]   ;;  %vm964_vm11 = vmpackc.low %vm5437_vm3, %vm5437_vm3 }
 0x16c   : > { %4273 = vmatprep.subr.bf16.mxu1 %v4840_v26  ;;  %v1027_v26 = vshrl.u32 %v4036_v7, 16  ;;  %v1025_v27 = vrot.slane %v1023_v18, 1  ;;  %v1305_v30 = vshll.u32 %v4044_v20, 16  ;;  %vm5460_vm5 = vcmp.ne.s32.totalorder %v750_v6, 0  ;;  %vm1245_vm13 = vmpackc.low %vm5451_vm4, %vm5451_vm4 }
 0x16d   : > { %vm1078_vm2 = vcmp.ne.s16.totalorder %v5424_v23, 0  ;;  %v1297_v33 = vrot.slane %v1295_v24, 7  ;;  %v1031_v45 = vshll.u32 %v5427_v25, 16  ;;  %vm5467_vm7 = vcmp.ne.s32.totalorder %v757_v10, 15  ;;  %vm966_vm15 = vmpackc.low %vm5460_vm5, %vm5460_vm5 }
 0x16e   : > { %4210 = vmatpush3.bf16.msra.mxu0 %v4841_v28  ;;  %v1298_v28 = vshll.u32 %v4043_v17, 16  ;;  %v1468_v36 = vsel %vm1078_vm2, %v1459_v14, 0  ;;  %v1029_v49 = vor.u32 %v1027_v26, %v1025_v27  ;;  %v4045_v18 = vcombine.low %v5393_v1, %v1259_v39  ;;  %vm1247_vm0 = vmpackc.low %vm5467_vm7, %vm5467_vm7 }
 0x16f   : > { %4274 = vmatpush3.bf16.msra.mxu1 %v4842_v29  ;;  %4211 = vmatprep.subr.bf16.mxu0 %v4843_v31  ;;  %v1302_v29 = vshrl.u32 %v4044_v20, 16  ;;  %v1021_v31 = vor.u32 %v1019_v13, %v5424_v23  ;;  %v1033_v0 = vrot.slane %v1031_v45, 1  ;;  %v4862_v20 = vld [vmem:[#allocation7 + $0x180] sm:$0xff]   ;;  %vm5573_vm3 = vcmp.ne.s32.totalorder %v764_v22, 0 }
 0x170   : > { %4275 = vmatprep.subr.bf16.mxu1 %v4844_v32  ;;  %v5435_v32 = vld [vmem:[%s5359_s20 + $0x10] sm:$0xff]  ;;  %v5464_v47 = vor.u32 %v1298_v28, %v1297_v33  ;;  %v1310_v39 = vshrl.u32 %v4045_v18, 16  ;;  %v4867_v22 = vld [vmem:[#allocation7 + $0x160] sm:$0xff]   ;;  %vm968_vm7 = vmpackc.low %vm5573_vm3, %vm5573_vm3 }
 0x171   : > { %v5448_v38 = vrot.slane %v1302_v29, 7  ;;  %v1026_v41 = vsel %vm1014_vm12, %v1021_v31, %v1025_v27  ;;  %v5490_v10 = vsel %vm1014_vm12, %v1029_v49, %v1033_v0  ;;  %v4858_v28 = vld [vmem:[#allocation7 + $0x108] sm:$0xff]   ;;  %v4859_v49 = vld [vmem:[#allocation7 + $0x150] sm:$0xff]  }
 0x172   : > { %4212 = vmatpush3.bf16.msra.mxu0 %v4845_v35  ;;  %v5442_v35 = vadd.s32 96, %v5331_v19  ;;  %vm1079_vm6 = vcmp.ne.s16.totalorder %v1026_v41, 0  ;;  %vm6499_vm8 = vcmp.ne.s16.totalorder %v5464_v47, 0  ;;  %vm1080_vm10 = vcmp.ne.s16.totalorder %v5490_v10, 0 }
 0x173   : > { %4276 = vmatpush3.bf16.msra.mxu1 %v4846_v37  ;;  %4213 = vmatprep.subr.bf16.mxu0 %v4847_v40  ;;  %v1087_v37 = vsel %vm1078_vm2, %v917_v15, 0  ;;  %v1088_v55 = vsel %vm1079_vm6, %v5362_v56, 0  ;;  %v1366_v5 = vsel %vm6499_vm8, %v5362_v56, 0  ;;  %v1470_v56 = vsel %vm1080_vm10, %v5457_v43, 0 }
 0x174   : > { %4277 = vmatprep.subr.bf16.mxu1 %v4848_v42  ;;  %v1478_v42 = vshrl.u32 %v1468_v36, 16  ;;  %v1102_v61 = vshrl.u32 %v1088_v55, 16  ;;  %v1105_v62 = vshll.u32 %v1088_v55, 16  ;;  %v1376_v7 = vshrl.u32 %v1366_v5, 16  ;;  %v4864_v36 = vld [vmem:[#allocation7 + $0x1c8] sm:$0xff]  }
 0x175   : > { %v1378_v8 = vshll.u32 %v1366_v5, 16  ;;  %v1089_v17 = vsel %vm1080_vm10, %v5435_v32, 0  ;;  %v1490_v27 = vshrl.u32 %v1470_v56, 16  ;;  %v1313_v41 = vshll.u32 %v4045_v18, 16 }
 0x176   : > { %4214 = vmatpush3.bf16.msra.mxu0 %v4849_v44  ;;  %v1098_v44 = vshrl.u32 %v1087_v37, 16  ;;  %v1480_v53 = vrot.slane %v1478_v42, 7  ;;  %v5480_v4 = vrot.slane %v1102_v61, 7  ;;  %v1110_v31 = vshrl.u32 %v1089_v17, 16  ;;  %v4863_v61 = vld [vmem:[#allocation7 + $0x158] sm:$0xff]  }
 0x177   : > { %4278 = vmatpush3.bf16.msra.mxu1 %v4850_v46  ;;  %4215 = vmatprep.subr.bf16.mxu0 %v4851_v48  ;;  %v1307_v48 = vor.u32 %v1305_v30, %v5448_v38  ;;  %v1380_v16 = vrot.slane %v1378_v8, 1  ;;  %v1493_v30 = vshll.u32 %v1470_v56, 16  ;;  %v5510_v37 = vrot.slane %v1490_v27, 7 }
 0x178   : > { %4279 = vmatprep.subr.bf16.mxu1 %v4852_v50  ;;  %v4860_v50 = vld [vmem:[#allocation7 + $0x1c0] sm:$0xff]   ;;  %v1100_v59 = vrot.slane %v1098_v44, 7  ;;  %v1107_v14 = vor.u32 %v1105_v62, %v5480_v4  ;;  %v5516_v45 = vrot.slane %v1110_v31, 7  ;;  %v4866_v62 = vld [vmem:[#allocation7 + $0x188] sm:$0xff]  }
 0x179   : > { %v5477_v63 = vsel %vm1096_vm14, %v1297_v33, %v1307_v48  ;;  %v1381_v29 = vor.u32 %v1380_v16, %v1376_v7  ;;  %v1113_v33 = vshll.u32 %v1089_v17, 16  ;;  %v1035_v48 = vshrl.u32 %v5427_v25, 16  ;;  %v4868_v7 = vld [vmem:[#allocation7 + $0x1d0] sm:$0xff]   ;;  %v5597_v31 = vld [vmem:[%s5359_s20 + $0x28] sm:$0xff] }
 0x17a   : > { %4216 = vmatpush3.bf16.msra.mxu0 %v4853_v52  ;;  %v1469_v52 = vsel %vm1079_vm6, %v5435_v32, 0  ;;  %vm6498_vm9 = vcmp.ne.s16.totalorder %v5477_v63, 0  ;;  %v1108_v24 = vsel %vm1096_vm14, %v1100_v59, %v1107_v14  ;;  %v1261_v25 = vsel %vm1245_vm13, 65537, %v5090_v60  ;;  %v5566_v14 = vld [vmem:[%s5359_s20 + $0x20] sm:$0xff] }
 0x17b   : > { %4280 = vmatpush3.bf16.msra.mxu1 %v4854_v54  ;;  %4329 = vmatprep.subr.bf16.mxu0 %v4855_v9  ;;  %v5473_v54 = vsel %vm1079_vm6, %v5457_v43, 0  ;;  %v1482_v57 = vshrl.u32 %v1469_v52, 16  ;;  %v1485_v58 = vshll.u32 %v1469_v52, 16  ;;  %v1367_v6 = vsel %vm6498_vm9, %v5435_v32, 0  ;;  %v4856_v9 = vld [vmem:[#allocation7 + $0x100] sm:$0xff]  }
 0x17c   : > { %4393 = vmatprep.subr.bf16.mxu1 %v4860_v50  ;;  %v1383_v15 = vshll.u32 %v1367_v6, 16  ;;  %v1387_v42 = vshrl.u32 %v1367_v6, 16  ;;  %v1495_v50 = vor.u32 %v1493_v30, %v5510_v37  ;;  %v5529_v52 = vrot.slane %v1310_v39, 7 }
 0x17d   : > { %v1484_v2 = vrot.slane %v1482_v57, 7  ;;  %2584 = vmatmul.mubr.bf16.vlgmr.msra.gmra.mrb[0].mxu0 %v1108_v24  ;;  %v4861_v57 = vld [vmem:[#allocation7 + $0x110] sm:$0xff]   ;;  %v1115_v34 = vor.u32 %v1113_v33, %v5516_v45  ;;  %v982_v59 = vsel %vm966_vm15, 65537, %v5090_v60  ;;  %v4046_v40 = vcombine.low %v5393_v1, %v1261_v25 }
 0x17e   : > { %v1385_v26 = vrot.slane %v1383_v15, 1  ;;  %4330 = vmatpush3.bf16.msra.mxu0 %v4856_v9  ;;  %2591 = vmatprep.mubr.bf16.mxu0 %v5435_v32  ;;  %v980_v32 = vsel %vm964_vm11, 65537, %v5090_v60  ;;  %v1315_v5 = vor.u32 %v1313_v41, %v5529_v52  ;;  %v5553_v46 = vcombine.low %v982_v59, %v5393_v1 }
 0x17f   : > { %v1487_v13 = vor.u32 %v1485_v58, %v1484_v2  ;;  %4331 = vmatprep.subr.bf16.mxu0 %v4857_v12  ;;  %v4038_v55 = vcombine.low %v980_v32, %v5393_v1  ;;  %v1037_v58 = vor.u32 %v1035_v48, %v1033_v0  ;;  %v1496_v0 = vsel %vm1096_vm14, %v1484_v2, %v1495_v50 }
 0x180   : > { %v1386_v44 = vsel %vm1014_vm12, %v1381_v29, %v1385_v26  ;;  %v1116_v8 = vsel %vm1096_vm14, %v5480_v4, %v1115_v34  ;;  %v1263_v2 = vsel %vm1247_vm0, 65537, %v5090_v60  ;;  %v5563_v12 = vsel %vm1096_vm14, %v5448_v38, %v1315_v5  ;;  %v4870_v38 = vld [vmem:[#allocation7 + $0x190] sm:$0xff]  }
 0x181   : > { %v1488_v21 = vsel %vm1096_vm14, %v1480_v53, %v1487_v13  ;;  %v5531_v53 = vor.u32 %v1387_v42, %v1385_v26  ;;  %v1039_v6 = vshll.u32 %v4038_v55, 16  ;;  %v1043_v9 = vshrl.u32 %v4038_v55, 16  ;;  %v4869_v55 = vld [vmem:[#allocation7 + $0x120] sm:$0xff]  }
 0x182   : > { %2680 = vmatprep.mubr.bf16.mxu1 %v1488_v21  ;;  %4332 = vmatpush3.bf16.msra.mxu0 %v4858_v28  ;;  %v1318_v4 = vshrl.u32 %v4046_v40, 16  ;;  %v1321_v15 = vshll.u32 %v4046_v40, 16  ;;  %vm1359_vm1 = vcmp.ne.s16.totalorder %v5563_v12, 0  ;;  %v1047_v16 = vshll.u32 %v5553_v46, 16 }
 0x183   : > { %2681 = vmatmul.mubr.bf16.vlgmr.msra.gmra.mrb[0].mxu1 %v1386_v44  ;;  %4333 = vmatprep.subr.bf16.mxu0 %v4859_v49  ;;  %v1041_v13 = vrot.slane %v1039_v6, 1  ;;  %v4047_v56 = vcombine.low %v5393_v1, %v1263_v2  ;;  %v1368_v17 = vsel %vm1359_vm1, %v5457_v43, 0 }
 0x184   : > { %4394 = vmatpush3.bf16.msra.mxu1 %v4862_v20  ;;  %2688 = vmatprep.mubr.bf16.mxu1 %v1496_v0  ;;  %v5584_v20 = vrot.slane %v1318_v4, 7  ;;  %v1391_v24 = vshll.u32 %v1368_v17, 16  ;;  %v1395_v26 = vshrl.u32 %v1368_v17, 16  ;;  %v5587_v27 = vrot.slane %v1047_v16, 1  ;;  %v4873_v0 = vld [vmem:[#allocation7 + $0x128] sm:$0xff]   ;;  %v4876_v4 = vld [vmem:[#allocation7 + $0x1e0] sm:$0xff]  }
 0x185   : > { %4395 = vmatprep.subr.bf16.mxu1 %v4864_v36  ;;  %2592 = vmatmul.mubr.bf16.gmra.mrb[4].mxu0 %v1116_v8  ;;  %v5582_v18 = vsel %vm1014_vm12, %v1037_v58, %v1041_v13  ;;  %v1045_v21 = vor.u32 %v1043_v9, %v1041_v13  ;;  %v1326_v33 = vshrl.u32 %v4047_v56, 16  ;;  %v4872_v36 = vld [vmem:[#allocation7 + $0x1d8] sm:$0xff]  }
 0x186   : > { %2599 = vmatprep.mubr.bf16.mxu0 %v5457_v43  ;;  %4334 = vmatpush3.bf16.msra.mxu0 %v4861_v57  ;;  %vm1081_vm4 = vcmp.ne.s16.totalorder %v5582_v18, 0  ;;  %v1323_v30 = vor.u32 %v1321_v15, %v5584_v20  ;;  %v1393_v39 = vrot.slane %v1391_v24, 1  ;;  %v4874_v57 = vld [vmem:[#allocation7 + $0x198] sm:$0xff]   ;;  %v1679_v15 = vld [vmem:[%s5359_s20 + $0x10] sm:$0x80] }
 0x187   : > { %4335 = vmatprep.subr.bf16.mxu0 %v4863_v61  ;;  %v1471_v28 = vsel %vm1081_vm4, %v5566_v14, 0  ;;  %v1090_v29 = vsel %vm1081_vm4, %v5457_v43, 0  ;;  %v5605_v49 = vsel %vm1014_vm12, %v1045_v21, %v5587_v27  ;;  %v5607_v50 = vrot.slane %v1326_v33, 7 }
 0x188   : > { %4396 = vmatpush3.bf16.msra.mxu1 %v4866_v62  ;;  %v1498_v41 = vshrl.u32 %v1471_v28, 16  ;;  %v1501_v42 = vshll.u32 %v1471_v28, 16  ;;  %v1118_v44 = vshrl.u32 %v1090_v29, 16  ;;  %v1121_v32 = vshll.u32 %v1090_v29, 16 }
 0x189   : > { %4397 = vmatprep.subr.bf16.mxu1 %v4868_v7  ;;  %v5601_v48 = vsel %vm1096_vm14, %v5529_v52, %v1323_v30  ;;  %v1394_v34 = vsel %vm1014_vm12, %v5531_v53, %v1393_v39  ;;  %v4871_v52 = vld [vmem:[#allocation7 + $0x168] sm:$0xff]   ;;  %v1397_v61 = vor.u32 %v1395_v26, %v1393_v39  ;;  %vm1082_vm6 = vcmp.ne.s16.totalorder %v5605_v49, 0  ;;  %v4875_v7 = vld [vmem:[#allocation7 + $0x170] sm:$0xff]  }
 0x18a   : > { %4336 = vmatpush3.bf16.msra.mxu0 %v4865_v3  ;;  %v1500_v58 = vrot.slane %v1498_v41, 7  ;;  %v5611_v25 = vrot.slane %v1118_v44, 7  ;;  %vm1360_vm5 = vcmp.ne.s16.totalorder %v5601_v48, 0  ;;  %v1329_v62 = vshll.u32 %v4047_v56, 16  ;;  %v4877_v26 = vld [vmem:[#allocation7 + $0x130] sm:$0xff]   ;;  %v4879_v39 = vld [vmem:[#allocation7 + $0x1e8] sm:$0xff]  }
 0x18b   : > { %4337 = vmatprep.subr.bf16.mxu0 %v4867_v22  ;;  %2689 = vmatmul.mubr.bf16.gmra.mrb[4].mxu1 %v1394_v34  ;;  %v1369_v59 = vsel %vm1360_vm5, %v5566_v14, 0  ;;  %v1472_v40 = vsel %vm1082_vm6, %v5597_v31, 0  ;;  %v1091_v2 = vsel %vm1082_vm6, %v5566_v14, 0  ;;  %v771_v44 = vand.u32 15, %v5412_v11 }
 0x18c   : > { %4398 = vmatpush3.bf16.msra.mxu1 %v4870_v38  ;;  %v1503_v5 = vor.u32 %v1501_v42, %v1500_v58  ;;  %v1123_v53 = vor.u32 %v1121_v32, %v5611_v25  ;;  %v1399_v6 = vshll.u32 %v1369_v59, 16  ;;  %v1506_v8 = vshrl.u32 %v1472_v40, 16  ;;  %v4880_v32 = vld [vmem:[#allocation7 + $0x1a8] sm:$0xff]  }
 0x18d   : > { %4399 = vmatprep.subr.bf16.mxu1 %v4872_v36  ;;  %v1509_v9 = vshll.u32 %v1472_v40, 16  ;;  %v1331_v13 = vor.u32 %v1329_v62, %v5607_v50  ;;  %v1126_v17 = vshrl.u32 %v1091_v2, 16  ;;  %v1129_v3 = vshll.u32 %v1091_v2, 16 }
 0x18e   : > { %4338 = vmatpush3.bf16.msra.mxu0 %v4869_v55  ;;  %v1504_v16 = vsel %vm1096_vm14, %v5510_v37, %v1503_v5  ;;  %v1124_v56 = vsel %vm1096_vm14, %v5516_v45, %v1123_v53  ;;  %v1401_v38 = vrot.slane %v1399_v6, 1  ;;  %v5634_v21 = vrot.slane %v1506_v8, 7  ;;  %v4882_v8 = vld [vmem:[#allocation7 + $0x1f0] sm:$0xff]  }
 0x18f   : > { %4339 = vmatprep.subr.bf16.mxu0 %v4871_v52  ;;  %2696 = vmatprep.mubr.bf16.mxu1 %v1504_v16  ;;  %v5638_v22 = vsel %vm1096_vm14, %v5584_v20, %v1331_v13  ;;  %v1403_v24 = vshrl.u32 %v1369_v59, 16  ;;  %v5642_v37 = vrot.slane %v1126_v17, 7  ;;  %v984_v45 = vsel %vm968_vm7, 65537, %v5090_v60  ;;  %v4878_v20 = vld [vmem:[#allocation7 + $0x1a0] sm:$0xff]  }
 0x190   : > { %4400 = vmatpush3.bf16.msra.mxu1 %v4874_v57  ;;  %2600 = vmatmul.mubr.bf16.gmra.mrb[8].mxu0 %v1124_v56  ;;  %v1402_v28 = vsel %vm1014_vm12, %v1397_v61, %v1401_v38  ;;  %vm1361_vm11 = vcmp.ne.s16.totalorder %v5638_v22, 0  ;;  %v1511_v29 = vor.u32 %v1509_v9, %v5634_v21  ;;  %v4040_v36 = vcombine.low %v984_v45, %v5393_v1  ;;  %v5672_v61 = vld [vmem:[%s5359_s20 + $0x30] sm:$0xff] }
 0x191   : > { %2607 = vmatprep.mubr.bf16.mxu0 %v5566_v14  ;;  %4401 = vmatprep.subr.bf16.mxu1 %v4876_v4  ;;  %v5655_v30 = vsel %vm1361_vm11, %v5597_v31, 0  ;;  %v1405_v33 = vor.u32 %v1403_v24, %v1401_v38  ;;  %v1131_v41 = vor.u32 %v1129_v3, %v5642_v37  ;;  %v1051_v42 = vshrl.u32 %v5553_v46, 16  ;;  %v4883_v4 = vld [vmem:[#allocation7 + $0x138] sm:$0xff]  }
 0x192   : > { %4340 = vmatpush3.bf16.msra.mxu0 %v4873_v0  ;;  %v1407_v51 = vshll.u32 %v5655_v30, 16  ;;  %v5664_v55 = vsel %vm1078_vm2, %v1679_v15, 0  ;;  %v1512_v57 = vsel %vm1096_vm14, %v1500_v58, %v1511_v29  ;;  %v1055_v34 = vshll.u32 %v4040_v36, 16 }
 0x193   : > { %4341 = vmatprep.subr.bf16.mxu0 %v4875_v7  ;;  %2697 = vmatmul.mubr.bf16.gmra.mrb[8].mxu1 %v1402_v28  ;;  %v778_v52 = vand.u32 15, %v5442_v35  ;;  %v1132_v46 = vsel %vm1096_vm14, %v5611_v25, %v1131_v41  ;;  %v1053_v11 = vor.u32 %v1051_v42, %v5587_v27  ;;  %vm909_vm13 = vcmp.ne.s32.totalorder %v771_v44, 15  ;;  %v4881_v27 = vld [vmem:[#allocation7 + $0x178] sm:$0xff]   ;;  %v4884_v41 = vld [vmem:[#allocation7 + $0x1b0] sm:$0xff]  }
 0x194   : > { %4402 = vmatpush3.bf16.msra.mxu1 %v4878_v20  ;;  %2704 = vmatprep.mubr.bf16.mxu1 %v1512_v57  ;;  %v1409_v59 = vrot.slane %v1407_v51, 1  ;;  %v1057_v23 = vrot.slane %v1055_v34, 1  ;;  %vm1249_vm2 = vmpackc.low %vm909_vm13, %vm909_vm13  ;;  %v1059_v62 = vshrl.u32 %v4040_v36, 16  ;;  %v687_v58 = vadd.s32 104, %v5331_v19  ;;  %v5708_v36 = vld [vmem:[%s5359_s20 + $0x38] sm:$0xff] }
 0x195   : > { %4403 = vmatprep.subr.bf16.mxu1 %v4879_v39  ;;  %vm894_vm15 = vcmp.ne.s32.totalorder %v778_v52, 0  ;;  %v1265_v0 = vsel %vm1249_vm2, 65537, %v5090_v60  ;;  %v1411_v5 = vshrl.u32 %v5655_v30, 16  ;;  %v688_v25 = vadd.s32 112, %v5331_v19  ;;  %v4885_v51 = vld [vmem:[#allocation7 + $0x1f8] sm:$0xff]  }
 0x196   : > { %4342 = vmatpush3.bf16.msra.mxu0 %v4877_v26  ;;  %v1410_v35 = vsel %vm1014_vm12, %v1405_v33, %v1409_v59  ;;  %vm970_vm0 = vmpackc.low %vm894_vm15, %vm894_vm15  ;;  %v5680_v53 = vsel %vm1014_vm12, %v1053_v11, %v1057_v23  ;;  %v4048_v6 = vcombine.low %v5393_v1, %v1265_v0  ;;  %v1061_v7 = vor.u32 %v1059_v62, %v1057_v23  ;;  %v4886_v23 = vld [vmem:[#allocation7 + $0x1b8] sm:$0xff]  }
 0x197   : > { %v986_v40 = vsel %vm970_vm0, 65537, %v5090_v60  ;;  %vm1083_vm3 = vcmp.ne.s16.totalorder %v5680_v53, 0  ;;  %v785_v2 = vand.u32 15, %v687_v58  ;;  %v792_v13 = vand.u32 15, %v688_v25  ;;  %4343 = vmatprep.subr.bf16.mxu0 %v4881_v27  ;;  %v5747_v27 = vld [vmem:[%s5359_s20 + $0x10] sm:$0xff] }
 0x198   : > { %4404 = vmatpush3.bf16.msra.mxu1 %v4880_v32  ;;  %2608 = vmatmul.mubr.bf16.gmra.mrb[12].mxu0 %v1132_v46  ;;  %v5687_v9 = vcombine.low %v986_v40, %v5393_v1  ;;  %v1473_v15 = vsel %vm1083_vm3, %v5672_v61, 0  ;;  %v1092_v16 = vsel %vm1083_vm3, %v5597_v31, 0  ;;  %v1334_v56 = vshrl.u32 %v4048_v6, 16 }
 0x199   : > { %2615 = vmatprep.mubr.bf16.mxu0 %v5597_v31  ;;  %v1337_v38 = vshll.u32 %v4048_v6, 16  ;;  %4405 = vmatprep.subr.bf16.mxu1 %v4882_v8  ;;  %v1514_v17 = vshrl.u32 %v1473_v15, 16  ;;  %v1517_v3 = vshll.u32 %v1473_v15, 16  ;;  %v1134_v24 = vshrl.u32 %v1092_v16, 16 }
 0x19a   : > { %v1137_v26 = vshll.u32 %v1092_v16, 16  ;;  %4344 = vmatpush3.bf16.msra.mxu0 %v4883_v4  ;;  %v5695_v28 = vrot.slane %v1334_v56, 7  ;;  %v1063_v45 = vshll.u32 %v5687_v9, 16  ;;  %vm911_vm7 = vcmp.ne.s32.totalorder %v785_v2, 15 }
 0x19b   : > { %2705 = vmatmul.mubr.bf16.gmra.mrb[12].mxu1 %v1410_v35  ;;  %vm5698_vm13 = vcmp.ne.s32.totalorder %v792_v13, 0  ;;  %v1698_v29 = vshrl.u32 %v5664_v55, 16  ;;  %v5703_v30 = vrot.slane %v1514_v17, 7  ;;  %v5705_v33 = vrot.slane %v1134_v24, 7  ;;  %vm1251_vm2 = vmpackc.low %vm911_vm7, %vm911_vm7 }
 0x19c   : > { %v1067_v39 = vshrl.u32 %v5687_v9, 16  ;;  %v1339_v42 = vor.u32 %v1337_v38, %v5695_v28  ;;  %v1413_v44 = vor.u32 %v1411_v5, %v1409_v59  ;;  %v1065_v32 = vrot.slane %v1063_v45, 1  ;;  %vm972_vm15 = vmpackc.low %vm5698_vm13, %vm5698_vm13  ;;  %4406 = vmatpush3.bf16.msra.mxu1 %v4884_v41 }
 0x19d   : > { %v1267_v57 = vsel %vm1251_vm2, 65537, %v5090_v60  ;;  %v1519_v34 = vor.u32 %v1517_v3, %v5703_v30  ;;  %v1139_v52 = vor.u32 %v1137_v26, %v5705_v33  ;;  %v988_v11 = vsel %vm972_vm15, 65537, %v5090_v60  ;;  %4407 = vmatprep.subr.bf16.mxu1 %v4885_v51 }
 0x19e   : > { %v4049_v46 = vcombine.low %v5393_v1, %v1267_v57  ;;  %v5722_v59 = vsel %vm1096_vm14, %v5607_v50, %v1339_v42  ;;  %v5725_v62 = vsel %vm1014_vm12, %v1061_v7, %v1065_v32  ;;  %v4042_v58 = vcombine.low %v988_v11, %v5393_v1  ;;  %v5735_v50 = vld [vmem:[#allocation7 + $0x200] sm:$0xff]  }
 0x19f   : > { %v689_v35 = vadd.s32 120, %v5331_v19  ;;  %v1520_v0 = vsel %vm1096_vm14, %v5634_v21, %v1519_v34  ;;  %v1140_v5 = vsel %vm1096_vm14, %v5642_v37, %v1139_v52  ;;  %vm1362_vm0 = vcmp.ne.s16.totalorder %v5722_v59, 0  ;;  %4543 = vmatprep.subr.bf16.mxu0 %v5735_v50  ;;  %v4892_v59 = vld [vmem:[#allocation7 + $0x228] sm:$0xff]  }
 0x1a0   : > { %vm1084_vm7 = vcmp.ne.s16.totalorder %v5725_v62, 0  ;;  %2712 = vmatprep.mubr.bf16.mxu1 %v1520_v0  ;;  %2616 = vmatmul.mubr.bf16.gmra.mrb[16].mxu0 %v1140_v5  ;;  %v1371_v25 = vsel %vm1362_vm0, %v5672_v61, 0  ;;  %v1342_v37 = vshrl.u32 %v4049_v46, 16  ;;  %v1345_v13 = vshll.u32 %v4049_v46, 16 }
 0x1a1   : > { %v1474_v19 = vsel %vm1084_vm7, %v5708_v36, 0  ;;  %v1093_v21 = vsel %vm1084_vm7, %v5672_v61, 0  ;;  %v1415_v6 = vshll.u32 %v1371_v25, 16  ;;  %2623 = vmatprep.mubr.bf16.mxu0 %v5672_v61  ;;  %4408 = vmatpush3.bf16.msra.mxu1 %v4886_v23  ;;  %v1419_v4 = vshrl.u32 %v1371_v25, 16  ;;  %v5797_v23 = vld [vmem:[%s5359_s20 + $0x48] sm:$0xff] }
 0x1a2   : > { %v1522_v40 = vshrl.u32 %v1474_v19, 16  ;;  %v1525_v7 = vshll.u32 %v1474_v19, 16  ;;  %v1142_v8 = vshrl.u32 %v1093_v21, 16  ;;  %v1145_v9 = vshll.u32 %v1093_v21, 16  ;;  %4687 = vmatprep.subr.bf16.mxu1 %v5735_v50 }
 0x1a3   : > { %v5750_v2 = vrot.slane %v1342_v37, 7  ;;  %v1417_v15 = vrot.slane %v1415_v6, 1  ;;  %v1071_v38 = vshll.u32 %v4042_v58, 16  ;;  %v1069_v3 = vor.u32 %v1067_v39, %v1065_v32  ;;  %v5772_v32 = vld [vmem:[%s5359_s20 + $0x40] sm:$0xff] }
 0x1a4   : > { %v5754_v16 = vrot.slane %v1522_v40, 7  ;;  %v5756_v56 = vrot.slane %v1142_v8, 7  ;;  %v799_v24 = vand.u32 15, %v689_v35  ;;  %v1075_v26 = vshrl.u32 %v4042_v58, 16 }
 0x1a5   : > { %v1347_v17 = vor.u32 %v1345_v13, %v5750_v2  ;;  %v1418_v45 = vsel %vm1014_vm12, %v1413_v44, %v1417_v15  ;;  %v5765_v51 = vsel %vm6499_vm8, %v5747_v27, 0  ;;  %v1421_v57 = vor.u32 %v1419_v4, %v1417_v15 }
 0x1a6   : > { %v1527_v20 = vor.u32 %v1525_v7, %v5754_v16  ;;  %v1147_v41 = vor.u32 %v1145_v9, %v5756_v56  ;;  %2713 = vmatmul.mubr.bf16.gmra.mrb[16].mxu1 %v1418_v45  ;;  %v1073_v39 = vrot.slane %v1071_v38, 1  ;;  %vm913_vm13 = vcmp.ne.s32.totalorder %v799_v24, 15 }
 0x1a7   : > { %v5769_v42 = vsel %vm1096_vm14, %v5695_v28, %v1347_v17  ;;  %vm1253_vm15 = vmpackc.low %vm913_vm13, %vm913_vm13  ;;  %v5782_v28 = vsel %vm6498_vm9, %v5457_v43, 0  ;;  %v1596_v58 = vshrl.u32 %v5765_v51, 16  ;;  %v1598_v0 = vshll.u32 %v5765_v51, 16 }
 0x1a8   : > { %v1528_v44 = vsel %vm1096_vm14, %v5703_v30, %v1527_v20  ;;  %v1148_v34 = vsel %vm1096_vm14, %v5705_v33, %v1147_v41  ;;  %vm1363_vm2 = vcmp.ne.s16.totalorder %v5769_v42, 0  ;;  %v5788_v46 = vsel %vm1014_vm12, %v1069_v3, %v1073_v39  ;;  %v1205_v3 = vld [vmem:[%s5359_s20 + $0x48] sm:$0x1] }
 0x1a9   : > { %2720 = vmatprep.mubr.bf16.mxu1 %v1528_v44  ;;  %2624 = vmatmul.mubr.bf16.gmra.mrb[20].mxu0 %v1148_v34  ;;  %v1372_v52 = vsel %vm1363_vm2, %v5708_v36, 0  ;;  %v1269_v30 = vsel %vm1253_vm15, 65537, %v5090_v60  ;;  %v5791_v33 = vor.u32 %v1075_v26, %v1073_v39  ;;  %vm1085_vm13 = vcmp.ne.s16.totalorder %v5788_v46, 0 }
 0x1aa   : > { %v1423_v11 = vshll.u32 %v1372_v52, 16  ;;  %2631 = vmatprep.mubr.bf16.mxu0 %v5708_v36  ;;  %v4050_v43 = vcombine.low %v5393_v1, %v1269_v30  ;;  %v1475_v35 = vsel %vm1085_vm13, %v5772_v32, 0  ;;  %v1094_v60 = vsel %vm1085_vm13, %v5708_v36, 0 }
 0x1ab   : > { %vm1086_vm15 = vcmp.ne.s16.totalorder %v5791_v33, 0  ;;  %v1530_v25 = vshrl.u32 %v1475_v35, 16  ;;  %v1533_v1 = vshll.u32 %v1475_v35, 16  ;;  %v1150_v19 = vshrl.u32 %v1094_v60, 16 }
 0x1ac   : > { %v1425_v5 = vrot.slane %v1423_v11, 1  ;;  %v1153_v21 = vshll.u32 %v1094_v60, 16  ;;  %v1350_v37 = vshrl.u32 %v4050_v43, 16  ;;  %v1353_v6 = vshll.u32 %v4050_v43, 16 }
 0x1ad   : > { %v1476_v40 = vsel %vm1086_vm15, %v5797_v23, 0  ;;  %v1532_v8 = vrot.slane %v1530_v25, 7  ;;  %v1152_v9 = vrot.slane %v1150_v19, 7  ;;  %v1427_v13 = vshrl.u32 %v1372_v52, 16 }
 0x1ae   : > { %v1426_v7 = vsel %vm1014_vm12, %v1421_v57, %v1425_v5  ;;  %v5812_v4 = vrot.slane %v1350_v37, 7  ;;  %v1538_v15 = vshrl.u32 %v1476_v40, 16  ;;  %v1541_v38 = vshll.u32 %v1476_v40, 16 }
 0x1af   : > { %2721 = vmatmul.mubr.bf16.gmra.mrb[20].mxu1 %v1426_v7  ;;  %v1095_v17 = vsel %vm1086_vm15, %v5772_v32, 0  ;;  %v1535_v24 = vor.u32 %v1533_v1, %v1532_v8  ;;  %v1155_v26 = vor.u32 %v1153_v21, %v1152_v9  ;;  %v1600_v57 = vrot.slane %v1598_v0, 1 }
 0x1b0   : > { %v1158_v45 = vshrl.u32 %v1095_v17, 16  ;;  %v1161_v20 = vshll.u32 %v1095_v17, 16  ;;  %v1355_v41 = vor.u32 %v1353_v6, %v5812_v4  ;;  %v1540_v51 = vrot.slane %v1538_v15, 7 }
 0x1b1   : > { %vm1365_vm9 = vcmp.ne.s16.totalorder %v5812_v4, 0  ;;  %v1536_v39 = vsel %vm1096_vm14, %v5754_v16, %v1535_v24  ;;  %v1156_v44 = vsel %vm1096_vm14, %v5756_v56, %v1155_v26  ;;  %v1429_v43 = vor.u32 %v1427_v13, %v1425_v5 }
 0x1b2   : > { %v1160_v34 = vrot.slane %v1158_v45, 7  ;;  %v1374_v52 = vsel %vm1365_vm9, %v1205_v3, 0  ;;  %2728 = vmatprep.mubr.bf16.mxu1 %v1536_v39  ;;  %2632 = vmatmul.mubr.bf16.gmra.mrb[24].mxu0 %v1156_v44  ;;  %v5828_v30 = vsel %vm1096_vm14, %v5750_v2, %v1355_v41  ;;  %v1543_v11 = vor.u32 %v1541_v38, %v1540_v51 }
 0x1b3   : > { %vm1364_vm8 = vcmp.ne.s16.totalorder %v5828_v30, 0  ;;  %2639 = vmatprep.mubr.bf16.mxu0 %v5772_v32  ;;  %v1603_v35 = vshll.u32 %v5782_v28, 16  ;;  %v1439_v60 = vshll.u32 %v1374_v52, 16  ;;  %v1601_v0 = vor.u32 %v1600_v57, %v1596_v58 }
 0x1b4   : > { %v1163_v16 = vor.u32 %v1161_v20, %v1160_v34  ;;  %v1373_v56 = vsel %vm1364_vm8, %v5772_v32, 0  ;;  %v1702_v25 = vshrl.u32 %v5473_v54, 16  ;;  %v1544_v2 = vsel %vm1096_vm14, %v1532_v8, %v1543_v11 }
 0x1b5   : > { %v1431_v1 = vshll.u32 %v1373_v56, 16  ;;  %v1605_v19 = vrot.slane %v1603_v35, 1  ;;  %v1700_v5 = vrot.slane %v1698_v29, 7  ;;  %v1705_v6 = vshll.u32 %v5473_v54, 16 }
 0x1b6   : > { %v1164_v21 = vsel %vm1096_vm14, %v1152_v9, %v1163_v16  ;;  %v1704_v37 = vrot.slane %v1702_v25, 7  ;;  %v1588_v40 = vsel %vm1359_vm1, %v5566_v14, 0  ;;  %v1435_v58 = vshrl.u32 %v1373_v56, 16  ;;  %v5868_v16 = vld [vmem:[#allocation7 + $0x208] sm:$0xff]  }
 0x1b7   : > { %v1433_v7 = vrot.slane %v1431_v1, 1  ;;  %v1607_v13 = vshrl.u32 %v5782_v28, 16  ;;  %v1690_v8 = vsel %vm1080_vm10, %v5566_v14, 0  ;;  %v1606_v55 = vsel %vm1014_vm12, %v1601_v0, %v1605_v19 }
 0x1b8   : > { %v1707_v29 = vor.u32 %v1705_v6, %v1704_v37  ;;  %v1710_v15 = vshrl.u32 %v1690_v8, 16  ;;  %v1713_v9 = vshll.u32 %v1690_v8, 16  ;;  %v1611_v54 = vshll.u32 %v1588_v40, 16 }
 0x1b9   : > { %v1434_v38 = vsel %vm1014_vm12, %v1429_v43, %v1433_v7  ;;  %v1437_v24 = vor.u32 %v1435_v58, %v1433_v7  ;;  %v1441_v28 = vrot.slane %v1439_v60, 1  ;;  %v1691_v10 = vsel %vm1081_vm4, %v5597_v31, 0  ;;  %v5866_v43 = vld [vmem:[%s5359_s20 + $0x18] sm:$0xff] }
 0x1ba   : > { %2729 = vmatmul.mubr.bf16.gmra.mrb[24].mxu1 %v1434_v38  ;;  %2640 = vmatmul.mubr.bf16.gmra.mrb[28].mxu0 %v1164_v21  ;;  %v1708_v17 = vsel %vm1096_vm14, %v1700_v5, %v1707_v29  ;;  %v1712_v3 = vrot.slane %v1710_v15, 7  ;;  %v1609_v26 = vor.u32 %v1607_v13, %v1605_v19  ;;  %v1718_v20 = vshrl.u32 %v1691_v10, 16 }
 0x1bb   : > { %2736 = vmatprep.mubr.bf16.mxu1 %v1544_v2  ;;  %2777 = vmatprep.mubr.bf16.mxu0 %v1606_v55  ;;  %v1613_v41 = vrot.slane %v1611_v54, 1  ;;  %v1589_v51 = vsel %vm1360_vm5, %v5597_v31, 0  ;;  %v1721_v57 = vshll.u32 %v1691_v10, 16  ;;  %v1692_v39 = vsel %vm1082_vm6, %v5672_v61, 0 }
 0x1bc   : > { %v1715_v45 = vor.u32 %v1713_v9, %v1712_v3  ;;  %v1720_v34 = vrot.slane %v1718_v20, 7  ;;  %v1726_v52 = vshrl.u32 %v1692_v39, 16  ;;  %v1442_v18 = vsel %vm1014_vm12, %v1437_v24, %v1441_v28  ;;  %v5897_v9 = vld [vmem:[%s5359_s20 + $0x50] sm:$0xff]  ;;  %v5901_v28 = vld [vmem:[#allocation7 + $0x218] sm:$0xff]  }
 0x1bd   : > { %v1729_v11 = vshll.u32 %v1692_v39, 16  ;;  %v1615_v35 = vshrl.u32 %v1588_v40, 16  ;;  %v1619_v56 = vshll.u32 %v1589_v51, 16  ;;  %v1614_v25 = vsel %vm1014_vm12, %v1609_v26, %v1613_v41  ;;  %v5923_v39 = vld [vmem:[#allocation7 + $0x220] sm:$0xff]  }
 0x1be   : > { %v5862_v44 = vsel %vm1096_vm14, %v1704_v37, %v1715_v45  ;;  %v1723_v60 = vor.u32 %v1721_v57, %v1720_v34  ;;  %v1728_v0 = vrot.slane %v1726_v52, 7  ;;  %v1693_v49 = vsel %vm1083_vm3, %v5708_v36, 0  ;;  %v5884_v37 = vld [vmem:[#allocation7 + $0x210] sm:$0xff]  }
 0x1bf   : > { %v1734_v19 = vshrl.u32 %v1693_v49, 16  ;;  %v1737_v5 = vshll.u32 %v1693_v49, 16  ;;  %v1694_v21 = vsel %vm1084_vm7, %v5772_v32, 0  ;;  %v1617_v53 = vor.u32 %v1615_v35, %v1613_v41 }
 0x1c0   : > { %v5876_v1 = vsel %vm1096_vm14, %v1712_v3, %v1723_v60  ;;  %v1731_v2 = vor.u32 %v1729_v11, %v1728_v0  ;;  %v1742_v40 = vshrl.u32 %v1694_v21, 16  ;;  %v1590_v7 = vsel %vm1361_vm11, %v5672_v61, 0 }
 0x1c1   : > { %v1736_v58 = vrot.slane %v1734_v19, 7  ;;  %v1745_v13 = vshll.u32 %v1694_v21, 16  ;;  %v1695_v8 = vsel %vm1085_vm13, %v5797_v23, 0  ;;  %v1623_v54 = vshrl.u32 %v1589_v51, 16 }
 0x1c2   : > { %2737 = vmatmul.mubr.bf16.gmra.mrb[28].mxu1 %v1442_v18  ;;  %2778 = vmatmul.mubr.bf16.vlgmr.msra.gmra.mrb[32].mxu0 %v5747_v27  ;;  %v1621_v27 = vrot.slane %v1619_v56, 1  ;;  %v5887_v6 = vsel %vm1096_vm14, %v1720_v34, %v1731_v2  ;;  %v1744_v62 = vrot.slane %v1742_v40, 7  ;;  %v1750_v29 = vshrl.u32 %v1695_v8, 16  ;;  %v1805_v40 = vld [vmem:[%s5359_s20 + $0x58] sm:$0x1] }
 0x1c3   : > { %2874 = vmatprep.mubr.bf16.mxu1 %v5866_v43  ;;  %4544 = vmatpush3.bf16.msra.mxu0 %v5735_v50  ;;  %v1739_v55 = vor.u32 %v1737_v5, %v1736_v58  ;;  %v1753_v15 = vshll.u32 %v1695_v8, 16  ;;  %v1627_v3 = vshll.u32 %v1590_v7, 16  ;;  %v1696_v45 = vsel %vm1086_vm15, %v5897_v9, 0 }
 0x1c4   : > { %2785 = vmatprep.mubr.bf16.mxu0 %v1614_v25  ;;  %4545 = vmatprep.subr.bf16.mxu0 %v5868_v16  ;;  %v1622_v38 = vsel %vm1014_vm12, %v1617_v53, %v1621_v27  ;;  %v1747_v24 = vor.u32 %v1745_v13, %v1744_v62  ;;  %v1752_v46 = vrot.slane %v1750_v29, 7  ;;  %v1758_v41 = vshrl.u32 %v1696_v45, 16 }
 0x1c5   : > { %v5904_v10 = vsel %vm1096_vm14, %v1728_v0, %v1739_v55  ;;  %v1625_v51 = vor.u32 %v1623_v54, %v1621_v27  ;;  %v1761_v57 = vshll.u32 %v1696_v45, 16  ;;  %v5921_v33 = vsel %vm1362_vm0, %v5708_v36, 0 }
 0x1c6   : > { %v5908_v26 = vsel %vm1096_vm14, %v1736_v58, %v1747_v24  ;;  %v1755_v20 = vor.u32 %v1753_v15, %v1752_v46  ;;  %v1810_v52 = vsel %vm1361_vm11, %v5708_v36, 0  ;;  %v1811_v18 = vsel %vm1362_vm0, %v5772_v32, 0 }
 0x1c7   : > { %4546 = vmatpush3.bf16.msra.mxu0 %v5868_v16  ;;  %v1631_v11 = vshrl.u32 %v1590_v7, 16  ;;  %v1847_v56 = vshll.u32 %v1810_v52, 16  ;;  %v1851_v60 = vshrl.u32 %v1810_v52, 16  ;;  %v1635_v25 = vshll.u32 %v5921_v33, 16 }
 0x1c8   : > { %4547 = vmatprep.subr.bf16.mxu0 %v5884_v37  ;;  %v5926_v34 = vsel %vm1096_vm14, %v1744_v62, %v1755_v20  ;;  %v1855_v49 = vshll.u32 %v1811_v18, 16  ;;  %v1859_v22 = vshrl.u32 %v1811_v18, 16  ;;  %v1812_v5 = vsel %vm1363_vm2, %v5797_v23, 0  ;;  %v4893_v62 = vld [vmem:[#allocation7 + $0x230] sm:$0xff]   ;;  %v4894_v20 = vld [vmem:[#allocation7 + $0x238] sm:$0xff]  }
 0x1c9   : > { %v5943_v19 = vrot.slane %v1847_v56, 1  ;;  %v1863_v27 = vshll.u32 %v1812_v5, 16  ;;  %v1637_v7 = vrot.slane %v1635_v25, 1  ;;  %v1867_v58 = vshrl.u32 %v1812_v5, 16 }
 0x1ca   : > { %2875 = vmatmul.mubr.bf16.vlgmr.msra.gmra.mrb[32].mxu1 %v1708_v17  ;;  %2786 = vmatmul.mubr.bf16.gmra.mrb[36].mxu0 %v5866_v43  ;;  %v1629_v17 = vrot.slane %v1627_v3, 1  ;;  %v1592_v13 = vsel %vm1363_vm2, %v5772_v32, 0  ;;  %v1814_v29 = vsel %vm1365_vm9, %v1805_v40, 0  ;;  %v1639_v24 = vshrl.u32 %v5921_v33, 16 }
 0x1cb   : > { %2882 = vmatprep.mubr.bf16.mxu1 %v5566_v14  ;;  %2793 = vmatprep.mubr.bf16.mxu0 %v1622_v38  ;;  %v1853_v53 = vor.u32 %v1851_v60, %v5943_v19  ;;  %v1879_v3 = vshll.u32 %v1814_v29, 16 }
 0x1cc   : > { %4695 = vmatpush3.bf16.msra.mxu1 %v5735_v50  ;;  %4548 = vmatpush3.bf16.msra.mxu0 %v5884_v37  ;;  %v1760_v50 = vrot.slane %v1758_v41, 7  ;;  %v1630_v0 = vsel %vm1014_vm12, %v1625_v51, %v1629_v17  ;;  %v1633_v21 = vor.u32 %v1631_v11, %v1629_v17 }
 0x1cd   : > { %4688 = vmatprep.subr.bf16.mxu1 %v5868_v16  ;;  %4549 = vmatprep.subr.bf16.mxu0 %v5901_v28  ;;  %v1881_v41 = vrot.slane %v1879_v3, 1 }
 0x1ce   : > { %v1763_v35 = vor.u32 %v1761_v57, %v1760_v50  ;;  %v1638_v42 = vsel %vm1014_vm12, %v1633_v21, %v1637_v7  ;;  %v1641_v57 = vor.u32 %v1639_v24, %v1637_v7  ;;  %v1647_v50 = vshrl.u32 %v1592_v13, 16 }
 0x1d0   : > { %4696 = vmatpush3.bf16.msra.mxu1 %v5868_v16  ;;  %4550 = vmatpush3.bf16.msra.mxu0 %v5901_v28  ;;  %v5941_v2 = vsel %vm1096_vm14, %v1752_v46, %v1763_v35  ;;  %v1857_v16 = vrot.slane %v1855_v49, 1  ;;  %v1643_v46 = vshll.u32 %v1592_v13, 16  ;;  %vm6541_vm14 = vcmp.ne.s16.totalorder %v5464_v47, 0 }
 0x1d1   : > { %4689 = vmatprep.subr.bf16.mxu1 %v5884_v37  ;;  %4551 = vmatprep.subr.bf16.mxu0 %v5923_v39 }
 0x1d2   : > { %2883 = vmatmul.mubr.bf16.gmra.mrb[36].mxu1 %v5862_v44  ;;  %2794 = vmatmul.mubr.bf16.gmra.mrb[40].mxu0 %v5566_v14  ;;  %v1861_v44 = vor.u32 %v1859_v22, %v1857_v16  ;;  %v1813_v14 = vsel %vm1364_vm8, %v5897_v9, 0  ;;  %v5963_v8 = vsel %vm1014_vm12, %v1853_v53, %v1857_v16 }
 0x1d3   : > { %2890 = vmatprep.mubr.bf16.mxu1 %v5597_v31  ;;  %2801 = vmatprep.mubr.bf16.mxu0 %v1630_v0  ;;  %v1871_v55 = vshll.u32 %v1813_v14, 16  ;;  %v1875_v54 = vshrl.u32 %v1813_v14, 16  ;;  %v1798_v0 = vld [vmem:[%s5359_s20 + $0x20] sm:$0xff] }
 0x1d4   : > { %4697 = vmatpush3.bf16.msra.mxu1 %v5884_v37  ;;  %4552 = vmatpush3.bf16.msra.mxu0 %v5923_v39  ;;  %v1865_v37 = vrot.slane %v1863_v27, 1 }
 0x1d5   : > { %4690 = vmatprep.subr.bf16.mxu1 %v5901_v28  ;;  %4553 = vmatprep.subr.bf16.mxu0 %v4892_v59  ;;  %v1873_v45 = vrot.slane %v1871_v55, 1 }
 0x1d6   : > { %v5968_v15 = vsel %vm1014_vm12, %v1861_v44, %v1865_v37  ;;  %v1869_v38 = vor.u32 %v1867_v58, %v1865_v37 }
 0x1d7   : > { %v1877_v17 = vor.u32 %v1875_v54, %v1873_v45 }
 0x1d8   : > { %4698 = vmatpush3.bf16.msra.mxu1 %v5901_v28  ;;  %4554 = vmatpush3.bf16.msra.mxu0 %v4892_v59  ;;  %v5977_v51 = vsel %vm1014_vm12, %v1869_v38, %v1873_v45  ;;  %v1645_v28 = vrot.slane %v1643_v46, 1 }
 0x1d9   : > { %4691 = vmatprep.subr.bf16.mxu1 %v5923_v39  ;;  %4555 = vmatprep.subr.bf16.mxu0 %v4893_v62  ;;  %v5982_v33 = vsel %vm1014_vm12, %v1877_v17, %v1881_v41 }
 0x1da   : > { %2891 = vmatmul.mubr.bf16.gmra.mrb[40].mxu1 %v5876_v1  ;;  %2802 = vmatmul.mubr.bf16.gmra.mrb[44].mxu0 %v5597_v31  ;;  %v1593_v31 = vsel %vm1364_vm8, %v5797_v23, 0  ;;  %v1646_v1 = vsel %vm1014_vm12, %v1641_v57, %v1645_v28  ;;  %v1649_v30 = vor.u32 %v1647_v50, %v1645_v28  ;;  %vm6542_vm8 = vcmp.ne.s16.totalorder %v5477_v63, 0 }
 0x1db   : > { %2898 = vmatprep.mubr.bf16.mxu1 %v5672_v61  ;;  %2809 = vmatprep.mubr.bf16.mxu0 %v1638_v42  ;;  %v1651_v52 = vshll.u32 %v1593_v31, 16  ;;  %v1655_v56 = vshrl.u32 %v1593_v31, 16  ;;  %v1807_v22 = vsel %vm6542_vm8, %v1798_v0, 0  ;;  %v1809_v63 = vsel %vm1360_vm5, %v5672_v61, 0 }
 0x1dc   : > { %4699 = vmatpush3.bf16.msra.mxu1 %v5923_v39  ;;  %4556 = vmatpush3.bf16.msra.mxu0 %v4893_v62  ;;  %v1585_v39 = vld [vmem:[%s5359_s20 + $0x50] sm:$0x1]  ;;  %v1823_v47 = vshll.u32 %v1807_v22, 16  ;;  %v1827_v27 = vshrl.u32 %v1807_v22, 16 }
 0x1dd   : > { %4692 = vmatprep.subr.bf16.mxu1 %v4892_v59  ;;  %4557 = vmatprep.subr.bf16.mxu0 %v4894_v20  ;;  %v1653_v18 = vrot.slane %v1651_v52, 1  ;;  %v1594_v11 = vsel %vm1365_vm9, %v1585_v39, 0 }
 0x1de   : > { %v1659_v60 = vshll.u32 %v1594_v11, 16  ;;  %v1825_v21 = vrot.slane %v1823_v47, 1 }
 0x1df   : > { %v1654_v35 = vsel %vm1014_vm12, %v1649_v30, %v1653_v18  ;;  %v1657_v4 = vor.u32 %v1655_v56, %v1653_v18 }
 0x1e0   : > { %4700 = vmatpush3.bf16.msra.mxu1 %v4892_v59  ;;  %4558 = vmatpush3.bf16.msra.mxu0 %v4894_v20  ;;  %v1661_v25 = vrot.slane %v1659_v60, 1  ;;  %v1829_v12 = vor.u32 %v1827_v27, %v1825_v21 }
 0x1e1   : > { %4693 = vmatprep.subr.bf16.mxu1 %v4893_v62 }
 0x1e2   : > { %2899 = vmatmul.mubr.bf16.gmra.mrb[44].mxu1 %v5887_v6  ;;  %2810 = vmatmul.mubr.bf16.gmra.mrb[48].mxu0 %v5672_v61  ;;  %v1806_v6 = vsel %vm6541_vm14, %v5866_v43, 0  ;;  %v1662_v59 = vsel %vm1014_vm12, %v1657_v4, %v1661_v25  ;;  %v1799_v43 = vld [vmem:[%s5359_s20 + $0x28] sm:$0xff]  ;;  %v1843_v61 = vshrl.u32 %v1809_v63, 16 }
 0x1e3   : > { %2906 = vmatprep.mubr.bf16.mxu1 %v5708_v36  ;;  %2817 = vmatprep.mubr.bf16.mxu0 %v1646_v1  ;;  %v1818_v49 = vshll.u32 %v1806_v6, 16  ;;  %v1816_v16 = vshrl.u32 %v1806_v6, 16 }
 0x1e4   : > { %4701 = vmatpush3.bf16.msra.mxu1 %v4893_v62 }
 0x1e5   : > { %4694 = vmatprep.subr.bf16.mxu1 %v4894_v20  ;;  %v1820_v5 = vrot.slane %v1818_v49, 1 }
 0x1e8   : > { %4702 = vmatpush3.bf16.msra.mxu1 %v4894_v20 }
 0x1ea   : > { %2907 = vmatmul.mubr.bf16.gmra.mrb[48].mxu1 %v5904_v10  ;;  %2818 = vmatmul.mubr.bf16.gmra.mrb[52].mxu0 %v5708_v36  ;;  %v1808_v36 = vsel %vm1359_vm1, %v1799_v43, 0  ;;  %v1821_v10 = vor.u32 %v1820_v5, %v1816_v16 }
 0x1eb   : > { %2914 = vmatprep.mubr.bf16.mxu1 %v5772_v32  ;;  %2825 = vmatprep.mubr.bf16.mxu0 %v1654_v35  ;;  %v1831_v53 = vshll.u32 %v1808_v36, 16  ;;  %v1835_v7 = vshrl.u32 %v1808_v36, 16 }
 0x1ec   : > { %v1826_v40 = vsel %vm1014_vm12, %v1821_v10, %v1825_v21 }
 0x1f2   : > { %2915 = vmatmul.mubr.bf16.gmra.mrb[52].mxu1 %v5908_v26  ;;  %2826 = vmatmul.mubr.bf16.gmra.mrb[56].mxu0 %v5772_v32  ;;  %v1839_v26 = vshll.u32 %v1809_v63, 16  ;;  %v1833_v32 = vrot.slane %v1831_v53, 1 }
 0x1f3   : > { %2922 = vmatprep.mubr.bf16.mxu1 %v5797_v23  ;;  %2833 = vmatprep.mubr.bf16.mxu0 %v1662_v59 }
 0x1f4   : > { %v1837_v44 = vor.u32 %v1835_v7, %v1833_v32  ;;  %v1841_v14 = vrot.slane %v1839_v26, 1  ;;  %v1834_v48 = vsel %vm1014_vm12, %v1829_v12, %v1833_v32 }
 0x1f6   : > { %v1842_v58 = vsel %vm1014_vm12, %v1837_v44, %v1841_v14 }
 0x1fa   : > { %2923 = vmatmul.mubr.bf16.gmra.mrb[56].mxu1 %v5926_v34  ;;  %2834 = vmatmul.mubr.bf16.gmra.mrb[60].mxu0 %v5797_v23  ;;  %v1845_v34 = vor.u32 %v1843_v61, %v1841_v14 }
 0x1fb   : > { %2930 = vmatprep.mubr.bf16.mxu1 %v5897_v9  ;;  %4559 = vmatprep.mubr.bf16.mxu0 %v1826_v40 }
 0x1fc   : > { %v1850_v23 = vsel %vm1014_vm12, %v1845_v34, %v5943_v19 }
 0x202   : > { %2931 = vmatmul.mubr.bf16.gmra.mrb[60].mxu1 %v5941_v2  ;;  %4560 = vmatmul.mubr.bf16.vlgmr.msra.gmra.mrb[64].mxu0 %v1834_v48  ;;  %v6030_v2 = vld [vmem:[%s6483_s7 + $0x1] ss:$0 sm:$0xff] }
 0x203   : > { %4567 = vmatprep.mubr.bf16.mxu1 %v5963_v8  ;;  %4563 = vmatprep.mubr.bf16.mxu0 %v1842_v58 }
 0x20a   : > { %4568 = vmatmul.mubr.bf16.vlgmr.msra.gmra.mrb[64].mxu1 %v5968_v15  ;;  %4564 = vmatmul.mubr.bf16.gmra.mrb[68].mxu0 %v1850_v23 }
 0x20b   : > { %4571 = vmatprep.mubr.bf16.mxu1 %v5977_v51 }
 0x212   : > { %4572 = vmatmul.mubr.bf16.gmra.mrb[68].mxu1 %v5982_v33 }
 0x250   : > { %v4217_v9 = vpop.f32.mrb[0].mxu0 }
 0x251   : > { %v4218_v13 = vpop.f32.mrb[1].mxu0 }
 0x252   : > { %v4219_v62 = vadd.f32 %v4218_v13, %v4217_v9  ;;  %v4220_v8 = vpop.f32.mrb[2].mxu0 }
 0x253   : > { %v4221_v55 = vpop.f32.mrb[3].mxu0 }
 0x254   : > { %v2586_v19 = vadd.f32 %v4219_v62, %v6030_v2  ;;  %v4222_v29 = vadd.f32 %v4221_v55, %v4220_v8 }
 0x256   : > { %v4281_v37 = vpop.f32.mrb[0].mxu1  ;;  %v2589_v3 = vadd.f32 %v4222_v29, %v6030_v2 }
 0x257   : > { %v4282_v15 = vpop.f32.mrb[1].mxu1 }
 0x258   : > { %v4283_v38 = vadd.f32 %v4282_v15, %v4281_v37  ;;  %v4284_v54 = vpop.f32.mrb[2].mxu1  ;;  %v4223_v45 = vpop.f32.mrb[4].mxu0 }
 0x259   : > { %v4285_v42 = vpop.f32.mrb[3].mxu1  ;;  %v4224_v41 = vpop.f32.mrb[5].mxu0 }
 0x25a   : > { %v6034_v24 = vadd.f32 %v4283_v38, %v2586_v19  ;;  %v4286_v46 = vadd.f32 %v4285_v42, %v4284_v54  ;;  %v4225_v51 = vadd.f32 %v4224_v41, %v4223_v45  ;;  %v4226_v17 = vpop.f32.mrb[6].mxu0 }
 0x25b   : > { %v4227_v57 = vpop.f32.mrb[7].mxu0 }
 0x25c   : > { %v6036_v20 = vadd.f32 %v4286_v46, %v2589_v3  ;;  %v4228_v28 = vadd.f32 %v4227_v57, %v4226_v17  ;;  %v2594_v33 = vadd.f32 %v4225_v51, %v6030_v2 }
 0x25e   : > { %v4287_v31 = vpop.f32.mrb[4].mxu1  ;;  %v2597_v50 = vadd.f32 %v4228_v28, %v6030_v2 }
 0x25f   : > { %v4288_v1 = vpop.f32.mrb[5].mxu1 }
 0x260   : > { %v4289_v52 = vadd.f32 %v4288_v1, %v4287_v31  ;;  %v4290_v39 = vpop.f32.mrb[6].mxu1 }
 0x261   : > { %v4291_v30 = vpop.f32.mrb[7].mxu1 }
 0x262   : > { %v6040_v18 = vadd.f32 %v4289_v52, %v2594_v33  ;;  %v4292_v11 = vadd.f32 %v4291_v30, %v4290_v39 }
 0x263   : > { %v4229_v35 = vpop.f32.mrb[8].mxu0 }
 0x264   : > { %v4230_v56 = vpop.f32.mrb[9].mxu0  ;;  %v6042_v60 = vadd.f32 %v4292_v11, %v2597_v50 }
 0x265   : > { %v4231_v6 = vadd.f32 %v4230_v56, %v4229_v35  ;;  %v4232_v0 = vpop.f32.mrb[10].mxu0 }
 0x266   : > { %v4233_v4 = vpop.f32.mrb[11].mxu0  ;;  %v4293_v49 = vpop.f32.mrb[8].mxu1 }
 0x267   : > { %v2602_v25 = vadd.f32 %v4231_v6, %v6030_v2  ;;  %v4234_v22 = vadd.f32 %v4233_v4, %v4232_v0  ;;  %v4294_v59 = vpop.f32.mrb[9].mxu1 }
 0x268   : > { %v4295_v5 = vadd.f32 %v4294_v59, %v4293_v49  ;;  %v4296_v47 = vpop.f32.mrb[10].mxu1 }
 0x269   : > { %v2605_v16 = vadd.f32 %v4234_v22, %v6030_v2  ;;  %v4297_v43 = vpop.f32.mrb[11].mxu1 }
 0x26a   : > { %v6046_v36 = vadd.f32 %v4295_v5, %v2602_v25  ;;  %v4298_v10 = vadd.f32 %v4297_v43, %v4296_v47 }
 0x26b   : > { %v4235_v21 = vpop.f32.mrb[12].mxu0 }
 0x26c   : > { %v4236_v63 = vpop.f32.mrb[13].mxu0  ;;  %v6048_v53 = vadd.f32 %v4298_v10, %v2605_v16 }
 0x26d   : > { %v4237_v27 = vadd.f32 %v4236_v63, %v4235_v21  ;;  %v4238_v40 = vpop.f32.mrb[14].mxu0 }
 0x26e   : > { %v4239_v7 = vpop.f32.mrb[15].mxu0  ;;  %v4299_v32 = vpop.f32.mrb[12].mxu1 }
 0x26f   : > { %v2610_v26 = vadd.f32 %v4237_v27, %v6030_v2  ;;  %v4240_v12 = vadd.f32 %v4239_v7, %v4238_v40  ;;  %v4300_v44 = vpop.f32.mrb[13].mxu1 }
 0x270   : > { %v4301_v48 = vadd.f32 %v4300_v44, %v4299_v32  ;;  %v4302_v61 = vpop.f32.mrb[14].mxu1 }
 0x271   : > { %v2613_v14 = vadd.f32 %v4240_v12, %v6030_v2  ;;  %v4303_v58 = vpop.f32.mrb[15].mxu1 }
 0x272   : > { %v6052_v34 = vadd.f32 %v4301_v48, %v2610_v26  ;;  %v4304_v23 = vadd.f32 %v4303_v58, %v4302_v61 }
 0x273   : > { %v4241_v13 = vpop.f32.mrb[16].mxu0 }
 0x274   : > { %v6054_v9 = vadd.f32 %v4304_v23, %v2613_v14  ;;  %v4242_v62 = vpop.f32.mrb[17].mxu0 }
 0x275   : > { %v4243_v8 = vadd.f32 %v4242_v62, %v4241_v13  ;;  %v4244_v37 = vpop.f32.mrb[18].mxu0 }
 0x276   : > { %v4245_v55 = vpop.f32.mrb[19].mxu0 }
 0x277   : > { %v4246_v19 = vadd.f32 %v4245_v55, %v4244_v37  ;;  %v2618_v29 = vadd.f32 %v4243_v8, %v6030_v2 }
 0x279   : > { %v4305_v15 = vpop.f32.mrb[16].mxu1  ;;  %v2621_v54 = vadd.f32 %v4246_v19, %v6030_v2 }
 0x27a   : > { %v4306_v38 = vpop.f32.mrb[17].mxu1 }
 0x27b   : > { %v4307_v3 = vadd.f32 %v4306_v38, %v4305_v15  ;;  %v4308_v42 = vpop.f32.mrb[18].mxu1 }
 0x27c   : > { %v4247_v46 = vpop.f32.mrb[20].mxu0  ;;  %v4309_v45 = vpop.f32.mrb[19].mxu1 }
 0x27d   : > { %v4248_v41 = vpop.f32.mrb[21].mxu0  ;;  %v6058_v51 = vadd.f32 %v4307_v3, %v2618_v29  ;;  %v4310_v17 = vadd.f32 %v4309_v45, %v4308_v42 }
 0x27e   : > { %v4249_v57 = vadd.f32 %v4248_v41, %v4247_v46  ;;  %v4250_v28 = vpop.f32.mrb[22].mxu0 }
 0x27f   : > { %v4251_v33 = vpop.f32.mrb[23].mxu0  ;;  %v6060_v31 = vadd.f32 %v4310_v17, %v2621_v54 }
 0x280   : > { %v4252_v1 = vadd.f32 %v4251_v33, %v4250_v28  ;;  %v2626_v50 = vadd.f32 %v4249_v57, %v6030_v2 }
 0x282   : > { %v4311_v52 = vpop.f32.mrb[20].mxu1  ;;  %v2629_v30 = vadd.f32 %v4252_v1, %v6030_v2 }
 0x283   : > { %v4312_v39 = vpop.f32.mrb[21].mxu1 }
 0x284   : > { %v4313_v11 = vadd.f32 %v4312_v39, %v4311_v52  ;;  %v4314_v35 = vpop.f32.mrb[22].mxu1 }
 0x285   : > { %v4315_v56 = vpop.f32.mrb[23].mxu1  ;;  %v4253_v4 = vpop.f32.mrb[24].mxu0 }
 0x286   : > { %v6064_v6 = vadd.f32 %v4313_v11, %v2626_v50  ;;  %v4316_v0 = vadd.f32 %v4315_v56, %v4314_v35  ;;  %v4254_v25 = vpop.f32.mrb[25].mxu0 }
 0x287   : > { %v4255_v22 = vadd.f32 %v4254_v25, %v4253_v4  ;;  %v4256_v59 = vpop.f32.mrb[26].mxu0 }
 0x288   : > { %v6066_v49 = vadd.f32 %v4316_v0, %v2629_v30  ;;  %v4257_v16 = vpop.f32.mrb[27].mxu0 }
 0x289   : > { %v4258_v5 = vadd.f32 %v4257_v16, %v4256_v59  ;;  %v2634_v47 = vadd.f32 %v4255_v22, %v6030_v2 }
 0x28b   : > { %v2637_v27 = vadd.f32 %v4258_v5, %v6030_v2 }
 0x28d   : > { %v4317_v43 = vpop.f32.mrb[24].mxu1  ;;  %v4259_v10 = vpop.f32.mrb[28].mxu0 }
 0x28e   : > { %v4318_v21 = vpop.f32.mrb[25].mxu1  ;;  %v4260_v63 = vpop.f32.mrb[29].mxu0 }
 0x28f   : > { %v4319_v40 = vadd.f32 %v4318_v21, %v4317_v43  ;;  %v4320_v7 = vpop.f32.mrb[26].mxu1  ;;  %v4261_v26 = vadd.f32 %v4260_v63, %v4259_v10  ;;  %v4262_v32 = vpop.f32.mrb[30].mxu0 }
 0x290   : > { %v4321_v12 = vpop.f32.mrb[27].mxu1  ;;  %v4263_v44 = vpop.f32.mrb[31].mxu0 }
 0x291   : > { %v6070_v14 = vadd.f32 %v4319_v40, %v2634_v47  ;;  %v4322_v48 = vadd.f32 %v4321_v12, %v4320_v7  ;;  %v4264_v61 = vadd.f32 %v4263_v44, %v4262_v32  ;;  %v2642_v23 = vadd.f32 %v4261_v26, %v6030_v2 }
 0x293   : > { %v6072_v58 = vadd.f32 %v4322_v48, %v2637_v27  ;;  %v2645_v55 = vadd.f32 %v4264_v61, %v6030_v2 }
 0x295   : > { %v4323_v13 = vpop.f32.mrb[28].mxu1  ;;  %v4345_v62 = vpop.f32.mrb[32].mxu0 }
 0x296   : > { %v4324_v8 = vpop.f32.mrb[29].mxu1  ;;  %v4346_v37 = vpop.f32.mrb[33].mxu0 }
 0x297   : > { %v4325_v19 = vadd.f32 %v4324_v8, %v4323_v13  ;;  %v4326_v29 = vpop.f32.mrb[30].mxu1  ;;  %v4347_v15 = vadd.f32 %v4346_v37, %v4345_v62  ;;  %v4348_v38 = vpop.f32.mrb[34].mxu0 }
 0x298   : > { %v4327_v54 = vpop.f32.mrb[31].mxu1  ;;  %v4349_v3 = vpop.f32.mrb[35].mxu0 }
 0x299   : > { %v6076_v42 = vadd.f32 %v4325_v19, %v2642_v23  ;;  %v4328_v46 = vadd.f32 %v4327_v54, %v4326_v29  ;;  %v2780_v45 = vadd.f32 %v4347_v15, %v6034_v24  ;;  %v4350_v41 = vadd.f32 %v4349_v3, %v4348_v38 }
 0x29b   : > { %v6079_v17 = vadd.f32 %v4328_v46, %v2645_v55  ;;  %v2783_v57 = vadd.f32 %v4350_v41, %v6036_v20 }
 0x29d   : > { %v4409_v28 = vpop.f32.mrb[32].mxu1  ;;  %v4351_v33 = vpop.f32.mrb[36].mxu0 }
 0x29e   : > { %v4410_v1 = vpop.f32.mrb[33].mxu1  ;;  %v4352_v2 = vpop.f32.mrb[37].mxu0 }
 0x29f   : > { %v4411_v50 = vadd.f32 %v4410_v1, %v4409_v28  ;;  %v4412_v52 = vpop.f32.mrb[34].mxu1  ;;  %v4353_v39 = vadd.f32 %v4352_v2, %v4351_v33  ;;  %v4354_v30 = vpop.f32.mrb[38].mxu0 }
 0x2a0   : > { %v4413_v11 = vpop.f32.mrb[35].mxu1  ;;  %v4355_v35 = vpop.f32.mrb[39].mxu0 }
 0x2a1   : > { %v4414_v56 = vadd.f32 %v4413_v11, %v4412_v52  ;;  %v2788_v0 = vadd.f32 %v4353_v39, %v6040_v18  ;;  %v4356_v4 = vadd.f32 %v4355_v35, %v4354_v30  ;;  %v6083_v24 = vadd.f32 %v4411_v50, %v2780_v45 }
 0x2a3   : > { %v2791_v25 = vadd.f32 %v4356_v4, %v6042_v60  ;;  %v6086_v22 = vadd.f32 %v4414_v56, %v2783_v57 }
 0x2a5   : > { %v4415_v20 = vpop.f32.mrb[36].mxu1  ;;  %v4357_v59 = vpop.f32.mrb[40].mxu0 }
 0x2a6   : > { %v4416_v16 = vpop.f32.mrb[37].mxu1  ;;  %v4358_v5 = vpop.f32.mrb[41].mxu0 }
 0x2a7   : > { %v4417_v47 = vadd.f32 %v4416_v16, %v4415_v20  ;;  %v4418_v43 = vpop.f32.mrb[38].mxu1  ;;  %v4359_v10 = vadd.f32 %v4358_v5, %v4357_v59  ;;  %v4360_v21 = vpop.f32.mrb[42].mxu0 }
 0x2a8   : > { %v4419_v63 = vpop.f32.mrb[39].mxu1  ;;  %v4361_v27 = vpop.f32.mrb[43].mxu0 }
 0x2a9   : > { %v4420_v40 = vadd.f32 %v4419_v63, %v4418_v43  ;;  %v2796_v18 = vadd.f32 %v4359_v10, %v6046_v36  ;;  %v4362_v7 = vadd.f32 %v4361_v27, %v4360_v21  ;;  %v6089_v26 = vadd.f32 %v4417_v47, %v2788_v0 }
 0x2ab   : > { %v2799_v60 = vadd.f32 %v4362_v7, %v6048_v53  ;;  %v6092_v32 = vadd.f32 %v4420_v40, %v2791_v25 }
 0x2ad   : > { %v4421_v12 = vpop.f32.mrb[40].mxu1  ;;  %v4363_v44 = vpop.f32.mrb[44].mxu0 }
 0x2ae   : > { %v4422_v48 = vpop.f32.mrb[41].mxu1  ;;  %v4364_v61 = vpop.f32.mrb[45].mxu0 }
 0x2af   : > { %v4423_v23 = vadd.f32 %v4422_v48, %v4421_v12  ;;  %v4424_v13 = vpop.f32.mrb[42].mxu1  ;;  %v4365_v62 = vadd.f32 %v4364_v61, %v4363_v44  ;;  %v4366_v8 = vpop.f32.mrb[46].mxu0 }
 0x2b0   : > { %v4425_v37 = vpop.f32.mrb[43].mxu1  ;;  %v4367_v55 = vpop.f32.mrb[47].mxu0 }
 0x2b1   : > { %v4426_v19 = vadd.f32 %v4425_v37, %v4424_v13  ;;  %v2804_v36 = vadd.f32 %v4365_v62, %v6052_v34  ;;  %v4368_v29 = vadd.f32 %v4367_v55, %v4366_v8  ;;  %v6095_v15 = vadd.f32 %v4423_v23, %v2796_v18 }
 0x2b3   : > { %v2807_v53 = vadd.f32 %v4368_v29, %v6054_v9  ;;  %v6098_v38 = vadd.f32 %v4426_v19, %v2799_v60 }
 0x2b5   : > { %v4427_v54 = vpop.f32.mrb[44].mxu1  ;;  %v4369_v3 = vpop.f32.mrb[48].mxu0 }
 0x2b6   : > { %v4428_v46 = vpop.f32.mrb[45].mxu1  ;;  %v4370_v45 = vpop.f32.mrb[49].mxu0 }
 0x2b7   : > { %v4429_v41 = vadd.f32 %v4428_v46, %v4427_v54  ;;  %v4430_v57 = vpop.f32.mrb[46].mxu1  ;;  %v4371_v28 = vadd.f32 %v4370_v45, %v4369_v3  ;;  %v4372_v33 = vpop.f32.mrb[50].mxu0 }
 0x2b8   : > { %v4431_v1 = vpop.f32.mrb[47].mxu1  ;;  %v4373_v2 = vpop.f32.mrb[51].mxu0 }
 0x2b9   : > { %v4432_v50 = vadd.f32 %v4431_v1, %v4430_v57  ;;  %v2812_v34 = vadd.f32 %v4371_v28, %v6058_v51  ;;  %v4374_v52 = vadd.f32 %v4373_v2, %v4372_v33  ;;  %v6101_v39 = vadd.f32 %v4429_v41, %v2804_v36 }
 0x2bb   : > { %v2815_v9 = vadd.f32 %v4374_v52, %v6060_v31  ;;  %v6104_v30 = vadd.f32 %v4432_v50, %v2807_v53 }
 0x2bd   : > { %v4433_v11 = vpop.f32.mrb[48].mxu1  ;;  %v4375_v35 = vpop.f32.mrb[52].mxu0 }
 0x2be   : > { %v4434_v56 = vpop.f32.mrb[49].mxu1  ;;  %v4376_v0 = vpop.f32.mrb[53].mxu0 }
 0x2bf   : > { %v4435_v4 = vadd.f32 %v4434_v56, %v4433_v11  ;;  %v4436_v25 = vpop.f32.mrb[50].mxu1  ;;  %v4377_v20 = vadd.f32 %v4376_v0, %v4375_v35  ;;  %v4378_v59 = vpop.f32.mrb[54].mxu0 }
 0x2c0   : > { %v4437_v16 = vpop.f32.mrb[51].mxu1  ;;  %v4379_v5 = vpop.f32.mrb[55].mxu0 }
 0x2c1   : > { %v4438_v47 = vadd.f32 %v4437_v16, %v4436_v25  ;;  %v2820_v51 = vadd.f32 %v4377_v20, %v6064_v6  ;;  %v4380_v43 = vadd.f32 %v4379_v5, %v4378_v59  ;;  %v6107_v10 = vadd.f32 %v4435_v4, %v2812_v34 }
 0x2c3   : > { %v2823_v31 = vadd.f32 %v4380_v43, %v6066_v49  ;;  %v6110_v21 = vadd.f32 %v4438_v47, %v2815_v9 }
 0x2c5   : > { %v4439_v63 = vpop.f32.mrb[52].mxu1  ;;  %v4381_v27 = vpop.f32.mrb[56].mxu0 }
 0x2c6   : > { %v4440_v40 = vpop.f32.mrb[53].mxu1  ;;  %v4382_v18 = vpop.f32.mrb[57].mxu0 }
 0x2c7   : > { %v4441_v7 = vadd.f32 %v4440_v40, %v4439_v63  ;;  %v4442_v60 = vpop.f32.mrb[54].mxu1  ;;  %v4383_v12 = vadd.f32 %v4382_v18, %v4381_v27  ;;  %v4384_v44 = vpop.f32.mrb[58].mxu0 }
 0x2c8   : > { %v4443_v48 = vpop.f32.mrb[55].mxu1  ;;  %v4385_v61 = vpop.f32.mrb[59].mxu0 }
 0x2c9   : > { %v4444_v23 = vadd.f32 %v4443_v48, %v4442_v60  ;;  %v2828_v6 = vadd.f32 %v4383_v12, %v6070_v14  ;;  %v4386_v13 = vadd.f32 %v4385_v61, %v4384_v44  ;;  %v2917_v62 = vadd.f32 %v4441_v7, %v2820_v51 }
 0x2cb   : > { %v2831_v8 = vadd.f32 %v4386_v13, %v6072_v58  ;;  %v2920_v49 = vadd.f32 %v4444_v23, %v2823_v31 }
 0x2cd   : > { %v4445_v37 = vpop.f32.mrb[56].mxu1  ;;  %v4387_v55 = vpop.f32.mrb[60].mxu0 }
 0x2ce   : > { %v4446_v19 = vpop.f32.mrb[57].mxu1  ;;  %v4388_v36 = vpop.f32.mrb[61].mxu0 }
 0x2cf   : > { %v4447_v29 = vadd.f32 %v4446_v19, %v4445_v37  ;;  %v4448_v53 = vpop.f32.mrb[58].mxu1  ;;  %v4389_v54 = vadd.f32 %v4388_v36, %v4387_v55  ;;  %v4390_v3 = vpop.f32.mrb[62].mxu0 }
 0x2d0   : > { %v4449_v46 = vpop.f32.mrb[59].mxu1  ;;  %v4391_v45 = vpop.f32.mrb[63].mxu0 }
 0x2d1   : > { %v4450_v41 = vadd.f32 %v4449_v46, %v4448_v53  ;;  %v2836_v57 = vadd.f32 %v4389_v54, %v6076_v42  ;;  %v4392_v14 = vadd.f32 %v4391_v45, %v4390_v3  ;;  %v6115_v28 = vadd.f32 %v4447_v29, %v2828_v6 }
 0x2d3   : > { %v2839_v58 = vadd.f32 %v4392_v14, %v6079_v17  ;;  %v6118_v33 = vadd.f32 %v4450_v41, %v2831_v8 }
 0x2d5   : > { %v4451_v1 = vpop.f32.mrb[60].mxu1  ;;  %v4561_v2 = vpop.f32.mrb[64].mxu0 }
 0x2d6   : > { %v4452_v50 = vpop.f32.mrb[61].mxu1  ;;  %v2982_v34 = vadd.f32 %v4561_v2, %v6089_v26  ;;  %v2973_v52 = vpop.f32.mrb[65].mxu0 }
 0x2d7   : > { %v4453_v9 = vadd.f32 %v4452_v50, %v4451_v1  ;;  %v4454_v11 = vpop.f32.mrb[62].mxu1  ;;  %v2974_v35 = vadd.f32 %v2973_v52, %v6083_v24  ;;  %v4562_v56 = vpop.f32.mrb[66].mxu0 }
 0x2d8   : > { %v4455_v42 = vpop.f32.mrb[63].mxu1  ;;  %v2985_v0 = vadd.f32 %v4562_v56, %v6092_v32  ;;  %v2976_v4 = vpop.f32.mrb[67].mxu0  ;;  %v3038_v59 = vmax.f32 %v2982_v34, 0.0 }
 0x2d9   : > { %v4456_v25 = vadd.f32 %v4455_v42, %v4454_v11  ;;  %v2977_v17 = vadd.f32 %v2976_v4, %v6086_v22  ;;  %v2933_v20 = vadd.f32 %v4453_v9, %v2836_v57  ;;  %v3036_v5 = vmax.f32 %v2974_v35, 0.0 }
 0x2da   : > { %v3039_v16 = vmax.f32 %v2985_v0, 0.0 }
 0x2db   : > { %v3037_v47 = vmax.f32 %v2977_v17, 0.0  ;;  %v2936_v26 = vadd.f32 %v4456_v25, %v2839_v58 }
 0x2dc   : > { %v3053_v51 = vpack.c.bf16 %v3039_v16, %v3038_v59 }
 0x2dd   : > { %v4569_v43 = vpop.f32.mrb[64].mxu1  ;;  %v3052_v31 = vpack.c.bf16 %v3037_v47, %v3036_v5  ;;  %v3072_v63 = vadd.f32 %v3037_v47, %v3036_v5  ;;  %v4565_v24 = vpop.f32.mrb[68].mxu0 }
 0x2de   : > { %v3014_v27 = vadd.f32 %v4569_v43, %v2917_v62  ;;  %v3005_v40 = vpop.f32.mrb[65].mxu1  ;;  %3064 = vst [vmem:[%s6125_s25 + $0x8] sm:$0xff] %v3053_v51  ;;  %v2998_v22 = vadd.f32 %v4565_v24, %v6101_v39  ;;  %v2989_v32 = vpop.f32.mrb[69].mxu0  ;;  %v3071_v51 = vld [vmem:[#allocation5] sm:$0x1] }
 0x2df   : > { %v3006_v18 = vadd.f32 %v3005_v40, %v6107_v10  ;;  %v4570_v7 = vpop.f32.mrb[66].mxu1  ;;  %3063 = vst [vmem:[%s6125_s25] sm:$0xff] %v3052_v31  ;;  %v3073_v60 = vadd.f32 %v3072_v63, %v3038_v59  ;;  %v2990_v12 = vadd.f32 %v2989_v32, %v6095_v15  ;;  %v4566_v44 = vpop.f32.mrb[70].mxu0 }
 0x2e0   : > { %v3017_v48 = vadd.f32 %v4570_v7, %v2920_v49  ;;  %v3008_v61 = vpop.f32.mrb[67].mxu1  ;;  %v3001_v23 = vadd.f32 %v4566_v44, %v6104_v30  ;;  %v2992_v6 = vpop.f32.mrb[71].mxu0  ;;  %v3046_v13 = vmax.f32 %v3014_v27, 0.0  ;;  %v3042_v10 = vmax.f32 %v2998_v22, 0.0 }
 0x2e1   : > { %v3009_v62 = vadd.f32 %v3008_v61, %v6110_v21  ;;  %v3040_v8 = vmax.f32 %v2990_v12, 0.0  ;;  %v3074_v39 = vadd.f32 %v3073_v60, %v3039_v16  ;;  %v2993_v19 = vadd.f32 %v2992_v6, %v6098_v38 }
 0x2e2   : > { %v3047_v37 = vmax.f32 %v3017_v48, 0.0  ;;  %v3043_v55 = vmax.f32 %v3001_v23, 0.0  ;;  %v3044_v15 = vmax.f32 %v3006_v18, 0.0 }
 0x2e3   : > { %v3045_v36 = vmax.f32 %v3009_v62, 0.0  ;;  %v3075_v49 = vadd.f32 %v3074_v39, %v3040_v8  ;;  %v3041_v53 = vmax.f32 %v2993_v19, 0.0 }
 0x2e4   : > { %v3057_v29 = vpack.c.bf16 %v3047_v37, %v3046_v13  ;;  %v3055_v30 = vpack.c.bf16 %v3043_v55, %v3042_v10 }
 0x2e5   : > { %v3056_v54 = vpack.c.bf16 %v3045_v36, %v3044_v15  ;;  %v4573_v3 = vpop.f32.mrb[68].mxu1  ;;  %v3054_v45 = vpack.c.bf16 %v3041_v53, %v3040_v8  ;;  %v3076_v41 = vadd.f32 %v3075_v49, %v3041_v53 }
 0x2e6   : > { %3068 = vst [vmem:[%s6125_s25 + $0x28] sm:$0xff] %v3057_v29  ;;  %v3030_v21 = vadd.f32 %v4573_v3, %v2933_v20  ;;  %v3021_v46 = vpop.f32.mrb[69].mxu1  ;;  %3066 = vst [vmem:[%s6125_s25 + $0x18] sm:$0xff] %v3055_v30 }
 0x2e7   : > { %3067 = vst [vmem:[%s6125_s25 + $0x20] sm:$0xff] %v3056_v54  ;;  %v3022_v57 = vadd.f32 %v3021_v46, %v6115_v28  ;;  %v4574_v38 = vpop.f32.mrb[70].mxu1  ;;  %3065 = vst [vmem:[%s6125_s25 + $0x10] sm:$0xff] %v3054_v45  ;;  %v3077_v58 = vadd.f32 %v3076_v41, %v3042_v10 }
 0x2e8   : > { %v3033_v14 = vadd.f32 %v4574_v38, %v2936_v26  ;;  %v3024_v1 = vpop.f32.mrb[71].mxu1  ;;  %v3050_v50 = vmax.f32 %v3030_v21, 0.0 }
 0x2e9   : > { %v3025_v2 = vadd.f32 %v3024_v1, %v6118_v33  ;;  %v3078_v52 = vadd.f32 %v3077_v58, %v3043_v55  ;;  %v3048_v9 = vmax.f32 %v3022_v57, 0.0 }
 0x2ea   : > { %v3051_v34 = vmax.f32 %v3033_v14, 0.0 }
 0x2eb   : > { %v3049_v11 = vmax.f32 %v3025_v2, 0.0  ;;  %v3079_v56 = vadd.f32 %v3078_v52, %v3044_v15 }
 0x2ec   : > { %v3059_v35 = vpack.c.bf16 %v3051_v34, %v3050_v50 }
 0x2ed   : > { %v3058_v42 = vpack.c.bf16 %v3049_v11, %v3048_v9  ;;  %v3080_v0 = vadd.f32 %v3079_v56, %v3045_v36 }
 0x2ee   : > { %3070 = vst [vmem:[%s6125_s25 + $0x38] sm:$0xff] %v3059_v35 }
 0x2ef   : > { %3069 = vst [vmem:[%s6125_s25 + $0x30] sm:$0xff] %v3058_v42  ;;  %v3081_v28 = vadd.f32 %v3080_v0, %v3046_v13 }
 0x2f1   : > { %v3082_v4 = vadd.f32 %v3081_v28, %v3047_v37 }
 0x2f3   : > { %v3083_v25 = vadd.f32 %v3082_v4, %v3048_v9 }
 0x2f5   : > { %v3084_v17 = vadd.f32 %v3083_v25, %v3049_v11 }
 0x2f7   : > { %v3085_v20 = vadd.f32 %v3084_v17, %v3050_v50 }
 0x2f9   : > { %v3086_v59 = vadd.f32 %v3085_v20, %v3051_v34 }
 0x2fb   : > { %v3087_v16 = vrot.slane %v3086_v59, 4 }
 0x2fd   : > { %v3088_v5 = vadd.f32 %v3087_v16, %v3086_v59 }
 0x2ff   : > { %v3089_v33 = vrot.slane %v3088_v5, 2 }
 0x301   : > { %v3090_v47 = vadd.f32 %v3089_v33, %v3088_v5 }
 0x303   : > { %v3091_v26 = vrot.slane %v3090_v47, 1 }
 0x305   : > { %v3092_v43 = vadd.f32 %v3091_v26, %v3090_v47 }
 0x307   : > { %v3093_v31 = vadd.f32 %v3092_v43, %v3071_v51 }
 0x309   : > { %3094 = vst [vmem:[#allocation5] sm:$0x1] %v3093_v31 }
 0x30a PF: > { %p4126_p12 = scmp.ne.s32.totalorder %s5061_s13, 2 }
 0x30b   : > { %v6147_v63 = vld [vmem:[%s6484_s8] ss:$0 sm:$0xff] (!%p4126_p12)  ;;  %v6152_v24 = vld [vmem:[%s6484_s8 + $0x1] sm:$0x1] (!%p4126_p12)  ;;  %p4127_p13 = scmp.ne.s32.totalorder (!%p4126_p12), %s5057_s12, 0 }
 0x30c   : > { %3098 = sbr.rel (%p4126_p12) target bundleno = 1772 (0x6ec), region = 88 }
 0x313   : > { %3104 = sbr.rel (%p4127_p13) target bundleno = 1491 (0x5d3), region = 92  ;;  %v4895_v27 = vld [vmem:[%s6480_s4] sm:$0xff] (!%p4127_p13)   ;;  %v5091_v40 = vmov (!%p4127_p13), 0.0   ;;  %v4896_v22 = vld [vmem:[%s6480_s4 + $0x8] sm:$0xff] (!%p4127_p13)   ;;  %vm5092_vm12 = vmmov (!%p4127_p13), 0   ;;  %v4897_v32 = vld [vmem:[%s6480_s4 + $0x10] sm:$0xff] (!%p4127_p13)  }
 0x314   : > { %4575 = vmatprep.subr.bf16.mxu0 (!%p4127_p13), %v5091_v40  ;;  %4595 = vmatprep.subr.bf16.mxu1 (!%p4127_p13), %v5091_v40  ;;  %v4903_v18 = vld [vmem:[%s6481_s5] sm:$0xff] (!%p4127_p13)   ;;  %v4898_v7 = vld [vmem:[%s6480_s4 + $0x18] sm:$0xff] (!%p4127_p13)   ;;  %v4904_v60 = vld [vmem:[%s6481_s5 + $0x8] sm:$0xff] (!%p4127_p13)  }
 0x315   : > { %4576 = vmatpush3.bf16.msra.mxu0 (!%p4127_p13), %v4895_v27  ;;  %4591 = vmatprep.mubr.msk.bf16.mxu0 (!%p4127_p13), %vm5092_vm12, %v5091_v40  ;;  %v4899_v12 = vld [vmem:[%s6480_s4 + $0x20] sm:$0xff] (!%p4127_p13)   ;;  %v4905_v44 = vld [vmem:[%s6481_s5 + $0x10] sm:$0xff] (!%p4127_p13)   ;;  %v4900_v48 = vld [vmem:[%s6480_s4 + $0x28] sm:$0xff] (!%p4127_p13)  }
 0x316   : > { %4577 = vmatprep.subr.bf16.mxu0 (!%p4127_p13), %v5091_v40  ;;  %4611 = vmatprep.mubr.msk.bf16.mxu1 (!%p4127_p13), %vm5092_vm12, %v5091_v40  ;;  %v4906_v61 = vld [vmem:[%s6481_s5 + $0x18] sm:$0xff] (!%p4127_p13)   ;;  %v4901_v23 = vld [vmem:[%s6480_s4 + $0x30] sm:$0xff] (!%p4127_p13)   ;;  %v3105_v6 = vld [vmem:[#allocation5] sm:$0x1] (!%p4127_p13) }
 0x317   : > { %4596 = vmatpush3.bf16.msra.mxu1 (!%p4127_p13), %v4903_v18  ;;  %v4907_v13 = vld [vmem:[%s6481_s5 + $0x20] sm:$0xff] (!%p4127_p13)   ;;  %v3106_v62 = vmul.f32 (!%p4127_p13), 0.00390625, %v3105_v6  ;;  %v4902_v8 = vld [vmem:[%s6480_s4 + $0x38] sm:$0xff] (!%p4127_p13)   ;;  %v4908_v39 = vld [vmem:[%s6481_s5 + $0x28] sm:$0xff] (!%p4127_p13)  }
 0x318   : > { %4597 = vmatprep.subr.bf16.mxu1 (!%p4127_p13), %v5091_v40  ;;  %v4909_v10 = vld [vmem:[%s6481_s5 + $0x30] sm:$0xff] (!%p4127_p13)   ;;  %v4910_v55 = vld [vmem:[%s6481_s5 + $0x38] sm:$0xff] (!%p4127_p13)   ;;  %v4911_v19 = vld [vmem:[%s6482_s6] sm:$0xff] (!%p4127_p13)  }
 0x319   : > { %4578 = vmatpush3.bf16.msra.mxu0 (!%p4127_p13), %v4896_v22  ;;  %v3107_v37 = vpack.c.bf16 (!%p4127_p13), %v3106_v62, %v3106_v62  ;;  %v4912_v15 = vld [vmem:[%s6482_s6 + $0x8] sm:$0xff] (!%p4127_p13)   ;;  %v4913_v36 = vld [vmem:[%s6482_s6 + $0x10] sm:$0xff] (!%p4127_p13)   ;;  %v4914_v49 = vld [vmem:[%s6482_s6 + $0x18] sm:$0xff] (!%p4127_p13)  }
 0x31a   : > { %4579 = vmatprep.subr.bf16.mxu0 %v5091_v40  ;;  %v4915_v29 = vld [vmem:[%s6482_s6 + $0x20] sm:$0xff]   ;;  %v4916_v30 = vld [vmem:[%s6482_s6 + $0x28] sm:$0xff]   ;;  %v4917_v53 = vld [vmem:[%s6482_s6 + $0x30] sm:$0xff]  }
 0x31b   : > { %4598 = vmatpush3.bf16.msra.mxu1 %v4904_v60  ;;  %v4918_v57 = vld [vmem:[%s6482_s6 + $0x38] sm:$0xff]  }
 0x31c   : > { %4599 = vmatprep.subr.bf16.mxu1 %v5091_v40 }
 0x31d   : > { %4580 = vmatpush3.bf16.msra.mxu0 %v4897_v32 }
 0x31e   : > { %4581 = vmatprep.subr.bf16.mxu0 %v5091_v40 }
 0x31f   : > { %4600 = vmatpush3.bf16.msra.mxu1 %v4905_v44 }
 0x320   : > { %4601 = vmatprep.subr.bf16.mxu1 %v5091_v40 }
 0x321   : > { %4582 = vmatpush3.bf16.msra.mxu0 %v4898_v7 }
 0x322   : > { %4583 = vmatprep.subr.bf16.mxu0 %v5091_v40 }
 0x323   : > { %4602 = vmatpush3.bf16.msra.mxu1 %v4906_v61 }
 0x324   : > { %4603 = vmatprep.subr.bf16.mxu1 %v5091_v40 }
 0x325   : > { %4584 = vmatpush3.bf16.msra.mxu0 %v4899_v12 }
 0x326   : > { %4585 = vmatprep.subr.bf16.mxu0 %v5091_v40 }
 0x327   : > { %4604 = vmatpush3.bf16.msra.mxu1 %v4907_v13 }
 0x328   : > { %4605 = vmatprep.subr.bf16.mxu1 %v5091_v40 }
 0x329   : > { %4586 = vmatpush3.bf16.msra.mxu0 %v4900_v48 }
 0x32a   : > { %4587 = vmatprep.subr.bf16.mxu0 %v5091_v40 }
 0x32b   : > { %4606 = vmatpush3.bf16.msra.mxu1 %v4908_v39 }
 0x32c   : > { %4607 = vmatprep.subr.bf16.mxu1 %v5091_v40 }
 0x32d   : > { %4588 = vmatpush3.bf16.msra.mxu0 %v4901_v23 }
 0x32e   : > { %4589 = vmatprep.subr.bf16.mxu0 %v5091_v40 }
 0x32f   : > { %4608 = vmatpush3.bf16.msra.mxu1 %v4909_v10 }
 0x330   : > { %4609 = vmatprep.subr.bf16.mxu1 %v5091_v40 }
 0x331   : > { %4590 = vmatpush3.bf16.msra.mxu0 %v4902_v8 }
 0x332   : > { %4615 = vmatprep.subr.bf16.mxu0 %v5091_v40 }
 0x333   : > { %4610 = vmatpush3.bf16.msra.mxu1 %v4910_v55 }
 0x334   : > { %4592 = vmatmul.mubr.bf16.vlgmr.msra.gmra.mrb[0].mxu0 %v3107_v37 }
 0x335   : > { %4631 = vmatprep.mubr.msk.bf16.mxu0 %vm5092_vm12, %v5091_v40  ;;  %4616 = vmatpush3.bf16.msra.mxu0 %v4911_v19 }
 0x336   : > { %4617 = vmatprep.subr.bf16.mxu0 %v5091_v40 }
 0x339   : > { %4618 = vmatpush3.bf16.msra.mxu0 %v4912_v15 }
 0x33a   : > { %4619 = vmatprep.subr.bf16.mxu0 %v5091_v40 }
 0x33d   : > { %4620 = vmatpush3.bf16.msra.mxu0 %v4913_v36 }
 0x33e   : > { %4621 = vmatprep.subr.bf16.mxu0 %v5091_v40 }
 0x341   : > { %4622 = vmatpush3.bf16.msra.mxu0 %v4914_v49 }
 0x342   : > { %4623 = vmatprep.subr.bf16.mxu0 %v5091_v40 }
 0x345   : > { %4624 = vmatpush3.bf16.msra.mxu0 %v4915_v29 }
 0x346   : > { %4625 = vmatprep.subr.bf16.mxu0 %v5091_v40 }
 0x349   : > { %4626 = vmatpush3.bf16.msra.mxu0 %v4916_v30 }
 0x34a   : > { %4627 = vmatprep.subr.bf16.mxu0 %v5091_v40 }
 0x34d   : > { %4628 = vmatpush3.bf16.msra.mxu0 %v4917_v53 }
 0x34e   : > { %4629 = vmatprep.subr.bf16.mxu0 %v5091_v40 }
 0x351   : > { %4630 = vmatpush3.bf16.msra.mxu0 %v4918_v57 }
 0x407   : > { %v3206_v54 = vpop.f32.mrb[0].mxu0 }
 0x408   : > { %v3207_v3 = vadd.f32 %v3206_v54, %v6152_v24  ;;  %v4593_v21 = vpop.f32.mrb[1].mxu0 }
 0x409   : > { %v3209_v46 = vpop.f32.mrb[2].mxu0 }
 0x40a   : > { %v3212_v45 = vpack.c.bf16 %v3207_v3, %v3207_v3  ;;  %v4594_v41 = vpop.f32.mrb[3].mxu0 }
 0x40c   : > { %4612 = vmatmul.mubr.bf16.vlgmr.msra.gmra.mrb[0].mxu1 %v3212_v45 }
 0x4df   : > { %v3311_v38 = vpop.f32.mrb[0].mxu1 }
 0x4e0   : > { %v3317_v14 = vmax.f32 %v3311_v38, 0.0  ;;  %v4613_v58 = vpop.f32.mrb[1].mxu1 }
 0x4e1   : > { %v3314_v1 = vpop.f32.mrb[2].mxu1 }
 0x4e2   : > { %v3318_v2 = vpack.c.bf16 %v3317_v14, %v3317_v14  ;;  %v4614_v50 = vpop.f32.mrb[3].mxu1 }
 0x4e4   : > { %4632 = vmatmul.mubr.bf16.vlgmr.msra.gmra.mrb[4].mxu0 %v3318_v2 }
 0x5b7   : > { %v3417_v34 = vpop.f32.mrb[4].mxu0 }
 0x5b8   : > { %v4152_v52 = vmul.f32 -1.442695, %v3417_v34  ;;  %v4633_v9 = vpop.f32.mrb[5].mxu0 }
 0x5b9   : > { %v3420_v11 = vpop.f32.mrb[6].mxu0 }
 0x5ba   : > { %4919 = vpow2.f32 %v4152_v52  ;;  %v4634_v35 = vpop.f32.mrb[7].mxu0 }
 0x5c4   : > { %v4920_v56 = vpop.eup %4919 }
 0x5c5   : > { %v3426_v42 = vadd.f32 1.0, %v4920_v56 }
 0x5c7   : > { %4921 = vrcp.f32 %v3426_v42 }
 0x5d1   : > { %v4922_v0 = vpop.eup %4921 }
 0x5d2   : > { %3429 = vst [vmem:[#allocation6] sm:$0x1] %v4922_v0 }
 0x5d3 PF: > { %v4923_v28 = vld [vmem:[%s6480_s4] sm:$0xff]   ;;  %v4924_v4 = vld [vmem:[%s6480_s4 + $0x8] sm:$0xff]   ;;  %s4191_s23 = sshll.u32 %s5057_s12, 6  ;;  %v4925_v25 = vld [vmem:[%s6480_s4 + $0x10] sm:$0xff]   ;;  %vm3692_vm9 = vcmask 1043456   ;;  %vm3667_vm10 = vcmask 64512   ;;  %v3457_v39 = vlaneseq }
 0x5d4   : > { %4635 = vmatprep.subr.bf16.mxu0 %v4923_v28  ;;  %v3622_v17 = vld [vmem:[%s6477_s1] sm:$0xf]  ;;  %v4926_v20 = vld [vmem:[%s6480_s4 + $0x18] sm:$0xff]   ;;  %s6275_s21 = scalar_lea.vmem [#allocation3], %s4191_s23  ;;  %v4932_v33 = vld [vmem:[%s5285_s19 + $0x8] sm:$0xff]  }
 0x5d5   : > { %4636 = vmatpush3.bf16.msra.mxu0 %v4923_v28  ;;  %4705 = vmatprep.subr.msk.bf16.mxu1 %vm3692_vm9, %v3622_v17  ;;  %v3694_v59 = vsel %vm3692_vm9, %v3622_v17, 0  ;;  %v4931_v16 = vld [vmem:[%s5285_s19] sm:$0xff]   ;;  %v4933_v47 = vld [vmem:[%s5285_s19 + $0x10] sm:$0xff]   ;;  %v4928_v51 = vld [vmem:[%s6480_s4 + $0x28] sm:$0xff]   ;;  %v3458_v19 = vshrl.u32 %v3457_v39, 7 }
 0x5d6   : > { %4637 = vmatprep.subr.bf16.mxu0 %v4924_v4  ;;  %4668 = vmatpush3.bf16.msra.mxu1 %v3694_v59  ;;  %v3433_v5 = vld [vmem:[%s6275_s21] sm:$0xff]  ;;  %v4934_v43 = vld [vmem:[%s5285_s19 + $0x18] sm:$0xff]   ;;  %v4929_v27 = vld [vmem:[%s6480_s4 + $0x30] sm:$0xff]  }
 0x5d7   : > { %4651 = vmatprep.mubr.bf16.mxu0 %v3433_v5  ;;  %4669 = vmatprep.mubr.msk.bf16.mxu1 %vm3667_vm10, %v4931_v16  ;;  %v4927_v26 = vld [vmem:[%s6480_s4 + $0x20] sm:$0xff]   ;;  %v4930_v40 = vld [vmem:[%s6480_s4 + $0x38] sm:$0xff]   ;;  %v4936_v22 = vld [vmem:[%s5285_s19 + $0x28] sm:$0xff]   ;;  %v3459_v36 = vsub.s32 0, %v3458_v19 }
 0x5d8   : > { %v4935_v31 = vld [vmem:[%s5285_s19 + $0x20] sm:$0xff]   ;;  %v4937_v32 = vld [vmem:[%s5285_s19 + $0x30] sm:$0xff]   ;;  %v3434_v18 = vld [vmem:[%s6275_s21 + $0x8] sm:$0xff] }
 0x5d9   : > { %4638 = vmatpush3.bf16.msra.mxu0 %v4924_v4  ;;  %4670 = vmatmul.mubr.msk.bf16.vlgmr.msra.gmra.mrb[0].mxu1 %vm3667_vm10, %v4932_v33  ;;  %v3435_v7 = vld [vmem:[%s6275_s21 + $0x10] sm:$0xff]  ;;  %v4938_v60 = vld [vmem:[%s5285_s19 + $0x38] sm:$0xff]   ;;  %v3437_v44 = vld [vmem:[%s6275_s21 + $0x20] sm:$0xff]  ;;  %v6319_v53 = vrot.slane %v6152_v24, %v3459_v36 }
 0x5da   : > { %4639 = vmatprep.subr.bf16.mxu0 %v4925_v25  ;;  %4673 = vmatprep.mubr.msk.bf16.mxu1 %vm3667_vm10, %v4933_v47  ;;  %v3436_v12 = vld [vmem:[%s6275_s21 + $0x18] sm:$0xff]  ;;  %v3438_v48 = vld [vmem:[%s6275_s21 + $0x28] sm:$0xff]  ;;  %v3439_v61 = vld [vmem:[%s6275_s21 + $0x30] sm:$0xff] }
 0x5db   : > { %v3440_v23 = vld [vmem:[%s6275_s21 + $0x38] sm:$0xff]  ;;  %v6323_v21 = vld [vmem:[#allocation6] ss:$0 sm:$0xff] }
 0x5dd   : > { %4640 = vmatpush3.bf16.msra.mxu0 %v4925_v25 }
 0x5de   : > { %4641 = vmatprep.subr.bf16.mxu0 %v4926_v20 }
 0x5e1   : > { %4642 = vmatpush3.bf16.msra.mxu0 %v4926_v20  ;;  %4674 = vmatmul.mubr.msk.bf16.gmra.mrb[4].mxu1 %vm3667_vm10, %v4934_v43 }
 0x5e2   : > { %4643 = vmatprep.subr.bf16.mxu0 %v4927_v26  ;;  %4677 = vmatprep.mubr.msk.bf16.mxu1 %vm3667_vm10, %v4935_v31 }
 0x5e5   : > { %4644 = vmatpush3.bf16.msra.mxu0 %v4927_v26 }
 0x5e6   : > { %4645 = vmatprep.subr.bf16.mxu0 %v4928_v51 }
 0x5e9   : > { %4646 = vmatpush3.bf16.msra.mxu0 %v4928_v51  ;;  %4678 = vmatmul.mubr.msk.bf16.gmra.mrb[8].mxu1 %vm3667_vm10, %v4936_v22 }
 0x5ea   : > { %4647 = vmatprep.subr.bf16.mxu0 %v4929_v27  ;;  %4681 = vmatprep.mubr.msk.bf16.mxu1 %vm3667_vm10, %v4937_v32 }
 0x5ed   : > { %4648 = vmatpush3.bf16.msra.mxu0 %v4929_v27 }
 0x5ee   : > { %4649 = vmatprep.subr.bf16.mxu0 %v4930_v40 }
 0x5f1   : > { %4650 = vmatpush3.bf16.msra.mxu0 %v4930_v40  ;;  %4682 = vmatmul.mubr.msk.bf16.gmra.mrb[12].mxu1 %vm3667_vm10, %v4938_v60 }
 0x5f4   : > { %4652 = vmatmul.mubr.bf16.vlgmr.msra.gmra.mrb[0].mxu0 %v3434_v18 }
 0x5f5   : > { %4655 = vmatprep.mubr.bf16.mxu0 %v3435_v7 }
 0x5fc   : > { %4656 = vmatmul.mubr.bf16.gmra.mrb[4].mxu0 %v3436_v12 }
 0x5fd   : > { %4659 = vmatprep.mubr.bf16.mxu0 %v3437_v44 }
 0x604   : > { %4660 = vmatmul.mubr.bf16.gmra.mrb[8].mxu0 %v3438_v48 }
 0x605   : > { %4663 = vmatprep.mubr.bf16.mxu0 %v3439_v61 }
 0x60c   : > { %4664 = vmatmul.mubr.bf16.gmra.mrb[12].mxu0 %v3440_v23 }
 0x6ac   : > { %v4671_v6 = vpop.f32.mrb[0].mxu1 }
 0x6ad   : > { %v3730_v13 = vpop.f32.mrb[1].mxu1  ;;  %v3739_v46 = vadd.f32 %v4671_v6, %v6147_v63 }
 0x6ae   : > { %v4672_v62 = vpop.f32.mrb[2].mxu1  ;;  %v3731_v57 = vadd.f32 %v6147_v63, %v3730_v13 }
 0x6af   : > { %v3733_v8 = vpop.f32.mrb[3].mxu1  ;;  %v3742_v35 = vadd.f32 %v4672_v62, %v6147_v63 }
 0x6b0   : > { %v3734_v28 = vadd.f32 %v6147_v63, %v3733_v8 }
 0x6b4   : > { %v4675_v37 = vpop.f32.mrb[4].mxu1 }
 0x6b5   : > { %v3746_v10 = vpop.f32.mrb[5].mxu1  ;;  %v3755_v33 = vadd.f32 %v4675_v37, %v6147_v63 }
 0x6b6   : > { %v4676_v55 = vpop.f32.mrb[6].mxu1  ;;  %v3747_v43 = vadd.f32 %v6147_v63, %v3746_v10 }
 0x6b7   : > { %v3749_v15 = vpop.f32.mrb[7].mxu1  ;;  %v3758_v12 = vadd.f32 %v4676_v55, %v6147_v63 }
 0x6b8   : > { %v3750_v61 = vadd.f32 %v6147_v63, %v3749_v15 }
 0x6bc   : > { %v6312_v49 = vpop.f32.mrb[8].mxu1 }
 0x6bd   : > { %v6314_v29 = vpop.f32.mrb[9].mxu1  ;;  %v3771_v10 = vadd.f32 %v6312_v49, %v6147_v63 }
 0x6be   : > { %v6316_v30 = vpop.f32.mrb[10].mxu1  ;;  %v3763_v15 = vadd.f32 %v6147_v63, %v6314_v29 }
 0x6bf   : > { %v6321_v54 = vpop.f32.mrb[11].mxu1  ;;  %v3774_v29 = vadd.f32 %v6316_v30, %v6147_v63 }
 0x6c4   : > { %v6329_v58 = vpop.f32.mrb[12].mxu1 }
 0x6c5   : > { %v6333_v50 = vpop.f32.mrb[13].mxu1  ;;  %v3787_v30 = vadd.f32 %v6329_v58, %v6147_v63 }
 0x6c6   : > { %v6337_v9 = vpop.f32.mrb[14].mxu1 }
 0x6c7   : > { %v4653_v3 = vpop.f32.mrb[0].mxu0  ;;  %v6341_v42 = vpop.f32.mrb[15].mxu1 }
 0x6c8   : > { %v3552_v45 = vadd.f32 %v4653_v3, %v6319_v53  ;;  %v3543_v41 = vpop.f32.mrb[1].mxu0 }
 0x6c9   : > { %v3544_v38 = vadd.f32 %v3543_v41, %v6319_v53  ;;  %v4654_v14 = vpop.f32.mrb[2].mxu0 }
 0x6ca   : > { %v3802_v24 = vmul.f32 %v6323_v21, %v3552_v45  ;;  %v3555_v1 = vadd.f32 %v4654_v14, %v6319_v53  ;;  %v3546_v2 = vpop.f32.mrb[3].mxu0 }
 0x6cb   : > { %v3800_v34 = vmul.f32 %v6323_v21, %v3544_v38  ;;  %v3547_v52 = vadd.f32 %v3546_v2, %v6319_v53  ;;  %v3766_v2 = vadd.f32 %v6147_v63, %v6321_v54  ;;  %v3779_v54 = vadd.f32 %v6147_v63, %v6333_v50 }
 0x6cc   : > { %v3818_v11 = vadd.f32 %v3802_v24, %v3739_v46  ;;  %v3803_v56 = vmul.f32 %v6323_v21, %v3555_v1  ;;  %v3790_v50 = vadd.f32 %v6337_v9, %v6147_v63 }
 0x6cd   : > { %v3816_v0 = vadd.f32 %v3800_v34, %v3731_v57  ;;  %v3801_v4 = vmul.f32 %v6323_v21, %v3547_v52 }
 0x6ce   : > { %v3834_v25 = vmax.f32 %v3818_v11, 0.0  ;;  %v3819_v17 = vadd.f32 %v3803_v56, %v3742_v35 }
 0x6cf   : > { %v3832_v20 = vmax.f32 %v3816_v0, 0.0  ;;  %v3817_v59 = vadd.f32 %v3801_v4, %v3734_v28  ;;  %v4657_v16 = vpop.f32.mrb[4].mxu0 }
 0x6d0   : > { %3850 = vst [vmem:[%s5287_s28 + $0x10] sm:$0xff] %v3834_v25  ;;  %v3835_v5 = vmax.f32 %v3819_v17, 0.0  ;;  %v3568_v47 = vadd.f32 %v4657_v16, %v6319_v53  ;;  %v3559_v26 = vpop.f32.mrb[5].mxu0 }
 0x6d1   : > { %3848 = vst [vmem:[%s5287_s28] sm:$0xff] %v3832_v20  ;;  %v3833_v51 = vmax.f32 %v3817_v59, 0.0  ;;  %v3560_v31 = vadd.f32 %v3559_v26, %v6319_v53  ;;  %v4658_v27 = vpop.f32.mrb[6].mxu0 }
 0x6d2   : > { %3851 = vst [vmem:[%s5287_s28 + $0x18] sm:$0xff] %v3835_v5  ;;  %v3806_v40 = vmul.f32 %v6323_v21, %v3568_v47  ;;  %v3571_v22 = vadd.f32 %v4658_v27, %v6319_v53  ;;  %v3562_v32 = vpop.f32.mrb[7].mxu0 }
 0x6d3   : > { %3849 = vst [vmem:[%s5287_s28 + $0x8] sm:$0xff] %v3833_v51  ;;  %v3804_v18 = vmul.f32 %v6323_v21, %v3560_v31  ;;  %v3563_v7 = vadd.f32 %v3562_v32, %v6319_v53  ;;  %v3782_v31 = vadd.f32 %v6147_v63, %v6341_v42 }
 0x6d4   : > { %v3822_v60 = vadd.f32 %v3806_v40, %v3755_v33  ;;  %v3807_v44 = vmul.f32 %v6323_v21, %v3571_v22 }
 0x6d5   : > { %v3820_v48 = vadd.f32 %v3804_v18, %v3747_v43  ;;  %v3805_v23 = vmul.f32 %v6323_v21, %v3563_v7 }
 0x6d6   : > { %v3838_v6 = vmax.f32 %v3822_v60, 0.0  ;;  %v3823_v13 = vadd.f32 %v3807_v44, %v3758_v12 }
 0x6d7   : > { %v3836_v62 = vmax.f32 %v3820_v48, 0.0  ;;  %v3821_v8 = vadd.f32 %v3805_v23, %v3750_v61  ;;  %v4661_v39 = vpop.f32.mrb[8].mxu0 }
 0x6d8   : > { %3854 = vst [vmem:[%s5287_s28 + $0x30] sm:$0xff] %v3838_v6  ;;  %v3839_v37 = vmax.f32 %v3823_v13, 0.0  ;;  %v3584_v55 = vadd.f32 %v4661_v39, %v6319_v53  ;;  %v3575_v19 = vpop.f32.mrb[9].mxu0 }
 0x6d9   : > { %3852 = vst [vmem:[%s5287_s28 + $0x20] sm:$0xff] %v3836_v62  ;;  %v3837_v36 = vmax.f32 %v3821_v8, 0.0  ;;  %v3576_v3 = vadd.f32 %v3575_v19, %v6319_v53  ;;  %v4662_v46 = vpop.f32.mrb[10].mxu0 }
 0x6da   : > { %3855 = vst [vmem:[%s5287_s28 + $0x38] sm:$0xff] %v3839_v37  ;;  %v3810_v45 = vmul.f32 %v6323_v21, %v3584_v55  ;;  %v3587_v41 = vadd.f32 %v4662_v46, %v6319_v53  ;;  %v3578_v57 = vpop.f32.mrb[11].mxu0 }
 0x6db   : > { %3853 = vst [vmem:[%s5287_s28 + $0x28] sm:$0xff] %v3837_v36  ;;  %v3808_v49 = vmul.f32 %v6323_v21, %v3576_v3  ;;  %v3579_v38 = vadd.f32 %v3578_v57, %v6319_v53 }
 0x6dc   : > { %v3826_v14 = vadd.f32 %v3810_v45, %v3771_v10  ;;  %v3811_v24 = vmul.f32 %v6323_v21, %v3587_v41 }
 0x6dd   : > { %v3824_v1 = vadd.f32 %v3808_v49, %v3763_v15  ;;  %v3809_v34 = vmul.f32 %v6323_v21, %v3579_v38 }
 0x6de   : > { %v3842_v52 = vmax.f32 %v3826_v14, 0.0  ;;  %v3827_v11 = vadd.f32 %v3811_v24, %v3774_v29 }
 0x6df   : > { %v3840_v35 = vmax.f32 %v3824_v1, 0.0  ;;  %v3825_v56 = vadd.f32 %v3809_v34, %v3766_v2  ;;  %v4665_v0 = vpop.f32.mrb[12].mxu0 }
 0x6e0   : > { %3858 = vst [vmem:[%s5287_s28 + $0x50] sm:$0xff] %v3842_v52  ;;  %v3843_v28 = vmax.f32 %v3827_v11, 0.0  ;;  %v3600_v4 = vadd.f32 %v4665_v0, %v6319_v53  ;;  %v3591_v25 = vpop.f32.mrb[13].mxu0 }
 0x6e1   : > { %3856 = vst [vmem:[%s5287_s28 + $0x40] sm:$0xff] %v3840_v35  ;;  %v3841_v17 = vmax.f32 %v3825_v56, 0.0  ;;  %v3592_v20 = vadd.f32 %v3591_v25, %v6319_v53  ;;  %v4666_v59 = vpop.f32.mrb[14].mxu0 }
 0x6e2   : > { %3859 = vst [vmem:[%s5287_s28 + $0x58] sm:$0xff] %v3843_v28  ;;  %v3814_v16 = vmul.f32 %v6323_v21, %v3600_v4  ;;  %v3603_v5 = vadd.f32 %v4666_v59, %v6319_v53  ;;  %v3594_v33 = vpop.f32.mrb[15].mxu0 }
 0x6e3   : > { %3857 = vst [vmem:[%s5287_s28 + $0x48] sm:$0xff] %v3841_v17  ;;  %v3812_v58 = vmul.f32 %v6323_v21, %v3592_v20  ;;  %v3595_v47 = vadd.f32 %v3594_v33, %v6319_v53 }
 0x6e4   : > { %v3830_v26 = vadd.f32 %v3814_v16, %v3787_v30  ;;  %v3815_v51 = vmul.f32 %v6323_v21, %v3603_v5 }
 0x6e5   : > { %v3828_v43 = vadd.f32 %v3812_v58, %v3779_v54  ;;  %v3813_v27 = vmul.f32 %v6323_v21, %v3595_v47 }
 0x6e6   : > { %v3846_v40 = vmax.f32 %v3830_v26, 0.0  ;;  %v3831_v22 = vadd.f32 %v3815_v51, %v3790_v50 }
 0x6e7   : > { %v3844_v32 = vmax.f32 %v3828_v43, 0.0  ;;  %v3829_v18 = vadd.f32 %v3813_v27, %v3782_v31 }
 0x6e8   : > { %3862 = vst [vmem:[%s5287_s28 + $0x70] sm:$0xff] %v3846_v40  ;;  %v3847_v7 = vmax.f32 %v3831_v22, 0.0 }
 0x6e9   : > { %3860 = vst [vmem:[%s5287_s28 + $0x60] sm:$0xff] %v3844_v32  ;;  %v3845_v53 = vmax.f32 %v3829_v18, 0.0 }
 0x6ea   : > { %3863 = vst [vmem:[%s5287_s28 + $0x78] sm:$0xff] %v3847_v7 }
 0x6eb   : > { %3861 = vst [vmem:[%s5287_s28 + $0x68] sm:$0xff] %v3845_v53 }
 0x6ec PF: > { %p3872_p2 = scmp.eq.s32.totalorder %s5061_s13, 2  ;;  %s4183_s19 = sshll.u32 %s5065_s14, 5 }
 0x6ed   : > { %s3882_s20 = sshll.u32 %s5287_s28, 4  ;;  %s6543_s22 = sand.u32 1, %s5049_s10   ;;  %s6409_s20 = int_to_ptr.vmem [resolvable:$true] %s3882_s20 }
 0x6ee   : > { %s6570_s12 = smov (!%p3872_p2, %s5057_s12), 0  ;;  %s6418_s15 = scalar_lea.sflag [#allocation9], %s6543_s22 }
 0x6ef   : > { %s4182_s17 = sshll.u32 %s6570_s12, 4  ;;  %s4967_s13 = scalar_lea.vmem %s6409_s20, 2048 }
 0x6f0   : > { %s3879_s21 = sadd.s32 %s4183_s19, %s4182_s17  ;;  %p4968_p4 = scmp.ne.s32.totalorder %s6409_s20, %s4967_s13 }
 0x6f1   : > { %s4184_s3 = sshll.u32 %s3879_s21, 7  ;;  %p6544_p6 = scmp.ne.s32.totalorder %s6506_s26, 0 }
 0x6f2   : > { %s6414_s23 = scalar_lea.hbm %s6485_s9, %s4184_s3  ;;  %s5093_s14 = smov [#allocation10]  }
 0x6f3   : > { %p4969_p7 = pnand %p4968_p4, %p6544_p6  ;;  %s4971_s28 = sshll.u32 %s5093_s14, 4  ;;  %s4972_s28 = int_to_ptr.vmem [resolvable:$false] %s4971_s28 }
 0x6f4   : > { %s4973_s24 = scalar_lea.vmem %s4972_s28, 4096  ;;  %p4974_p0 = scmp.lt.s32.totalorder %s6409_s20, %s4972_s28 }
 0x6f5   : > { %p4970_p10 = pneg %p4969_p7  ;;  %p4975_p1 = scmp.lt.s32.totalorder %s4973_s24, %s4967_s13 }
 0x6f7   : > { %p4976_p3 = por %p4975_p1, %p4974_p0 }
 0x6f9   : > { %p4977_p5 = pnand %p4976_p3, %p4970_p10 }
 0x6fb   : > { %4980 = shalt.err (!%p4977_p5)
}
 0x6fc   : > { %s4981_s12 = scalar_lea.hbm %s6414_s23, 2048  ;;  %s4985_s17 = scalar_lea.hbm %s6485_s9, 8192 }
 0x6fd   : > { %p4982_p8 = scmp.ne.s32.totalorder %s6414_s23, %s4981_s12  ;;  %p4986_p12 = scmp.lt.u32.totalorder %s6414_s23, %s6485_s9 }
 0x6fe   : > { %p4987_p13 = scmp.lt.u32.totalorder %s4985_s17, %s4981_s12  ;;  %p4989_p4 = scmp.lt.u32.totalorder %s4981_s12, %s6414_s23 }
 0x6ff   : > { %p4983_p9 = pnand %p4982_p8, %p6544_p6 }
 0x700   : > { %p4988_p2 = por %p4987_p13, %p4986_p12 }
 0x701   : > { %p4984_p11 = pneg %p4983_p9 }
 0x702   : > { %p4990_p7 = por %p4989_p4, %p4988_p2 }
 0x704   : > { %p4991_p10 = pnand %p4990_p7, %p4984_p11 }
 0x706   : > { %4994 = shalt.err (!%p4991_p10)
}
 0x707   : > { %s5094_s25 = smov 128   ;;  %s5095_s16 = smov 8  }
 0x708   : > { %4710 = dma.vmem_to_hbm [thread:$0]  (%p6544_p6), %s6409_s20, 2048, %s6414_s23, %s6418_s15, %s5094_s25, %s5094_s25, %s5095_s16  }
 0x709 PF: > { %p4722_p0 = scmp.ge.s32.totalorder %s5081_s18, 2  ;;  %s3897_s22 = sand.u32 1, %s5045_s30  }
 0x70a   : > { %p6545_p1 = scmp.ne.s32.totalorder %s6508_s29, 0  ;;  %s3898_s13 = scalar_lea.sflag [#allocation9], %s3897_s22 }
 0x70c   : > { %p4717_p3 = pnand %p4722_p0, %p6545_p1 }
 0x70e   : > { %5040 = dma.done.wait (!%p4717_p3), %s3898_s13, 2048  }
 0x70f   : > { %5042 = vsyncadd (!%p4717_p3), %s3898_s13, 4294965248  ;;  %s23_s18 = sadd.s32 1, %s5081_s18   ;;  %s6546_s14 = sld [smem:[#allocation19_spill]] }
 0x710   : > { %p20_p5 = scmp.ge.s32.totalorder %s23_s18, 14   ;;  %s6547_s12 = sld [smem:[#allocation13_spill]] }
 0x711   : > { %s6548_s13 = sld [smem:[#allocation14_spill]]  ;;  %s6549_s26 = sld [smem:[#allocation15_spill]] }
 0x712   : > { %s6550_s15 = sld [smem:[#allocation16_spill]]  ;;  %s6551_s16 = sld [smem:[#allocation17_spill]] }
 0x713   : > { %s6552_s17 = sld [smem:[#allocation18_spill]]  ;;  %s6553_s30 = smov %s5049_s10 }
 0x714   : > { %s6554_s10 = smov %s5053_s11  ;;  %22 = sbr.rel (!%p20_p5) target bundleno = 9 (0x9), region = 135 }
 0x715   : > { %s6555_s11 = smov %s6546_s14 }
 0x717   : > { %s6556_s14 = smov %s6549_s26 }
 0x71b   :  { %3903 = vsyncpa [#allocation8], 1 }
 0x71c   :  { %3905 = vsyncpa [#allocation8 + $0x1], 1 }
 0x71d   :  { %3906 = vsyncpa [#allocation9], 1 }
 0x71e   :  { %3908 = vsyncpa [#allocation9 + $0x1], 1 }

</bundles_post_ra>
